<compile_context>
chip_gen: v7x
topology: tpu7x:2x2x1
jax: 0.10.0
libtpu: 0.0.40
codegen_flags: <defaults>
</compile_context>

<pallas_src>
import functools
import math

import jax
import jax.numpy as jnp
from jax import lax
from jax.experimental import pallas as pl
from jax.experimental.pallas import tpu as pltpu

# ---------------- config (small, consistent with the module's dims dicts) ----
B = 2           # batch
N = 8           # dense subgraph nodes
N_EXT = 8       # external (conditioning) graph nodes
F_IN = 4        # input_dims[DIM_X]        (raw ext node features)
DE_EXT = 4      # input_dims[DIM_E] - 1    (raw ext edge features)
DX = 32         # transf_inout_dims[DIM_X]
DE = 16         # transf_inout_dims[DIM_E]
DY = 8          # transf_inout_dims[DIM_Y]
DFF = 64        # transformer FFN hidden
NUM_ITER = 2
NEG = 1e9

BN = B * N
BNE = B * N_EXT
LANES = 128
assert N * DE == LANES and N_EXT * DE == LANES

# -------- data-slab row layout (single lane-dense input slab, (D_ROWS,128)) --
R_E = 0                     # rows 0:16   E (folded, lane-dense)
R_CE = BN                   # rows 16:32  ext_E (folded, lane-dense)
R_PAIR = 2 * BN             # rows 32:48  pair mask (N x N, expanded to DE lanes)
R_CPAIR = 3 * BN            # rows 48:64  cross pair mask
R_MISC = 4 * BN             # rows 64:80  misc16 (see column layout below)
R_MISC8 = 5 * BN            # rows 80:88  misc8  (y, pool selector)
D_ROWS = 5 * BN + 8         # 88

# misc16 column layout
C_X = 0
C_EXTX = C_X + DX                       # 32
C_EXTEF = C_EXTX + F_IN                 # 36
C_ENCB = C_EXTEF + N_EXT * DE_EXT       # 68
C_MSELF = C_ENCB + BNE                  # 84
C_MCROSS = C_MSELF + BN                 # 100
C_NMCOL = C_MCROSS + BNE                # 116
C_MISC_END = C_NMCOL + 1                # 117
assert C_MISC_END <= LANES

# misc8 column layout
C_Y = 0
C_POOL = DY
assert C_POOL + BN <= LANES

# output-slab row layout (single lane-dense output slab, (O_ROWS,128))
RO_E = 0
RO_CE = BN
RO_XY = 2 * BN
O_ROWS = 3 * BN             # 48


# =============================================================================
# Packed-weight layout: one (W_ROWS, 128) f32 slab, every block 8-row aligned.
# Built ONCE (outside the jitted forward) and passed in as an argument.
# =============================================================================
def _round8(n):
    return ((n + 7) // 8) * 8


_W_SHAPES = (
    ("enc_w", F_IN, DX),                    # GAT node projection
    ("enc_a", 2, DX),                       # GAT attention vectors (src,dst)
    ("enc_we2_t", 2 * N_EXT, N_EXT * DE_EXT),   # tiled kron(I, we_enc)^T
    ("wn", DX, 4 * DX),                     # fused Q|K|V|Qc (Q,Qc pre-scaled 1/sqrt(DX))
    ("wext", DX, 2 * DX),                   # fused Kc|Vc projection
    ("we12b_t", 4 * N, N * DE),             # tiled kron(I, we_mul|we_add)^T
    ("we_out2", 2 * N, N * DE),             # tiled kron(I, we_out)
    ("wce12b_t", 4 * N_EXT, N_EXT * DE),    # tiled kron(I, wce_mul|wce_add)^T
    ("wce_out2", 2 * N_EXT, N_EXT * DE),    # tiled kron(I, wce_out)
    ("wy1", DY, DY),                        # y MLP hidden
    ("wy2xy", DY + DX, DY),                 # fused [Wy2 ; Wxy]
    ("wyx", DY, DX),                        # y -> X
    ("w1", DX, DFF),                        # FFN in
    ("w2", DFF, DX),                        # FFN out
)
W_OFF = {}
_off = 0
for _name, _rows, _cols in _W_SHAPES:
    W_OFF[_name] = _off
    _off += _round8(_rows)
W_ROWS = _off        # = 344
W_COLS = 128


def pack_weights(params):
    """Pack all (kron-expanded, pre-scaled) weights into one (W_ROWS, 128) slab.

    Call once when params change; do NOT call per forward pass.
    """
    enc, tr = params["enc"], params["tr"]
    eye_n = jnp.eye(N, dtype=jnp.float32)
    eye_e = jnp.eye(N_EXT, dtype=jnp.float32)
    inv_sqrt = 1.0 / math.sqrt(DX)

    # fold 1/sqrt(DX) into Q and Qc columns
    col_scale = jnp.concatenate(
        [jnp.full((DX,), inv_sqrt), jnp.ones((2 * DX,)), jnp.full((DX,), inv_sqrt)]
    ).astype(jnp.float32)
    wn_scaled = tr["wn"] * col_scale[None, :]

    k_enc = jnp.kron(eye_e, enc["we"][0][None, :])        # (8, 32)
    k_e0 = jnp.kron(eye_n, tr["we"][0][None, :])          # (8, 128)
    k_e1 = jnp.kron(eye_n, tr["we"][1][None, :])
    k_e2 = jnp.kron(eye_n, tr["we"][2][None, :])
    k_c0 = jnp.kron(eye_e, tr["wce"][0][None, :])
    k_c1 = jnp.kron(eye_e, tr["wce"][1][None, :])
    k_c2 = jnp.kron(eye_e, tr["wce"][2][None, :])

    blocks = {
        "enc_w": enc["w"],
        "enc_a": enc["a"],
        "enc_we2_t": jnp.concatenate([k_enc, k_enc], axis=0),
        "wn": wn_scaled,
        "wext": tr["wext"],
        "we12b_t": jnp.concatenate([k_e0, k_e0, k_e1, k_e1], axis=0),
        "we_out2": jnp.concatenate([k_e2, k_e2], axis=0),
        "wce12b_t": jnp.concatenate([k_c0, k_c0, k_c1, k_c1], axis=0),
        "wce_out2": jnp.concatenate([k_c2, k_c2], axis=0),
        "wy1": tr["wy"][:, 0:DY],
        "wy2xy": jnp.concatenate([tr["wy"][:, DY:2 * DY], tr["wxy"]], axis=0),
        "wyx": tr["wyx"],
        "w1": tr["w1"],
        "w2": tr["w2"],
    }
    w = jnp.zeros((W_ROWS, W_COLS), jnp.float32)
    for name, rows, cols in _W_SHAPES:
        blk = blocks[name].astype(jnp.float32)
        assert blk.shape == (rows, cols), (name, blk.shape)
        w = w.at[W_OFF[name]:W_OFF[name] + rows, 0:cols].set(blk)
    return w


# =============================================================================
# Fused kernel: GAT encoder + num_iter conditional graph-transformer layers.
# Single grid step; batch folded into rows; all state stays in vregs/VMEM.
# =============================================================================
def fused_kernel(d_ref, w_ref, o_ref, *, num_iter):

    def W(name, rows, cols):
        off = W_OFF[name]
        return w_ref[off:off + rows, 0:cols]

    # ---------------- unpack the data slab ----------------
    Ef = d_ref[R_E:R_E + BN, :]                       # (16, 128) lane-dense E
    CEf = d_ref[R_CE:R_CE + BN, :]                    # (16, 128) lane-dense ext_E
    pair_mask = d_ref[R_PAIR:R_PAIR + BN, :]          # (16, 128)
    cpair_mask = d_ref[R_CPAIR:R_CPAIR + BN, :]       # (16, 128)
    misc = d_ref[R_MISC:R_MISC + BN, :]               # (16, 128)
    X = misc[:, C_X:C_X + DX]                         # (16, 32)
    ext_x = misc[:, C_EXTX:C_EXTX + F_IN]             # (16, 4)
    extef = misc[:, C_EXTEF:C_EXTEF + N_EXT * DE_EXT]  # (16, 32)
    enc_bias = misc[:, C_ENCB:C_ENCB + BNE]           # (16, 16)
    M_self = misc[:, C_MSELF:C_MSELF + BN]            # (16, 16) block-diag * node_mask
    M_cross = misc[:, C_MCROSS:C_MCROSS + BNE]        # (16, 16) block-diag * ext_mask
    nm_col = misc[:, C_NMCOL:C_NMCOL + 1]             # (16, 1)
    m8 = d_ref[R_MISC8:R_MISC8 + 8, :]
    yv = m8[0:B, C_Y:C_Y + DY]                        # (2, 8)
    pool_sel = m8[0:B, C_POOL:C_POOL + BN]            # (2, 16) masked-mean selector

    # ---------------- external-graph GAT-style node encoder ----------------
    H = jnp.dot(ext_x, W("enc_w", F_IN, DX), preferred_element_type=jnp.float32)
    a_enc = W("enc_a", 2, DX)
    s_src = lax.dot_general(H, a_enc[0:1, :], (((1,), (1,)), ((), ())),
                            preferred_element_type=jnp.float32)          # (16, 1)
    s_dst = lax.dot_general(a_enc[1:2, :], H, (((1,), (1,)), ((), ())),
                            preferred_element_type=jnp.float32)          # (1, 16)
    e_edge = lax.dot_general(extef, W("enc_we2_t", 2 * N_EXT, N_EXT * DE_EXT),
                             (((1,), (1,)), ((), ())),
                             preferred_element_type=jnp.float32)         # (16, 16)
    z = s_src + s_dst + e_edge
    z = jnp.where(z > 0, z, 0.2 * z)                                     # LeakyReLU(0.2)
    z = z + enc_bias                                                     # block-diag adj mask
    z = z - jnp.max(z, axis=-1, keepdims=True)
    pz = jnp.exp(z)
    alpha = pz * pl.reciprocal(jnp.sum(pz, axis=-1, keepdims=True), approx=False)
    XE = jnp.dot(alpha, H, preferred_element_type=jnp.float32)           # (16, 32)

    # ---------------- loop-invariant transformer prep ----------------
    key_bias = (M_self - 1.0) * NEG                   # (16, 16)
    ckey_bias = (M_cross - 1.0) * NEG                 # (16, 16)

    wn = W("wn", DX, 4 * DX)
    we12b_t = W("we12b_t", 4 * N, N * DE)
    we_out2 = W("we_out2", 2 * N, N * DE)
    wce12b_t = W("wce12b_t", 4 * N_EXT, N_EXT * DE)
    wce_out2 = W("wce_out2", 2 * N_EXT, N_EXT * DE)
    wy1 = W("wy1", DY, DY)
    wy2xy = W("wy2xy", DY + DX, DY)
    wyx = W("wyx", DY, DX)
    w1 = W("w1", DX, DFF)
    w2 = W("w2", DFF, DX)

    # cross-attention K/V are loop-invariant (ext_X fixed across iterations)
    KVc = jnp.dot(XE, W("wext", DX, 2 * DX), preferred_element_type=jnp.float32)
    Kc = KVc[:, 0:DX]
    Vc = KVc[:, DX:2 * DX]

    # ---------------- num_iter conditional transformer layers ----------------
    for _ in range(num_iter):
        # fused Q|K|V|Qc projection (Q, Qc already carry the 1/sqrt(DX) scale)
        QKV = jnp.dot(X, wn, preferred_element_type=jnp.float32)        # (16, 128)
        Q = QKV[:, 0:DX]
        K = QKV[:, DX:2 * DX]
        V = QKV[:, 2 * DX:3 * DX]
        Qc = QKV[:, 3 * DX:4 * DX]

        # ---- edge-modulated self attention (batch-block-diagonal) ----
        S = lax.dot_general(Q, K, (((1,), (1,)), ((), ())),
                            preferred_element_type=jnp.float32)          # (16, 16)
        E12 = lax.dot_general(Ef, we12b_t, (((1,), (1,)), ((), ())),
                              preferred_element_type=jnp.float32)        # (16, 32)
        Ym = (S * (E12[:, 0:2 * N] + 1.0) + E12[:, 2 * N:4 * N]) * M_self
        Ef = (Ef + jnp.dot(Ym, we_out2, preferred_element_type=jnp.float32)) * pair_mask

        logit = Ym + key_bias
        logit = logit - jnp.max(logit, axis=-1, keepdims=True)
        pe = jnp.exp(logit)
        attn = pe * pl.reciprocal(jnp.sum(pe, axis=-1, keepdims=True), approx=False)

        # ---- cross attention to external nodes, modulated by ext edges ----
        Sc = lax.dot_general(Qc, Kc, (((1,), (1,)), ((), ())),
                             preferred_element_type=jnp.float32)         # (16, 16)
        C12 = lax.dot_general(CEf, wce12b_t, (((1,), (1,)), ((), ())),
                              preferred_element_type=jnp.float32)        # (16, 32)
        Yc = (Sc * (C12[:, 0:2 * N_EXT] + 1.0) + C12[:, 2 * N_EXT:4 * N_EXT]) * M_cross
        CEf = (CEf + jnp.dot(Yc, wce_out2, preferred_element_type=jnp.float32)) * cpair_mask

        clogit = Yc + ckey_bias
        clogit = clogit - jnp.max(clogit, axis=-1, keepdims=True)
        pc = jnp.exp(clogit)
        attn_c = pc * pl.reciprocal(jnp.sum(pc, axis=-1, keepdims=True), approx=False)

        # ---- fused self+cross value matmul: [attn | attn_c] @ [V ; Vc] ----
        attn_all = jnp.concatenate([attn, attn_c], axis=1)               # (16, 32)
        VVc = jnp.concatenate([V, Vc], axis=0)                           # (32, 32)
        X_sc = jnp.dot(attn_all, VVc, preferred_element_type=jnp.float32)   # X_self + X_cross

        # ---- global (y) update: masked mean-pool (via pool selector) + MLP ----
        pool_attn = jnp.dot(pool_sel, attn, preferred_element_type=jnp.float32)   # (2, 16)
        Xpool = jnp.dot(pool_attn, V, preferred_element_type=jnp.float32)          # (2, 32)
        h_y = jnp.maximum(jnp.dot(yv, wy1, preferred_element_type=jnp.float32), 0.0)
        yv = yv + jnp.dot(jnp.concatenate([h_y, Xpool], axis=1), wy2xy,
                          preferred_element_type=jnp.float32)                       # (2, 8)

        # ---- node update (residual, y-conditioned) + FFN ----
        yx_small = jnp.dot(yv, wyx, preferred_element_type=jnp.float32)             # (2, 32)
        yx = jnp.concatenate(
            [jnp.broadcast_to(yx_small[b:b + 1, :], (N, DX)) for b in range(B)], axis=0)
        X_upd = X + X_sc + yx
        Hff = jnp.maximum(jnp.dot(X_upd, w1, preferred_element_type=jnp.float32), 0.0)
        X = (X_upd + jnp.dot(Hff, w2, preferred_element_type=jnp.float32)) * nm_col

    # ---------------- pack outputs into one lane-dense slab ----------------
    y_bcast = jnp.concatenate(
        [jnp.broadcast_to(yv[b:b + 1, :], (N, DY)) for b in range(B)], axis=0)      # (16, 8)
    xy = jnp.concatenate(
        [X, y_bcast, jnp.zeros((BN, LANES - DX - DY), jnp.float32)], axis=1)        # (16, 128)
    o_ref[RO_E:RO_E + BN, :] = Ef
    o_ref[RO_CE:RO_CE + BN, :] = CEf
    o_ref[RO_XY:RO_XY + BN, :] = xy


# =============================================================================
# ConditionalGraphTransformer.forward (single fused pallas_call, batch folded)
# =============================================================================
@functools.partial(jax.jit, static_argnames=("num_iter",))
def cond_graph_transformer_forward(w_packed, X, E, y, ext_E,
                                   ext_x, adj, ext_ef,
                                   node_mask, ext_node_mask, num_iter):
    f32 = jnp.float32

    # ---- fold batch into rows; build the single lane-dense data slab ----
    E_f = E.reshape(BN, N * DE).astype(f32)                              # (16, 128)
    extE_f = ext_E.reshape(BN, N_EXT * DE).astype(f32)                   # (16, 128)
    extef_f = ext_ef.reshape(BNE, N_EXT * DE_EXT).astype(f32)            # (16, 32)
    extx_f = ext_x.reshape(BNE, F_IN).astype(f32)                        # (16, 4)
    X_f = X.reshape(BN, DX).astype(f32)                                  # (16, 32)

    nmflat = node_mask.reshape(BN).astype(f32)
    emflat = ext_node_mask.reshape(BNE).astype(f32)

    # batch block-diagonal masks (queries attend only within their batch block)
    BB_n = jnp.kron(jnp.eye(B, dtype=f32), jnp.ones((N, N), f32))        # (16, 16)
    BB_c = jnp.kron(jnp.eye(B, dtype=f32), jnp.ones((N, N_EXT), f32))    # (16, 16)
    M_self = BB_n * nmflat[None, :]
    M_cross = BB_c * emflat[None, :]

    # block-diagonal adjacency -> encoder additive bias
    A_bd = jnp.einsum("bij,bc->bicj", adj.astype(f32),
                      jnp.eye(B, dtype=f32)).reshape(BNE, BNE)
    enc_bias = (A_bd - 1.0) * NEG

    # pair masks expanded to the lane-dense DE layout
    nm_col = nmflat[:, None]
    nm_rows = jnp.repeat(node_mask.astype(f32), N, axis=0)               # (16, 8)
    em_rows = jnp.repeat(ext_node_mask.astype(f32), N, axis=0)           # (16, 8)
    pair_mask = nm_col * jnp.repeat(nm_rows, DE, axis=1)                 # (16, 128)
    cpair_mask = nm_col * jnp.repeat(em_rows, DE, axis=1)                # (16, 128)

    # per-batch masked-mean pooling selector (2, 16)
    nm_f = node_mask.astype(f32)
    pool_block = nm_f / jnp.sum(nm_f, axis=1, keepdims=True)             # (B, N)
    pool_sel = (jnp.eye(B, dtype=f32)[:, :, None] * pool_block[None, :, :]).reshape(B, BN)

    misc16 = jnp.concatenate(
        [X_f, extx_f, extef_f, enc_bias, M_self, M_cross, nm_col,
         jnp.zeros((BN, LANES - C_MISC_END), f32)], axis=1)              # (16, 128)
    misc8_top = jnp.concatenate(
        [y.astype(f32), pool_sel, jnp.zeros((B, LANES - DY - BN), f32)], axis=1)
    misc8 = jnp.concatenate([misc8_top, jnp.zeros((8 - B, LANES), f32)], axis=0)

    data = jnp.concatenate(
        [E_f, extE_f, pair_mask, cpair_mask, misc16, misc8], axis=0)     # (88, 128)

    out = pl.pallas_call(
        functools.partial(fused_kernel, num_iter=num_iter),
        out_shape=jax.ShapeDtypeStruct((O_ROWS, LANES), f32),
        grid=(1,),
        in_specs=[
            pl.BlockSpec((D_ROWS, LANES), lambda i: (0, 0)),
            pl.BlockSpec((W_ROWS, W_COLS), lambda i: (0, 0)),
        ],
        out_specs=pl.BlockSpec((O_ROWS, LANES), lambda i: (0, 0)),
        compiler_params=pltpu.CompilerParams(
            dimension_semantics=("arbitrary",)),
    )(data, w_packed)

    Eo = out[RO_E:RO_E + BN, :].reshape(B, N, N, DE)
    extEo = out[RO_CE:RO_CE + BN, :].reshape(B, N, N_EXT, DE)
    Xo = out[RO_XY:RO_XY + BN, 0:DX].reshape(B, N, DX)
    yo = out[RO_XY:RO_XY + BN, DX:DX + DY].reshape(B, N, DY)[:, 0, :]
    return Xo, Eo, yo, extEo


# =============================================================================
# Pure-JAX reference (same math, un-fused / 4-D layouts) for validation
# =============================================================================
def _leaky(x):
    return jnp.where(x > 0, x, 0.2 * x)


def ref_encoder(p, x, adj, ef):
    H = x @ p["w"]
    s_src = jnp.einsum("bnd,d->bn", H, p["a"][0])[:, :, None]
    s_dst = jnp.einsum("bnd,d->bn", H, p["a"][1])[:, None, :]
    e_edge = jnp.sum(ef * p["we"][0][None, None, None, :], axis=-1)
    z = _leaky(s_src + s_dst + e_edge) + (adj - 1.0) * NEG
    alpha = jax.nn.softmax(z, axis=-1)
    return jnp.einsum("bij,bjd->bid", alpha, H)


def ref_layer(p, X, E, y, XE, CE, nm, em):
    Wq, Wk, Wv, Wqc = (p["wn"][:, :DX], p["wn"][:, DX:2 * DX],
                       p["wn"][:, 2 * DX:3 * DX], p["wn"][:, 3 * DX:])
    Wkc, Wvc = p["wext"][:, :DX], p["wext"][:, DX:]
    Q, K, V = X @ Wq, X @ Wk, X @ Wv
    S = jnp.einsum("bid,bjd->bij", Q, K) / math.sqrt(DX)
    E1 = jnp.sum(E * p["we"][0][None, None, None, :], axis=-1)
    E2 = jnp.sum(E * p["we"][1][None, None, None, :], axis=-1)
    Ym = S * (E1 + 1.0) + E2
    pair = nm[:, :, None] * nm[:, None, :]
    newE = (E + Ym[..., None] * p["we"][2][None, None, None, :]) * pair[..., None]
    attn = jax.nn.softmax(Ym + (nm[:, None, :] - 1.0) * NEG, axis=-1)
    X_self = jnp.einsum("bij,bjd->bid", attn, V)

    Qc, Kc, Vc = X @ Wqc, XE @ Wkc, XE @ Wvc
    Sc = jnp.einsum("bid,bkd->bik", Qc, Kc) / math.sqrt(DX)
    C1 = jnp.sum(CE * p["wce"][0][None, None, None, :], axis=-1)
    C2 = jnp.sum(CE * p["wce"][1][None, None, None, :], axis=-1)
    Yc = Sc * (C1 + 1.0) + C2
    cpair = nm[:, :, None] * em[:, None, :]
    newCE = (CE + Yc[..., None] * p["wce"][2][None, None, None, :]) * cpair[..., None]
    attn_c = jax.nn.softmax(Yc + (em[:, None, :] - 1.0) * NEG, axis=-1)
    X_cross = jnp.einsum("bik,bkd->bid", attn_c, Vc)

    Wy1, Wy2 = p["wy"][:, :DY], p["wy"][:, DY:]
    n_valid = jnp.sum(nm, axis=-1, keepdims=True)
    Xpool = jnp.sum(X_self * nm[:, :, None], axis=1) / n_valid
    y_new = y + jnp.maximum(y @ Wy1, 0.0) @ Wy2 + Xpool @ p["wxy"]

    X_upd = X + X_self + X_cross + (y_new @ p["wyx"])[:, None, :]
    Hff = jnp.maximum(X_upd @ p["w1"], 0.0)
    X_out = (X_upd + Hff @ p["w2"]) * nm[:, :, None]
    return X_out, newE, y_new, newCE


def ref_forward(params, X, E, y, ext_E, ext_x, adj, ext_ef, nm, em, num_iter):
    XE = ref_encoder(params["enc"], ext_x, adj, ext_ef)
    for _ in range(num_iter):
        X, E, y, ext_E = ref_layer(params["tr"], X, E, y, XE, ext_E, nm, em)
    return X, E, y, ext_E


# =============================================================================
# Deterministic parameter / input construction
# =============================================================================
def init_params(key):
    ks = jax.random.split(key, 12)
    enc = {
        "w": jax.random.normal(ks[0], (F_IN, DX), jnp.float32) / math.sqrt(F_IN),
        "a": jax.random.normal(ks[1], (2, DX), jnp.float32) / math.sqrt(DX),
        "we": jax.random.normal(ks[2], (1, DE_EXT), jnp.float32) / math.sqrt(DE_EXT),
    }
    tr = {
        "wn": jax.random.normal(ks[3], (DX, 4 * DX), jnp.float32) / math.sqrt(DX),
        "wext": jax.random.normal(ks[4], (DX, 2 * DX), jnp.float32) / math.sqrt(DX),
        "we": jax.random.normal(ks[5], (3, DE), jnp.float32) / math.sqrt(DE),
        "wce": jax.random.normal(ks[6], (3, DE), jnp.float32) / math.sqrt(DE),
        "wy": jax.random.normal(ks[7], (DY, 2 * DY), jnp.float32) / math.sqrt(DY),
        "wxy": jax.random.normal(ks[8], (DX, DY), jnp.float32) / math.sqrt(DX),
        "wyx": jax.random.normal(ks[9], (DY, DX), jnp.float32) / math.sqrt(DY),
        "w1": jax.random.normal(ks[10], (DX, DFF), jnp.float32) / math.sqrt(DX),
        "w2": jax.random.normal(ks[11], (DFF, DX), jnp.float32) / math.sqrt(DFF),
    }
    return {"enc": enc, "tr": tr}


if __name__ == "__main__":
    key = jax.random.PRNGKey(0)
    kp, kd = jax.random.split(key)
    params = init_params(kp)
    ks = jax.random.split(kd, 8)

    X = jax.random.normal(ks[0], (B, N, DX), jnp.float32)
    E = jax.random.normal(ks[1], (B, N, N, DE), jnp.float32)
    E = 0.5 * (E + jnp.swapaxes(E, 1, 2))                       # symmetric edges
    y = jax.random.normal(ks[2], (B, DY), jnp.float32)
    ext_x = jax.random.normal(ks[3], (B, N_EXT, F_IN), jnp.float32)
    ext_ef = jax.random.normal(ks[4], (B, N_EXT, N_EXT, DE_EXT), jnp.float32)
    ext_E = jax.random.normal(ks[5], (B, N, N_EXT, DE), jnp.float32)

    adj = (jax.random.uniform(ks[6], (B, N_EXT, N_EXT)) > 0.5).astype(jnp.float32)
    adj = jnp.maximum(adj, jnp.swapaxes(adj, 1, 2))
    adj = jnp.maximum(adj, jnp.eye(N_EXT, dtype=jnp.float32)[None])  # self loops

    node_mask = jnp.ones((B, N), jnp.float32).at[1, N - 1].set(0.0)
    ext_node_mask = jnp.ones((B, N_EXT), jnp.float32).at[1, N_EXT - 1].set(0.0)

    # Pack weights ONCE, outside the jitted forward (amortized across calls).
    w_packed = pack_weights(params)
    jax.block_until_ready(w_packed)

    # full-f32 matmuls on both kernel and reference so the check can be tight
    with jax.default_matmul_precision("float32"):
        # ---- Pallas fused forward ----
        Xo, Eo, yo, ext_Eo = cond_graph_transformer_forward(
            w_packed, X, E, y, ext_E, ext_x, adj, ext_ef,
            node_mask, ext_node_mask, num_iter=NUM_ITER)
        jax.block_until_ready((Xo, Eo, yo, ext_Eo))

        # ---- reference check ----
        Xr, Er, yr, ext_Er = ref_forward(
            params, X, E, y, ext_E, ext_x, adj, ext_ef,
            node_mask, ext_node_mask, NUM_ITER)

        for a, b in ((Xo, Xr), (Eo, Er), (yo, yr), (ext_Eo, ext_Er)):
            assert a.shape == b.shape and a.dtype == b.dtype
            assert bool(jnp.allclose(a, b, rtol=1e-4, atol=1e-4)), \
                f"mismatch: max abs diff {float(jnp.max(jnp.abs(a - b)))}"

    print("KERNEL_OK")
</pallas_src>

<mosaic_0001>
module attributes {stable_mosaic.version = 11 : i64} {
  func.func @fused_kernel(%arg0: i32, %arg1: memref<88x128xf32, #tpu.memory_space<vmem>>, %arg2: memref<344x128xf32, #tpu.memory_space<vmem>>, %arg3: memref<48x128xf32, #tpu.memory_space<vmem>>) attributes {dimension_semantics = [#tpu.dimension_semantics<arbitrary>], iteration_bounds = array<i64: 1>, scalar_prefetch = 0 : i64, scratch_operands = 0 : i64, tpu.core_type = #tpu.core_type<tc>, window_params = [{pipeline_mode = #tpu.pipeline_mode<synchronous>, transform_indices = @transform_0, window_bounds = array<i64: 88, 128>}, {pipeline_mode = #tpu.pipeline_mode<synchronous>, transform_indices = @transform_1, window_bounds = array<i64: 344, 128>}, {pipeline_mode = #tpu.pipeline_mode<synchronous>, transform_indices = @transform_2, window_bounds = array<i64: 48, 128>}]} {
    %c0 = arith.constant 0 : index
    %c0_0 = arith.constant 0 : index
    %0 = vector.load %arg1[%c0, %c0_0] : memref<88x128xf32, #tpu.memory_space<vmem>>, vector<16x128xf32>
    %c16 = arith.constant 16 : index
    %c0_1 = arith.constant 0 : index
    %1 = vector.load %arg1[%c16, %c0_1] : memref<88x128xf32, #tpu.memory_space<vmem>>, vector<16x128xf32>
    %c32 = arith.constant 32 : index
    %c0_2 = arith.constant 0 : index
    %2 = vector.load %arg1[%c32, %c0_2] : memref<88x128xf32, #tpu.memory_space<vmem>>, vector<16x128xf32>
    %c48 = arith.constant 48 : index
    %c0_3 = arith.constant 0 : index
    %3 = vector.load %arg1[%c48, %c0_3] : memref<88x128xf32, #tpu.memory_space<vmem>>, vector<16x128xf32>
    %c64 = arith.constant 64 : index
    %c0_4 = arith.constant 0 : index
    %4 = vector.load %arg1[%c64, %c0_4] : memref<88x128xf32, #tpu.memory_space<vmem>>, vector<16x128xf32>
    %5 = vector.extract_strided_slice %4 {offsets = [0, 0], sizes = [16, 32], strides = [1, 1]} : vector<16x128xf32> to vector<16x32xf32>
    %6 = vector.extract_strided_slice %4 {offsets = [0, 32], sizes = [16, 4], strides = [1, 1]} : vector<16x128xf32> to vector<16x4xf32>
    %7 = vector.extract_strided_slice %4 {offsets = [0, 36], sizes = [16, 32], strides = [1, 1]} : vector<16x128xf32> to vector<16x32xf32>
    %8 = vector.extract_strided_slice %4 {offsets = [0, 68], sizes = [16, 16], strides = [1, 1]} : vector<16x128xf32> to vector<16x16xf32>
    %9 = vector.extract_strided_slice %4 {offsets = [0, 84], sizes = [16, 16], strides = [1, 1]} : vector<16x128xf32> to vector<16x16xf32>
    %10 = vector.extract_strided_slice %4 {offsets = [0, 100], sizes = [16, 16], strides = [1, 1]} : vector<16x128xf32> to vector<16x16xf32>
    %11 = vector.extract_strided_slice %4 {offsets = [0, 116], sizes = [16, 1], strides = [1, 1]} : vector<16x128xf32> to vector<16x1xf32>
    %c80 = arith.constant 80 : index
    %c0_5 = arith.constant 0 : index
    %12 = vector.load %arg1[%c80, %c0_5] : memref<88x128xf32, #tpu.memory_space<vmem>>, vector<8x128xf32>
    %13 = vector.extract_strided_slice %12 {offsets = [0, 0], sizes = [2, 8], strides = [1, 1]} : vector<8x128xf32> to vector<2x8xf32>
    %14 = vector.extract_strided_slice %12 {offsets = [0, 8], sizes = [2, 16], strides = [1, 1]} : vector<8x128xf32> to vector<2x16xf32>
    %c0_6 = arith.constant 0 : index
    %c0_7 = arith.constant 0 : index
    %15 = vector.load %arg2[%c0_6, %c0_7] : memref<344x128xf32, #tpu.memory_space<vmem>>, vector<4x32xf32>
    %cst = arith.constant dense<0.000000e+00> : vector<16x32xf32>
    %16 = tpu.matmul %6, %15, %cst {dimension_numbers = #tpu.dot_dimension_numbers<[1], [0], [0], [1], [0, 0, 1, 1], [], []>, precision = #tpu.contract_precision<fp32>} : vector<16x4xf32>, vector<4x32xf32>, vector<16x32xf32> -> vector<16x32xf32>
    %c8 = arith.constant 8 : index
    %c0_8 = arith.constant 0 : index
    %17 = vector.load %arg2[%c8, %c0_8] : memref<344x128xf32, #tpu.memory_space<vmem>>, vector<2x32xf32>
    %18 = vector.extract_strided_slice %17 {offsets = [0, 0], sizes = [1, 32], strides = [1, 1]} : vector<2x32xf32> to vector<1x32xf32>
    %cst_9 = arith.constant dense<0.000000e+00> : vector<16x1xf32>
    %19 = tpu.matmul %16, %18, %cst_9 {dimension_numbers = #tpu.dot_dimension_numbers<[1], [1], [0], [0], [0, 0, 1, 0], [], []>, precision = #tpu.contract_precision<fp32>} : vector<16x32xf32>, vector<1x32xf32>, vector<16x1xf32> -> vector<16x1xf32>
    %20 = vector.extract_strided_slice %17 {offsets = [1, 0], sizes = [1, 32], strides = [1, 1]} : vector<2x32xf32> to vector<1x32xf32>
    %cst_10 = arith.constant dense<0.000000e+00> : vector<1x16xf32>
    %21 = tpu.matmul %20, %16, %cst_10 {dimension_numbers = #tpu.dot_dimension_numbers<[1], [1], [0], [0], [0, 0, 1, 0], [], []>, precision = #tpu.contract_precision<fp32>} : vector<1x32xf32>, vector<16x32xf32>, vector<1x16xf32> -> vector<1x16xf32>
    %c16_11 = arith.constant 16 : index
    %c0_12 = arith.constant 0 : index
    %22 = vector.load %arg2[%c16_11, %c0_12] : memref<344x128xf32, #tpu.memory_space<vmem>>, vector<16x32xf32>
    %cst_13 = arith.constant dense<0.000000e+00> : vector<16x16xf32>
    %23 = tpu.matmul %7, %22, %cst_13 {dimension_numbers = #tpu.dot_dimension_numbers<[1], [1], [0], [0], [0, 0, 1, 0], [], []>, precision = #tpu.contract_precision<fp32>} : vector<16x32xf32>, vector<16x32xf32>, vector<16x16xf32> -> vector<16x16xf32>
    %24 = vector.broadcast %19 : vector<16x1xf32> to vector<16x16xf32>
    %25 = vector.broadcast %21 : vector<1x16xf32> to vector<16x16xf32>
    %26 = arith.addf %24, %25 : vector<16x16xf32>
    %27 = arith.addf %26, %23 : vector<16x16xf32>
    %cst_14 = arith.constant 0.000000e+00 : f32
    %28 = vector.broadcast %cst_14 : f32 to vector<16x16xf32>
    %29 = arith.cmpf ogt, %27, %28 : vector<16x16xf32>
    %cst_15 = arith.constant 2.000000e-01 : f32
    %30 = vector.broadcast %cst_15 : f32 to vector<16x16xf32>
    %31 = arith.mulf %30, %27 : vector<16x16xf32>
    %32 = arith.select %29, %27, %31 : vector<16x16xi1>, vector<16x16xf32>
    %33 = arith.addf %32, %8 : vector<16x16xf32>
    %cst_16 = arith.constant dense<0xFF800000> : vector<16xf32>
    %34 = vector.multi_reduction <maximumf>, %33, %cst_16 [1] : vector<16x16xf32> to vector<16xf32>
    %35 = vector.shape_cast %34 : vector<16xf32> to vector<16x1xf32>
    %36 = vector.broadcast %35 : vector<16x1xf32> to vector<16x16xf32>
    %37 = arith.subf %33, %36 : vector<16x16xf32>
    %38 = math.exp %37 : vector<16x16xf32>
    %cst_17 = arith.constant dense<0.000000e+00> : vector<16xf32>
    %39 = vector.multi_reduction <add>, %38, %cst_17 [1] : vector<16x16xf32> to vector<16xf32>
    %40 = vector.shape_cast %39 : vector<16xf32> to vector<16x1xf32>
    %41 = tpu.reciprocal %40 : vector<16x1xf32> -> vector<16x1xf32>
    %42 = vector.broadcast %41 : vector<16x1xf32> to vector<16x16xf32>
    %43 = arith.mulf %38, %42 : vector<16x16xf32>
    %cst_18 = arith.constant dense<0.000000e+00> : vector<16x32xf32>
    %44 = tpu.matmul %43, %16, %cst_18 {dimension_numbers = #tpu.dot_dimension_numbers<[1], [0], [0], [1], [0, 0, 1, 1], [], []>, precision = #tpu.contract_precision<fp32>} : vector<16x16xf32>, vector<16x32xf32>, vector<16x32xf32> -> vector<16x32xf32>
    %cst_19 = arith.constant 1.000000e+00 : f32
    %45 = vector.broadcast %cst_19 : f32 to vector<16x16xf32>
    %46 = arith.subf %9, %45 : vector<16x16xf32>
    %cst_20 = arith.constant 1.000000e+09 : f32
    %47 = vector.broadcast %cst_20 : f32 to vector<16x16xf32>
    %48 = arith.mulf %46, %47 : vector<16x16xf32>
    %cst_21 = arith.constant 1.000000e+00 : f32
    %49 = vector.broadcast %cst_21 : f32 to vector<16x16xf32>
    %50 = arith.subf %10, %49 : vector<16x16xf32>
    %cst_22 = arith.constant 1.000000e+09 : f32
    %51 = vector.broadcast %cst_22 : f32 to vector<16x16xf32>
    %52 = arith.mulf %50, %51 : vector<16x16xf32>
    %c32_23 = arith.constant 32 : index
    %c0_24 = arith.constant 0 : index
    %53 = vector.load %arg2[%c32_23, %c0_24] : memref<344x128xf32, #tpu.memory_space<vmem>>, vector<32x128xf32>
    %c96 = arith.constant 96 : index
    %c0_25 = arith.constant 0 : index
    %54 = vector.load %arg2[%c96, %c0_25] : memref<344x128xf32, #tpu.memory_space<vmem>>, vector<32x128xf32>
    %c128 = arith.constant 128 : index
    %c0_26 = arith.constant 0 : index
    %55 = vector.load %arg2[%c128, %c0_26] : memref<344x128xf32, #tpu.memory_space<vmem>>, vector<16x128xf32>
    %c144 = arith.constant 144 : index
    %c0_27 = arith.constant 0 : index
    %56 = vector.load %arg2[%c144, %c0_27] : memref<344x128xf32, #tpu.memory_space<vmem>>, vector<32x128xf32>
    %c176 = arith.constant 176 : index
    %c0_28 = arith.constant 0 : index
    %57 = vector.load %arg2[%c176, %c0_28] : memref<344x128xf32, #tpu.memory_space<vmem>>, vector<16x128xf32>
    %c192 = arith.constant 192 : index
    %c0_29 = arith.constant 0 : index
    %58 = vector.load %arg2[%c192, %c0_29] : memref<344x128xf32, #tpu.memory_space<vmem>>, vector<8x8xf32>
    %c200 = arith.constant 200 : index
    %c0_30 = arith.constant 0 : index
    %59 = vector.load %arg2[%c200, %c0_30] : memref<344x128xf32, #tpu.memory_space<vmem>>, vector<40x8xf32>
    %c240 = arith.constant 240 : index
    %c0_31 = arith.constant 0 : index
    %60 = vector.load %arg2[%c240, %c0_31] : memref<344x128xf32, #tpu.memory_space<vmem>>, vector<8x32xf32>
    %c248 = arith.constant 248 : index
    %c0_32 = arith.constant 0 : index
    %61 = vector.load %arg2[%c248, %c0_32] : memref<344x128xf32, #tpu.memory_space<vmem>>, vector<32x64xf32>
    %c280 = arith.constant 280 : index
    %c0_33 = arith.constant 0 : index
    %62 = vector.load %arg2[%c280, %c0_33] : memref<344x128xf32, #tpu.memory_space<vmem>>, vector<64x32xf32>
    %c64_34 = arith.constant 64 : index
    %c0_35 = arith.constant 0 : index
    %63 = vector.load %arg2[%c64_34, %c0_35] : memref<344x128xf32, #tpu.memory_space<vmem>>, vector<32x64xf32>
    %cst_36 = arith.constant dense<0.000000e+00> : vector<16x64xf32>
    %64 = tpu.matmul %44, %63, %cst_36 {dimension_numbers = #tpu.dot_dimension_numbers<[1], [0], [0], [1], [0, 0, 1, 1], [], []>, precision = #tpu.contract_precision<fp32>} : vector<16x32xf32>, vector<32x64xf32>, vector<16x64xf32> -> vector<16x64xf32>
    %65 = vector.extract_strided_slice %64 {offsets = [0, 0], sizes = [16, 32], strides = [1, 1]} : vector<16x64xf32> to vector<16x32xf32>
    %66 = vector.extract_strided_slice %64 {offsets = [0, 32], sizes = [16, 32], strides = [1, 1]} : vector<16x64xf32> to vector<16x32xf32>
    %cst_37 = arith.constant dense<0.000000e+00> : vector<16x128xf32>
    %67 = tpu.matmul %5, %53, %cst_37 {dimension_numbers = #tpu.dot_dimension_numbers<[1], [0], [0], [1], [0, 0, 1, 1], [], []>, precision = #tpu.contract_precision<fp32>} : vector<16x32xf32>, vector<32x128xf32>, vector<16x128xf32> -> vector<16x128xf32>
    %68 = vector.extract_strided_slice %67 {offsets = [0, 0], sizes = [16, 32], strides = [1, 1]} : vector<16x128xf32> to vector<16x32xf32>
    %69 = vector.extract_strided_slice %67 {offsets = [0, 32], sizes = [16, 32], strides = [1, 1]} : vector<16x128xf32> to vector<16x32xf32>
    %70 = vector.extract_strided_slice %67 {offsets = [0, 64], sizes = [16, 32], strides = [1, 1]} : vector<16x128xf32> to vector<16x32xf32>
    %71 = vector.extract_strided_slice %67 {offsets = [0, 96], sizes = [16, 32], strides = [1, 1]} : vector<16x128xf32> to vector<16x32xf32>
    %cst_38 = arith.constant dense<0.000000e+00> : vector<16x16xf32>
    %72 = tpu.matmul %68, %69, %cst_38 {dimension_numbers = #tpu.dot_dimension_numbers<[1], [1], [0], [0], [0, 0, 1, 0], [], []>, precision = #tpu.contract_precision<fp32>} : vector<16x32xf32>, vector<16x32xf32>, vector<16x16xf32> -> vector<16x16xf32>
    %cst_39 = arith.constant dense<0.000000e+00> : vector<16x32xf32>
    %73 = tpu.matmul %0, %54, %cst_39 {dimension_numbers = #tpu.dot_dimension_numbers<[1], [1], [0], [0], [0, 0, 1, 0], [], []>, precision = #tpu.contract_precision<fp32>} : vector<16x128xf32>, vector<32x128xf32>, vector<16x32xf32> -> vector<16x32xf32>
    %74 = vector.extract_strided_slice %73 {offsets = [0, 0], sizes = [16, 16], strides = [1, 1]} : vector<16x32xf32> to vector<16x16xf32>
    %cst_40 = arith.constant 1.000000e+00 : f32
    %75 = vector.broadcast %cst_40 : f32 to vector<16x16xf32>
    %76 = arith.addf %74, %75 : vector<16x16xf32>
    %77 = arith.mulf %72, %76 : vector<16x16xf32>
    %78 = vector.extract_strided_slice %73 {offsets = [0, 16], sizes = [16, 16], strides = [1, 1]} : vector<16x32xf32> to vector<16x16xf32>
    %79 = arith.addf %77, %78 : vector<16x16xf32>
    %80 = arith.mulf %79, %9 : vector<16x16xf32>
    %cst_41 = arith.constant dense<0.000000e+00> : vector<16x128xf32>
    %81 = tpu.matmul %80, %55, %cst_41 {dimension_numbers = #tpu.dot_dimension_numbers<[1], [0], [0], [1], [0, 0, 1, 1], [], []>, precision = #tpu.contract_precision<fp32>} : vector<16x16xf32>, vector<16x128xf32>, vector<16x128xf32> -> vector<16x128xf32>
    %82 = arith.addf %0, %81 : vector<16x128xf32>
    %83 = arith.mulf %82, %2 : vector<16x128xf32>
    %84 = arith.addf %80, %48 : vector<16x16xf32>
    %cst_42 = arith.constant dense<0xFF800000> : vector<16xf32>
    %85 = vector.multi_reduction <maximumf>, %84, %cst_42 [1] : vector<16x16xf32> to vector<16xf32>
    %86 = vector.shape_cast %85 : vector<16xf32> to vector<16x1xf32>
    %87 = vector.broadcast %86 : vector<16x1xf32> to vector<16x16xf32>
    %88 = arith.subf %84, %87 : vector<16x16xf32>
    %89 = math.exp %88 : vector<16x16xf32>
    %cst_43 = arith.constant dense<0.000000e+00> : vector<16xf32>
    %90 = vector.multi_reduction <add>, %89, %cst_43 [1] : vector<16x16xf32> to vector<16xf32>
    %91 = vector.shape_cast %90 : vector<16xf32> to vector<16x1xf32>
    %92 = tpu.reciprocal %91 : vector<16x1xf32> -> vector<16x1xf32>
    %93 = vector.broadcast %92 : vector<16x1xf32> to vector<16x16xf32>
    %94 = arith.mulf %89, %93 : vector<16x16xf32>
    %cst_44 = arith.constant dense<0.000000e+00> : vector<16x16xf32>
    %95 = tpu.matmul %71, %65, %cst_44 {dimension_numbers = #tpu.dot_dimension_numbers<[1], [1], [0], [0], [0, 0, 1, 0], [], []>, precision = #tpu.contract_precision<fp32>} : vector<16x32xf32>, vector<16x32xf32>, vector<16x16xf32> -> vector<16x16xf32>
    %cst_45 = arith.constant dense<0.000000e+00> : vector<16x32xf32>
    %96 = tpu.matmul %1, %56, %cst_45 {dimension_numbers = #tpu.dot_dimension_numbers<[1], [1], [0], [0], [0, 0, 1, 0], [], []>, precision = #tpu.contract_precision<fp32>} : vector<16x128xf32>, vector<32x128xf32>, vector<16x32xf32> -> vector<16x32xf32>
    %97 = vector.extract_strided_slice %96 {offsets = [0, 0], sizes = [16, 16], strides = [1, 1]} : vector<16x32xf32> to vector<16x16xf32>
    %cst_46 = arith.constant 1.000000e+00 : f32
    %98 = vector.broadcast %cst_46 : f32 to vector<16x16xf32>
    %99 = arith.addf %97, %98 : vector<16x16xf32>
    %100 = arith.mulf %95, %99 : vector<16x16xf32>
    %101 = vector.extract_strided_slice %96 {offsets = [0, 16], sizes = [16, 16], strides = [1, 1]} : vector<16x32xf32> to vector<16x16xf32>
    %102 = arith.addf %100, %101 : vector<16x16xf32>
    %103 = arith.mulf %102, %10 : vector<16x16xf32>
    %cst_47 = arith.constant dense<0.000000e+00> : vector<16x128xf32>
    %104 = tpu.matmul %103, %57, %cst_47 {dimension_numbers = #tpu.dot_dimension_numbers<[1], [0], [0], [1], [0, 0, 1, 1], [], []>, precision = #tpu.contract_precision<fp32>} : vector<16x16xf32>, vector<16x128xf32>, vector<16x128xf32> -> vector<16x128xf32>
    %105 = arith.addf %1, %104 : vector<16x128xf32>
    %106 = arith.mulf %105, %3 : vector<16x128xf32>
    %107 = arith.addf %103, %52 : vector<16x16xf32>
    %cst_48 = arith.constant dense<0xFF800000> : vector<16xf32>
    %108 = vector.multi_reduction <maximumf>, %107, %cst_48 [1] : vector<16x16xf32> to vector<16xf32>
    %109 = vector.shape_cast %108 : vector<16xf32> to vector<16x1xf32>
    %110 = vector.broadcast %109 : vector<16x1xf32> to vector<16x16xf32>
    %111 = arith.subf %107, %110 : vector<16x16xf32>
    %112 = math.exp %111 : vector<16x16xf32>
    %cst_49 = arith.constant dense<0.000000e+00> : vector<16xf32>
    %113 = vector.multi_reduction <add>, %112, %cst_49 [1] : vector<16x16xf32> to vector<16xf32>
    %114 = vector.shape_cast %113 : vector<16xf32> to vector<16x1xf32>
    %115 = tpu.reciprocal %114 : vector<16x1xf32> -> vector<16x1xf32>
    %116 = vector.broadcast %115 : vector<16x1xf32> to vector<16x16xf32>
    %117 = arith.mulf %112, %116 : vector<16x16xf32>
    %118 = tpu.concatenate %94, %117 in 1 : vector<16x16xf32>, vector<16x16xf32> -> vector<16x32xf32>
    %119 = tpu.concatenate %70, %66 in 0 : vector<16x32xf32>, vector<16x32xf32> -> vector<32x32xf32>
    %cst_50 = arith.constant dense<0.000000e+00> : vector<16x32xf32>
    %120 = tpu.matmul %118, %119, %cst_50 {dimension_numbers = #tpu.dot_dimension_numbers<[1], [0], [0], [1], [0, 0, 1, 1], [], []>, precision = #tpu.contract_precision<fp32>} : vector<16x32xf32>, vector<32x32xf32>, vector<16x32xf32> -> vector<16x32xf32>
    %cst_51 = arith.constant dense<0.000000e+00> : vector<2x16xf32>
    %121 = tpu.matmul %14, %94, %cst_51 {dimension_numbers = #tpu.dot_dimension_numbers<[1], [0], [0], [1], [0, 0, 1, 1], [], []>, precision = #tpu.contract_precision<fp32>} : vector<2x16xf32>, vector<16x16xf32>, vector<2x16xf32> -> vector<2x16xf32>
    %cst_52 = arith.constant dense<0.000000e+00> : vector<2x32xf32>
    %122 = tpu.matmul %121, %70, %cst_52 {dimension_numbers = #tpu.dot_dimension_numbers<[1], [0], [0], [1], [0, 0, 1, 1], [], []>, precision = #tpu.contract_precision<fp32>} : vector<2x16xf32>, vector<16x32xf32>, vector<2x32xf32> -> vector<2x32xf32>
    %cst_53 = arith.constant dense<0.000000e+00> : vector<2x8xf32>
    %123 = tpu.matmul %13, %58, %cst_53 {dimension_numbers = #tpu.dot_dimension_numbers<[1], [0], [0], [1], [0, 0, 1, 1], [], []>, precision = #tpu.contract_precision<fp32>} : vector<2x8xf32>, vector<8x8xf32>, vector<2x8xf32> -> vector<2x8xf32>
    %cst_54 = arith.constant 0.000000e+00 : f32
    %124 = vector.broadcast %cst_54 : f32 to vector<2x8xf32>
    %125 = arith.maximumf %123, %124 : vector<2x8xf32>
    %126 = tpu.concatenate %125, %122 in 1 : vector<2x8xf32>, vector<2x32xf32> -> vector<2x40xf32>
    %cst_55 = arith.constant dense<0.000000e+00> : vector<2x8xf32>
    %127 = tpu.matmul %126, %59, %cst_55 {dimension_numbers = #tpu.dot_dimension_numbers<[1], [0], [0], [1], [0, 0, 1, 1], [], []>, precision = #tpu.contract_precision<fp32>} : vector<2x40xf32>, vector<40x8xf32>, vector<2x8xf32> -> vector<2x8xf32>
    %128 = arith.addf %13, %127 : vector<2x8xf32>
    %cst_56 = arith.constant dense<0.000000e+00> : vector<2x32xf32>
    %129 = tpu.matmul %128, %60, %cst_56 {dimension_numbers = #tpu.dot_dimension_numbers<[1], [0], [0], [1], [0, 0, 1, 1], [], []>, precision = #tpu.contract_precision<fp32>} : vector<2x8xf32>, vector<8x32xf32>, vector<2x32xf32> -> vector<2x32xf32>
    %130 = vector.extract_strided_slice %129 {offsets = [0, 0], sizes = [1, 32], strides = [1, 1]} : vector<2x32xf32> to vector<1x32xf32>
    %131 = vector.shape_cast %130 : vector<1x32xf32> to vector<1x32xf32>
    %132 = vector.broadcast %131 : vector<1x32xf32> to vector<8x32xf32>
    %133 = vector.extract_strided_slice %129 {offsets = [1, 0], sizes = [1, 32], strides = [1, 1]} : vector<2x32xf32> to vector<1x32xf32>
    %134 = vector.shape_cast %133 : vector<1x32xf32> to vector<1x32xf32>
    %135 = vector.broadcast %134 : vector<1x32xf32> to vector<8x32xf32>
    %136 = tpu.concatenate %132, %135 in 0 : vector<8x32xf32>, vector<8x32xf32> -> vector<16x32xf32>
    %137 = arith.addf %5, %120 : vector<16x32xf32>
    %138 = arith.addf %137, %136 : vector<16x32xf32>
    %cst_57 = arith.constant dense<0.000000e+00> : vector<16x64xf32>
    %139 = tpu.matmul %138, %61, %cst_57 {dimension_numbers = #tpu.dot_dimension_numbers<[1], [0], [0], [1], [0, 0, 1, 1], [], []>, precision = #tpu.contract_precision<fp32>} : vector<16x32xf32>, vector<32x64xf32>, vector<16x64xf32> -> vector<16x64xf32>
    %cst_58 = arith.constant 0.000000e+00 : f32
    %140 = vector.broadcast %cst_58 : f32 to vector<16x64xf32>
    %141 = arith.maximumf %139, %140 : vector<16x64xf32>
    %cst_59 = arith.constant dense<0.000000e+00> : vector<16x32xf32>
    %142 = tpu.matmul %141, %62, %cst_59 {dimension_numbers = #tpu.dot_dimension_numbers<[1], [0], [0], [1], [0, 0, 1, 1], [], []>, precision = #tpu.contract_precision<fp32>} : vector<16x64xf32>, vector<64x32xf32>, vector<16x32xf32> -> vector<16x32xf32>
    %143 = arith.addf %138, %142 : vector<16x32xf32>
    %144 = vector.broadcast %11 : vector<16x1xf32> to vector<16x32xf32>
    %145 = arith.mulf %143, %144 : vector<16x32xf32>
    %cst_60 = arith.constant dense<0.000000e+00> : vector<16x128xf32>
    %146 = tpu.matmul %145, %53, %cst_60 {dimension_numbers = #tpu.dot_dimension_numbers<[1], [0], [0], [1], [0, 0, 1, 1], [], []>, precision = #tpu.contract_precision<fp32>} : vector<16x32xf32>, vector<32x128xf32>, vector<16x128xf32> -> vector<16x128xf32>
    %147 = vector.extract_strided_slice %146 {offsets = [0, 0], sizes = [16, 32], strides = [1, 1]} : vector<16x128xf32> to vector<16x32xf32>
    %148 = vector.extract_strided_slice %146 {offsets = [0, 32], sizes = [16, 32], strides = [1, 1]} : vector<16x128xf32> to vector<16x32xf32>
    %149 = vector.extract_strided_slice %146 {offsets = [0, 64], sizes = [16, 32], strides = [1, 1]} : vector<16x128xf32> to vector<16x32xf32>
    %150 = vector.extract_strided_slice %146 {offsets = [0, 96], sizes = [16, 32], strides = [1, 1]} : vector<16x128xf32> to vector<16x32xf32>
    %cst_61 = arith.constant dense<0.000000e+00> : vector<16x16xf32>
    %151 = tpu.matmul %147, %148, %cst_61 {dimension_numbers = #tpu.dot_dimension_numbers<[1], [1], [0], [0], [0, 0, 1, 0], [], []>, precision = #tpu.contract_precision<fp32>} : vector<16x32xf32>, vector<16x32xf32>, vector<16x16xf32> -> vector<16x16xf32>
    %cst_62 = arith.constant dense<0.000000e+00> : vector<16x32xf32>
    %152 = tpu.matmul %83, %54, %cst_62 {dimension_numbers = #tpu.dot_dimension_numbers<[1], [1], [0], [0], [0, 0, 1, 0], [], []>, precision = #tpu.contract_precision<fp32>} : vector<16x128xf32>, vector<32x128xf32>, vector<16x32xf32> -> vector<16x32xf32>
    %153 = vector.extract_strided_slice %152 {offsets = [0, 0], sizes = [16, 16], strides = [1, 1]} : vector<16x32xf32> to vector<16x16xf32>
    %cst_63 = arith.constant 1.000000e+00 : f32
    %154 = vector.broadcast %cst_63 : f32 to vector<16x16xf32>
    %155 = arith.addf %153, %154 : vector<16x16xf32>
    %156 = arith.mulf %151, %155 : vector<16x16xf32>
    %157 = vector.extract_strided_slice %152 {offsets = [0, 16], sizes = [16, 16], strides = [1, 1]} : vector<16x32xf32> to vector<16x16xf32>
    %158 = arith.addf %156, %157 : vector<16x16xf32>
    %159 = arith.mulf %158, %9 : vector<16x16xf32>
    %cst_64 = arith.constant dense<0.000000e+00> : vector<16x128xf32>
    %160 = tpu.matmul %159, %55, %cst_64 {dimension_numbers = #tpu.dot_dimension_numbers<[1], [0], [0], [1], [0, 0, 1, 1], [], []>, precision = #tpu.contract_precision<fp32>} : vector<16x16xf32>, vector<16x128xf32>, vector<16x128xf32> -> vector<16x128xf32>
    %161 = arith.addf %83, %160 : vector<16x128xf32>
    %162 = arith.mulf %161, %2 : vector<16x128xf32>
    %163 = arith.addf %159, %48 : vector<16x16xf32>
    %cst_65 = arith.constant dense<0xFF800000> : vector<16xf32>
    %164 = vector.multi_reduction <maximumf>, %163, %cst_65 [1] : vector<16x16xf32> to vector<16xf32>
    %165 = vector.shape_cast %164 : vector<16xf32> to vector<16x1xf32>
    %166 = vector.broadcast %165 : vector<16x1xf32> to vector<16x16xf32>
    %167 = arith.subf %163, %166 : vector<16x16xf32>
    %168 = math.exp %167 : vector<16x16xf32>
    %cst_66 = arith.constant dense<0.000000e+00> : vector<16xf32>
    %169 = vector.multi_reduction <add>, %168, %cst_66 [1] : vector<16x16xf32> to vector<16xf32>
    %170 = vector.shape_cast %169 : vector<16xf32> to vector<16x1xf32>
    %171 = tpu.reciprocal %170 : vector<16x1xf32> -> vector<16x1xf32>
    %172 = vector.broadcast %171 : vector<16x1xf32> to vector<16x16xf32>
    %173 = arith.mulf %168, %172 : vector<16x16xf32>
    %cst_67 = arith.constant dense<0.000000e+00> : vector<16x16xf32>
    %174 = tpu.matmul %150, %65, %cst_67 {dimension_numbers = #tpu.dot_dimension_numbers<[1], [1], [0], [0], [0, 0, 1, 0], [], []>, precision = #tpu.contract_precision<fp32>} : vector<16x32xf32>, vector<16x32xf32>, vector<16x16xf32> -> vector<16x16xf32>
    %cst_68 = arith.constant dense<0.000000e+00> : vector<16x32xf32>
    %175 = tpu.matmul %106, %56, %cst_68 {dimension_numbers = #tpu.dot_dimension_numbers<[1], [1], [0], [0], [0, 0, 1, 0], [], []>, precision = #tpu.contract_precision<fp32>} : vector<16x128xf32>, vector<32x128xf32>, vector<16x32xf32> -> vector<16x32xf32>
    %176 = vector.extract_strided_slice %175 {offsets = [0, 0], sizes = [16, 16], strides = [1, 1]} : vector<16x32xf32> to vector<16x16xf32>
    %cst_69 = arith.constant 1.000000e+00 : f32
    %177 = vector.broadcast %cst_69 : f32 to vector<16x16xf32>
    %178 = arith.addf %176, %177 : vector<16x16xf32>
    %179 = arith.mulf %174, %178 : vector<16x16xf32>
    %180 = vector.extract_strided_slice %175 {offsets = [0, 16], sizes = [16, 16], strides = [1, 1]} : vector<16x32xf32> to vector<16x16xf32>
    %181 = arith.addf %179, %180 : vector<16x16xf32>
    %182 = arith.mulf %181, %10 : vector<16x16xf32>
    %cst_70 = arith.constant dense<0.000000e+00> : vector<16x128xf32>
    %183 = tpu.matmul %182, %57, %cst_70 {dimension_numbers = #tpu.dot_dimension_numbers<[1], [0], [0], [1], [0, 0, 1, 1], [], []>, precision = #tpu.contract_precision<fp32>} : vector<16x16xf32>, vector<16x128xf32>, vector<16x128xf32> -> vector<16x128xf32>
    %184 = arith.addf %106, %183 : vector<16x128xf32>
    %185 = arith.mulf %184, %3 : vector<16x128xf32>
    %186 = arith.addf %182, %52 : vector<16x16xf32>
    %cst_71 = arith.constant dense<0xFF800000> : vector<16xf32>
    %187 = vector.multi_reduction <maximumf>, %186, %cst_71 [1] : vector<16x16xf32> to vector<16xf32>
    %188 = vector.shape_cast %187 : vector<16xf32> to vector<16x1xf32>
    %189 = vector.broadcast %188 : vector<16x1xf32> to vector<16x16xf32>
    %190 = arith.subf %186, %189 : vector<16x16xf32>
    %191 = math.exp %190 : vector<16x16xf32>
    %cst_72 = arith.constant dense<0.000000e+00> : vector<16xf32>
    %192 = vector.multi_reduction <add>, %191, %cst_72 [1] : vector<16x16xf32> to vector<16xf32>
    %193 = vector.shape_cast %192 : vector<16xf32> to vector<16x1xf32>
    %194 = tpu.reciprocal %193 : vector<16x1xf32> -> vector<16x1xf32>
    %195 = vector.broadcast %194 : vector<16x1xf32> to vector<16x16xf32>
    %196 = arith.mulf %191, %195 : vector<16x16xf32>
    %197 = tpu.concatenate %173, %196 in 1 : vector<16x16xf32>, vector<16x16xf32> -> vector<16x32xf32>
    %198 = tpu.concatenate %149, %66 in 0 : vector<16x32xf32>, vector<16x32xf32> -> vector<32x32xf32>
    %cst_73 = arith.constant dense<0.000000e+00> : vector<16x32xf32>
    %199 = tpu.matmul %197, %198, %cst_73 {dimension_numbers = #tpu.dot_dimension_numbers<[1], [0], [0], [1], [0, 0, 1, 1], [], []>, precision = #tpu.contract_precision<fp32>} : vector<16x32xf32>, vector<32x32xf32>, vector<16x32xf32> -> vector<16x32xf32>
    %cst_74 = arith.constant dense<0.000000e+00> : vector<2x16xf32>
    %200 = tpu.matmul %14, %173, %cst_74 {dimension_numbers = #tpu.dot_dimension_numbers<[1], [0], [0], [1], [0, 0, 1, 1], [], []>, precision = #tpu.contract_precision<fp32>} : vector<2x16xf32>, vector<16x16xf32>, vector<2x16xf32> -> vector<2x16xf32>
    %cst_75 = arith.constant dense<0.000000e+00> : vector<2x32xf32>
    %201 = tpu.matmul %200, %149, %cst_75 {dimension_numbers = #tpu.dot_dimension_numbers<[1], [0], [0], [1], [0, 0, 1, 1], [], []>, precision = #tpu.contract_precision<fp32>} : vector<2x16xf32>, vector<16x32xf32>, vector<2x32xf32> -> vector<2x32xf32>
    %cst_76 = arith.constant dense<0.000000e+00> : vector<2x8xf32>
    %202 = tpu.matmul %128, %58, %cst_76 {dimension_numbers = #tpu.dot_dimension_numbers<[1], [0], [0], [1], [0, 0, 1, 1], [], []>, precision = #tpu.contract_precision<fp32>} : vector<2x8xf32>, vector<8x8xf32>, vector<2x8xf32> -> vector<2x8xf32>
    %cst_77 = arith.constant 0.000000e+00 : f32
    %203 = vector.broadcast %cst_77 : f32 to vector<2x8xf32>
    %204 = arith.maximumf %202, %203 : vector<2x8xf32>
    %205 = tpu.concatenate %204, %201 in 1 : vector<2x8xf32>, vector<2x32xf32> -> vector<2x40xf32>
    %cst_78 = arith.constant dense<0.000000e+00> : vector<2x8xf32>
    %206 = tpu.matmul %205, %59, %cst_78 {dimension_numbers = #tpu.dot_dimension_numbers<[1], [0], [0], [1], [0, 0, 1, 1], [], []>, precision = #tpu.contract_precision<fp32>} : vector<2x40xf32>, vector<40x8xf32>, vector<2x8xf32> -> vector<2x8xf32>
    %207 = arith.addf %128, %206 : vector<2x8xf32>
    %cst_79 = arith.constant dense<0.000000e+00> : vector<2x32xf32>
    %208 = tpu.matmul %207, %60, %cst_79 {dimension_numbers = #tpu.dot_dimension_numbers<[1], [0], [0], [1], [0, 0, 1, 1], [], []>, precision = #tpu.contract_precision<fp32>} : vector<2x8xf32>, vector<8x32xf32>, vector<2x32xf32> -> vector<2x32xf32>
    %209 = vector.extract_strided_slice %208 {offsets = [0, 0], sizes = [1, 32], strides = [1, 1]} : vector<2x32xf32> to vector<1x32xf32>
    %210 = vector.shape_cast %209 : vector<1x32xf32> to vector<1x32xf32>
    %211 = vector.broadcast %210 : vector<1x32xf32> to vector<8x32xf32>
    %212 = vector.extract_strided_slice %208 {offsets = [1, 0], sizes = [1, 32], strides = [1, 1]} : vector<2x32xf32> to vector<1x32xf32>
    %213 = vector.shape_cast %212 : vector<1x32xf32> to vector<1x32xf32>
    %214 = vector.broadcast %213 : vector<1x32xf32> to vector<8x32xf32>
    %215 = tpu.concatenate %211, %214 in 0 : vector<8x32xf32>, vector<8x32xf32> -> vector<16x32xf32>
    %216 = arith.addf %145, %199 : vector<16x32xf32>
    %217 = arith.addf %216, %215 : vector<16x32xf32>
    %cst_80 = arith.constant dense<0.000000e+00> : vector<16x64xf32>
    %218 = tpu.matmul %217, %61, %cst_80 {dimension_numbers = #tpu.dot_dimension_numbers<[1], [0], [0], [1], [0, 0, 1, 1], [], []>, precision = #tpu.contract_precision<fp32>} : vector<16x32xf32>, vector<32x64xf32>, vector<16x64xf32> -> vector<16x64xf32>
    %cst_81 = arith.constant 0.000000e+00 : f32
    %219 = vector.broadcast %cst_81 : f32 to vector<16x64xf32>
    %220 = arith.maximumf %218, %219 : vector<16x64xf32>
    %cst_82 = arith.constant dense<0.000000e+00> : vector<16x32xf32>
    %221 = tpu.matmul %220, %62, %cst_82 {dimension_numbers = #tpu.dot_dimension_numbers<[1], [0], [0], [1], [0, 0, 1, 1], [], []>, precision = #tpu.contract_precision<fp32>} : vector<16x64xf32>, vector<64x32xf32>, vector<16x32xf32> -> vector<16x32xf32>
    %222 = arith.addf %217, %221 : vector<16x32xf32>
    %223 = vector.broadcast %11 : vector<16x1xf32> to vector<16x32xf32>
    %224 = arith.mulf %222, %223 : vector<16x32xf32>
    %225 = vector.extract_strided_slice %207 {offsets = [0, 0], sizes = [1, 8], strides = [1, 1]} : vector<2x8xf32> to vector<1x8xf32>
    %226 = vector.shape_cast %225 : vector<1x8xf32> to vector<1x8xf32>
    %227 = vector.broadcast %226 : vector<1x8xf32> to vector<8x8xf32>
    %228 = vector.extract_strided_slice %207 {offsets = [1, 0], sizes = [1, 8], strides = [1, 1]} : vector<2x8xf32> to vector<1x8xf32>
    %229 = vector.shape_cast %228 : vector<1x8xf32> to vector<1x8xf32>
    %230 = vector.broadcast %229 : vector<1x8xf32> to vector<8x8xf32>
    %231 = tpu.concatenate %227, %230 in 0 : vector<8x8xf32>, vector<8x8xf32> -> vector<16x8xf32>
    %cst_83 = arith.constant 0.000000e+00 : f32
    %232 = vector.broadcast %cst_83 : f32 to vector<16x88xf32>
    %233 = tpu.concatenate %224, %231, %232 in 1 : vector<16x32xf32>, vector<16x8xf32>, vector<16x88xf32> -> vector<16x128xf32>
    %c0_84 = arith.constant 0 : index
    %c0_85 = arith.constant 0 : index
    %234 = vector.load %arg3[%c0_84, %c0_85] : memref<48x128xf32, #tpu.memory_space<vmem>>, vector<16x128xf32>
    tpu.vector_store %arg3[%c0_84, %c0_85], %162 {strides = array<i32>} : memref<48x128xf32, #tpu.memory_space<vmem>>, vector<16x128xf32>,
    %c16_86 = arith.constant 16 : index
    %c0_87 = arith.constant 0 : index
    %235 = vector.load %arg3[%c16_86, %c0_87] : memref<48x128xf32, #tpu.memory_space<vmem>>, vector<16x128xf32>
    tpu.vector_store %arg3[%c16_86, %c0_87], %185 {strides = array<i32>} : memref<48x128xf32, #tpu.memory_space<vmem>>, vector<16x128xf32>,
    %c32_88 = arith.constant 32 : index
    %c0_89 = arith.constant 0 : index
    %236 = vector.load %arg3[%c32_88, %c0_89] : memref<48x128xf32, #tpu.memory_space<vmem>>, vector<16x128xf32>
    tpu.vector_store %arg3[%c32_88, %c0_89], %233 {strides = array<i32>} : memref<48x128xf32, #tpu.memory_space<vmem>>, vector<16x128xf32>,
    return
  }
  func.func @transform_0(%arg0: i32) -> (i32, i32) {
    %c0_i32 = arith.constant 0 : i32
    %c0_i32_0 = arith.constant 0 : i32
    %c0_i32_1 = arith.constant 0 : i32
    return %c0_i32, %c0_i32_0 : i32, i32
  }
  func.func @transform_1(%arg0: i32) -> (i32, i32) {
    %c0_i32 = arith.constant 0 : i32
    %c0_i32_0 = arith.constant 0 : i32
    %c0_i32_1 = arith.constant 0 : i32
    return %c0_i32, %c0_i32_0 : i32, i32
  }
  func.func @transform_2(%arg0: i32) -> (i32, i32) {
    %c0_i32 = arith.constant 0 : i32
    %c0_i32_0 = arith.constant 0 : i32
    %c0_i32_1 = arith.constant 0 : i32
    return %c0_i32, %c0_i32_0 : i32, i32
  }
}

</mosaic_0001>

<bundles_post_ra>
// kernel: mul.50
= control target key start
LH: loop header
LB: loop body
LE: loop exit
PB: predicated region body
PF: predicated region fallthrough
CT: control target
= control target key end

     0   :  { %vm7_vm0 = vcmask 64512   ;;  %vm13_vm1 = vcmask 130112   ;;  %s39_s0 = inlined_call_operand.vmem [shape: f32[2,8], index: 0, kind: input, shape index: {}]   ;;  %s40_s1 = inlined_call_operand.vmem [shape: f32[16], index: 1, kind: output, shape index: {}]  }
   0x1   :  { %v4_v0 = vld [vmem:[%s39_s0] sm:$0x3]  ;;  %s22_s0 = smov 8  }
   0x2   :  { %5 = vst [vmem:[#allocation1] sm:$0x3] %v4_v0 }
   0x9   :  { %v10_v1 = vld [vmem:[#allocation1 + $0x1] sm:$0x1]   ;;  %v6_v2 = vld [vmem:[#allocation1] sm:$0x1]  }
   0xa   :  { %11 = vrot.lane.b32.xlu0 %v10_v1, %s22_s0  ;;  %8 = vst.msk [vmem:[#allocation0] sm:$0x1] %vm7_vm0, %v6_v2  }
  0x7c   :  { %v12_v3 = vpop.permute.xlu0 %11  }
  0x7d   :  { %14 = vst.msk [vmem:[#allocation0] sm:$0x1] %vm13_vm1, %v12_v3  }
  0x84   :  { %v18_v4 = vld [vmem:[#allocation0] sm:$0x1] }
  0x85   :  { %20 = vst [vmem:[%s40_s1] sm:$0x1] %v18_v4 }

// kernel: cond_graph_transformer_forward.1
= control target key start
LH: loop header
LB: loop body
LE: loop exit
PB: predicated region body
PF: predicated region fallthrough
CT: control target
= control target key end

     0   :  { %vm34_vm0 = vcmask 1043456   ;;  %s22603_s13 = smov 96   ;;  %s22604_s16 = smov 92   ;;  %vm29_vm1 = vcmask 31744   ;;  %vm534_vm2 = vcmask 261120   ;;  %v24485_v55 = vmov 0.0|0.0   ;;  %s24478_s0 = inlined_call_operand.vmem [shape: f32[88,128], index: 0, kind: input, shape index: {}]   ;;  %s24479_s1 = inlined_call_operand.vmem [shape: f32[344,128], index: 1, kind: input, shape index: {}]   ;;  %s24480_s2 = inlined_call_operand.vmem [shape: f32[48,128], index: 2, kind: output, shape index: {}]  }
   0x1   :  { %v22636_v0 = vld [vmem:[%s24478_s0 + $0x40] sm:$0xff]  ;;  %v22646_v3 = vld [vmem:[%s24478_s0 + $0x48] sm:$0xff]  ;;  %v1010_v23 = vld [vmem:[%s24479_s1 + $0x10] sm:$0xff]  ;;  %21086 = vmatprep.subr.bf16.mxu1 %v24485_v55  ;;  %vm22606_vm3 = vmmov 0   ;;  %v24483_v56 = vmov 0.0   ;;  %v528_v58 = vlaneseq  ;;  %s22608_s23 = smov 60  }
   0x2   :  { %v22_v1 = vld [vmem:[%s24479_s1] sm:$0xf]  ;;  %25 = vrot.lane.b32.xlu0 %v22636_v0, %s22603_s13  ;;  %1012 = vrot.lane.b32.xlu1 %v22636_v0, %s22604_s16  ;;  %v1011_v24 = vld [vmem:[%s24479_s1 + $0x18] sm:$0xff]  ;;  %v1021_v25 = vsel %vm534_vm2, %v1010_v23, 0  ;;  %vm1550_vm6 = vcmask 130048   ;;  %s22609_s11 = smov 44  }
   0x3   :  { %v36_v2 = vsel %vm34_vm0, %v22_v1, 0  ;;  %v1024_v26 = vsel %vm534_vm2, %v1011_v24, 0  ;;  %v1027_v27 = vand.u32 4294901760, %v1021_v25  ;;  %19230 = vmatprep.mubr.msk.f32.mxu1 %vm22606_vm3, %v24483_v56  ;;  %v527_v57 = vld [vmem:[%s24479_s1 + $0x8] sm:$0x3]  ;;  %v22677_v60 = vshrl.u32 %v528_v58, 7 }
   0x4   :  { %v22648_v4 = vand.u32 4294901760, %v36_v2  ;;  %v1030_v28 = vand.u32 4294901760, %v1024_v26  ;;  %v542_v59 = vrot.slane %v527_v57, 1  ;;  %s22610_s12 = smov 32   ;;  %s22611_s14 = smov 112   ;;  %vm7894_vm7 = vcmask 64512  }
   0x5   :  { %v1115_v29 = vsub.f32 %v1021_v25, %v1027_v27  ;;  %v22681_v62 = vsub.s32 0, %v22677_v60  ;;  %s22612_s15 = smov 28   ;;  %s22613_s26 = smov 64   ;;  %vm8349_vm8 = vcmask 326656   ;;  %vm9849_vm9 = vcmask 523264  }
   0x6   :  { %19196 = vmatprep.subr.mxu0 %v22648_v4  ;;  %v126_v5 = vsub.f32 %v36_v2, %v22648_v4  ;;  %27 = vrot.lane.b32.xlu0 %v22646_v3, %s22603_s13  ;;  %v1122_v30 = vsub.f32 %v1024_v26, %v1030_v28  ;;  %v21104_v36 = vpack.c.bf16 %v1030_v28, %v1027_v27  ;;  %v543_v61 = vsel %vm534_vm2, %v542_v59, 0  ;;  %s22614_s27 = smov 16   ;;  %s22615_s30 = smov 120  }
   0x7   :  { %19197 = vmatpush3.msra.mxu0 %v22648_v4  ;;  %1014 = vrot.lane.b32.xlu1 %v22646_v3, %s22604_s16  ;;  %v1116_v31 = vand.u32 4294901760, %v1115_v29  ;;  %24601 = vst [vmem:[#allocation2_spill] sm:$0xff] %v22681_v62  ;;  %v22683_v63 = vand.u32 4294901760, %v543_v61  ;;  %v531_v1 = vrot.slane %v527_v57, %v22681_v62  ;;  %s22616_s18 = smov 8  }
   0x8   :  { %v127_v6 = vand.u32 4294901760, %v126_v5  ;;  %v1123_v32 = vand.u32 4294901760, %v1122_v30  ;;  %v21112_v53 = vpack.c.bf16 %v1122_v30, %v1115_v29 }
   0x9   :  { %v1117_v37 = vsub.f32 %v1115_v29, %v1116_v31  ;;  %v619_v2 = vsub.f32 %v543_v61, %v22683_v63 }
   0xa   :  { %v128_v7 = vsub.f32 %v126_v5, %v127_v6  ;;  %v1124_v38 = vsub.f32 %v1122_v30, %v1123_v32  ;;  %v21120_v54 = vpack.c.bf16 %v1123_v32, %v1116_v31 }
   0xb   :  { %v1118_v44 = vand.u32 4294901760, %v1117_v37 }
   0xc   :  { %v129_v8 = vand.u32 4294901760, %v128_v7  ;;  %v1125_v45 = vand.u32 4294901760, %v1124_v38 }
   0xe   :  { %19201 = vmatprep.subr.mxu0 %v129_v8  ;;  %v21108_v50 = vpack.c.bf16 %v1125_v45, %v1118_v44 }
  0x74   :  { %v26_v9 = vpop.permute.xlu0 %25  ;;  %v1013_v33 = vpop.permute.xlu1 %1012 }
  0x75   :  { %v30_v10 = vsel %vm29_vm1, %v26_v9, 0  ;;  %v1016_v34 = vsel %vm534_vm2, %v1013_v33, 0  ;;  %v620_v9 = vand.u32 4294901760, %v619_v2 }
  0x76   :  { %v104_v11 = vand.u32 4294901760, %v30_v10  ;;  %v1093_v35 = vand.u32 4294901760, %v1016_v34 }
  0x77   :  { %v621_v24 = vsub.f32 %v619_v2, %v620_v9 }
  0x78   :  { %v105_v12 = vsub.f32 %v30_v10, %v104_v11  ;;  %v28_v13 = vpop.permute.xlu0 %27  ;;  %v1094_v39 = vsub.f32 %v1016_v34, %v1093_v35 }
  0x79   :  { %v32_v14 = vsel %vm29_vm1, %v28_v13, 0  ;;  %v1015_v40 = vpop.permute.xlu1 %1014  ;;  %v622_v37 = vand.u32 4294901760, %v621_v24 }
  0x7a   :  { %v114_v15 = vand.u32 4294901760, %v32_v14  ;;  %v106_v16 = vand.u32 4294901760, %v105_v12  ;;  %v1018_v41 = vsel %vm534_vm2, %v1015_v40, 0  ;;  %v1095_v42 = vand.u32 4294901760, %v1094_v39 }
  0x7b   :  { %v1103_v43 = vand.u32 4294901760, %v1018_v41 }
  0x7c   :  { %v115_v17 = vsub.f32 %v32_v14, %v114_v15  ;;  %v107_v18 = vsub.f32 %v105_v12, %v106_v16  ;;  %v1096_v47 = vsub.f32 %v1094_v39, %v1095_v42 }
  0x7d   :  { %v1104_v46 = vsub.f32 %v1018_v41, %v1103_v43 }
  0x7e   :  { %v116_v19 = vand.u32 4294901760, %v115_v17  ;;  %v108_v20 = vand.u32 4294901760, %v107_v18  ;;  %v1097_v49 = vand.u32 4294901760, %v1096_v47 }
  0x7f   :  { %v1105_v48 = vand.u32 4294901760, %v1104_v46 }
  0x80   :  { %19198 = vmatprep.mubr.f32.mxu0 %v108_v20  ;;  %v117_v21 = vsub.f32 %v115_v17, %v116_v19 }
  0x81   :  { %v1106_v51 = vsub.f32 %v1104_v46, %v1105_v48 }
  0x82   :  { %v118_v22 = vand.u32 4294901760, %v117_v21 }
  0x83   :  { %v1107_v52 = vand.u32 4294901760, %v1106_v51 }
  0x84   :  { %19199 = vmatmul.mubr.f32.vlgmr.msra.gmra.mrb[0].mxu0 %v118_v22 }
  0x85   :  { %19202 = vmatpush3.msra.mxu0 %v129_v8  ;;  %19203 = vmatprep.mubr.f32.mxu0 %v104_v11 }
  0x86   :  { %19206 = vmatprep.subr.mxu0 %v126_v5 }
  0x8c   :  { %19204 = vmatmul.mubr.f32.vlgmr.msra.gmra.mrb[0].mxu0 %v114_v15 }
  0x8d   :  { %19207 = vmatpush3.msra.mxu0 %v126_v5  ;;  %19208 = vmatprep.mubr.f32.mxu0 %v105_v12 }
  0x8e   :  { %19211 = vmatprep.subr.mxu0 %v22648_v4 }
  0x94   :  { %19209 = vmatmul.mubr.f32.vlgmr.msra.gmra.mrb[0].mxu0 %v115_v17 }
  0x95   :  { %19212 = vmatpush3.msra.mxu0 %v22648_v4  ;;  %19213 = vmatprep.mubr.f32.mxu0 %v106_v16 }
  0x96   :  { %19216 = vmatprep.subr.mxu0 %v127_v6 }
  0x9c   :  { %19214 = vmatmul.mubr.f32.vlgmr.msra.gmra.mrb[0].mxu0 %v116_v19 }
  0x9d   :  { %19217 = vmatpush3.msra.mxu0 %v127_v6  ;;  %19218 = vmatprep.mubr.f32.mxu0 %v104_v11 }
  0x9e   :  { %19221 = vmatprep.subr.mxu0 %v22648_v4 }
  0xa4   :  { %19219 = vmatmul.mubr.f32.vlgmr.msra.gmra.mrb[0].mxu0 %v114_v15 }
  0xa5   :  { %19222 = vmatpush3.msra.mxu0 %v22648_v4  ;;  %19223 = vmatprep.mubr.f32.mxu0 %v104_v11 }
  0xa6   :  { %21105 = vmatprep.subr.bf16.mxu0 %v21104_v36 }
  0xac   :  { %19224 = vmatmul.mubr.f32.vlgmr.msra.gmra.mrb[0].mxu0 %v114_v15 }
  0xad   :  { %21107 = vmatpush3.bf16.xpose.msra.mxu0 %v21104_v36  ;;  %19272 = vmatprep.mubr.f32.mxu0 %v1097_v49 }
  0xae   :  { %21109 = vmatprep.subr.bf16.mxu0 %v21108_v50 }
  0xb4   :  { %19273 = vmatmul.mubr.f32.vlgmr.msra.gmra.mrb[2].mxu0 %v1107_v52 }
  0xb5   :  { %21111 = vmatpush3.bf16.xpose.msra.mxu0 %v21108_v50  ;;  %19279 = vmatprep.mubr.f32.mxu0 %v1093_v35 }
  0xb6   :  { %21113 = vmatprep.subr.bf16.mxu0 %v21112_v53 }
  0xbc   :  { %19280 = vmatmul.mubr.f32.vlgmr.msra.gmra.mrb[2].mxu0 %v1103_v43 }
  0xbd   :  { %21115 = vmatpush3.bf16.xpose.msra.mxu0 %v21112_v53  ;;  %19286 = vmatprep.mubr.f32.mxu0 %v1094_v39 }
  0xbe   :  { %21117 = vmatprep.subr.bf16.mxu0 %v21104_v36 }
  0xc4   :  { %19287 = vmatmul.mubr.f32.vlgmr.msra.gmra.mrb[2].mxu0 %v1104_v46 }
  0xc5   :  { %21119 = vmatpush3.bf16.xpose.msra.mxu0 %v21104_v36  ;;  %19293 = vmatprep.mubr.f32.mxu0 %v1095_v42 }
  0xc6   :  { %21121 = vmatprep.subr.bf16.mxu0 %v21120_v54 }
  0xcc   :  { %19294 = vmatmul.mubr.f32.vlgmr.msra.gmra.mrb[2].mxu0 %v1105_v48 }
  0xcd   :  { %21123 = vmatpush3.bf16.xpose.msra.mxu0 %v21120_v54  ;;  %19300 = vmatprep.mubr.f32.mxu0 %v1093_v35 }
  0xce   :  { %21125 = vmatprep.subr.bf16.mxu0 %v21104_v36 }
  0xd4   :  { %19301 = vmatmul.mubr.f32.vlgmr.msra.gmra.mrb[2].mxu0 %v1103_v43 }
  0xd5   :  { %21127 = vmatpush3.bf16.xpose.msra.mxu0 %v21104_v36  ;;  %19307 = vmatprep.mubr.f32.mxu0 %v1093_v35 }
  0xdc   :  { %19308 = vmatmul.mubr.f32.vlgmr.msra.gmra.mrb[2].mxu0 %v1103_v43 }
 0x17f   :  { %v19225_v4 = vpop.f32.mrb[0].mxu0 }
 0x180   :  { %v549_v5 = vsel %vm534_vm2, %v19225_v4, 0  ;;  %v1583_v6 = vand.u32 4294901760, %v19225_v4  ;;  %v517_v7 = vpop.f32.mrb[1].mxu0  ;;  %v533_v8 = vmul.f32 %v19225_v4, %v531_v1 }
 0x181   :  { %v546_v10 = vsel %vm534_vm2, %v517_v7, 0  ;;  %v1580_v11 = vand.u32 4294901760, %v517_v7  ;;  %v532_v12 = vmul.f32 %v531_v1, %v517_v7  ;;  %v555_v13 = vand.u32 4294901760, %v549_v5 }
 0x182   :  { %v1675_v14 = vsub.f32 %v19225_v4, %v1583_v6  ;;  %v538_v15 = vsel %vm534_vm2, %v533_v8, 0.0  ;;  %v552_v16 = vand.u32 4294901760, %v546_v10 }
 0x183   :  { %v22690_v17 = vpack.c.bf16 %v1583_v6, %v1580_v11  ;;  %v1668_v18 = vsub.f32 %v517_v7, %v1580_v11  ;;  %539 = vadd.xlane.f32.xlu1 %v538_v15  ;;  %v535_v19 = vsel %vm534_vm2, %v532_v12, 0.0  ;;  %v637_v20 = vsub.f32 %v549_v5, %v555_v13 }
 0x184   :  { %536 = vadd.xlane.f32.xlu0 %v535_v19  ;;  %v21087_v21 = vpack.c.bf16 %v555_v13, %v552_v16  ;;  %v630_v22 = vsub.f32 %v546_v10, %v552_v16  ;;  %v1676_v23 = vand.u32 4294901760, %v1675_v14 }
 0x185   :  { %21129 = vmatprep.subr.bf16.mxu0 %v22690_v17  ;;  %v638_v25 = vand.u32 4294901760, %v637_v20  ;;  %v1669_v26 = vand.u32 4294901760, %v1668_v18  ;;  %v22694_v27 = vpack.c.bf16 %v1675_v14, %v1668_v18 }
 0x186   :  { %21088 = vmatpush3.bf16.xpose.msra.mxu1 %v21087_v21  ;;  %21131 = vmatpush3.bf16.msra.mxu0 %v22690_v17  ;;  %v631_v28 = vand.u32 4294901760, %v630_v22  ;;  %v21093_v29 = vpack.c.bf16 %v637_v20, %v630_v22  ;;  %v1677_v30 = vsub.f32 %v1675_v14, %v1676_v23 }
 0x187   :  { %21089 = vmatprep.subr.bf16.mxu1 %v24485_v55  ;;  %v639_v31 = vsub.f32 %v637_v20, %v638_v25  ;;  %v1670_v32 = vsub.f32 %v1668_v18, %v1669_v26  ;;  %v22698_v33 = vpack.c.bf16 %v1676_v23, %v1669_v26 }
 0x188   :  { %v632_v34 = vsub.f32 %v630_v22, %v631_v28  ;;  %v21099_v35 = vpack.c.bf16 %v638_v25, %v631_v28  ;;  %v1678_v36 = vand.u32 4294901760, %v1677_v30 }
 0x189   :  { %v640_v38 = vand.u32 4294901760, %v639_v31  ;;  %v1671_v39 = vand.u32 4294901760, %v1670_v32 }
 0x18a   :  { %v633_v40 = vand.u32 4294901760, %v632_v34 }
 0x18b   :  { %v21132_v41 = vpack.c.bf16 %v1678_v36, %v1671_v39 }
 0x18c   :  { %v21090_v42 = vpack.c.bf16 %v640_v38, %v633_v40  ;;  %v2086_v38 = vld [vmem:[%s24479_s1 + $0x28] sm:$0xff] }
 0x18d   :  { %19231 = vmatmul.mubr.f32.vlgmr.msra.gmra.mrb[0].mxu1 %v622_v37  ;;  %v2658_v37 = vsel %vm534_vm2, %v22636_v0, 0 }
 0x18e   :  { %21091 = vmatpush3.bf16.xpose.msra.mxu1 %v21090_v42  ;;  %19237 = vmatprep.mubr.msk.f32.mxu1 %vm22606_vm3, %v24483_v56  ;;  %v22739_v39 = vand.u32 4294901760, %v2658_v37  ;;  %v2087_v42 = vld [vmem:[%s24479_s1 + $0x30] sm:$0xff] }
 0x18f   :  { %21092 = vmatprep.subr.bf16.mxu1 %v24485_v55 }
 0x194   :  { %1544 = vrot.lane.b32.xlu1 %v22646_v3, %s22608_s23 }
 0x195   :  { %19238 = vmatmul.mubr.f32.vlgmr.msra.gmra.mrb[0].mxu1 %v22683_v63 }
 0x196   :  { %21094 = vmatpush3.bf16.xpose.msra.mxu1 %v21093_v29  ;;  %19244 = vmatprep.mubr.msk.f32.mxu1 %vm22606_vm3, %v24483_v56 }
 0x197   :  { %21095 = vmatprep.subr.bf16.mxu1 %v24485_v55 }
 0x19a   :  { %1542 = vrot.lane.b32.xlu0 %v22636_v0, %s22608_s23  ;;  %v2088_v0 = vld [vmem:[%s24479_s1 + $0x38] sm:$0xff] }
 0x19d   :  { %19245 = vmatmul.mubr.f32.vlgmr.msra.gmra.mrb[0].mxu1 %v619_v2 }
 0x19e   :  { %21097 = vmatpush3.bf16.xpose.msra.mxu1 %v21087_v21  ;;  %19251 = vmatprep.mubr.msk.f32.mxu1 %vm22606_vm3, %v24483_v56 }
 0x19f   :  { %21098 = vmatprep.subr.bf16.mxu1 %v24485_v55 }
 0x1a5   :  { %19252 = vmatmul.mubr.f32.vlgmr.msra.gmra.mrb[0].mxu1 %v620_v9 }
 0x1a6   :  { %21100 = vmatpush3.bf16.xpose.msra.mxu1 %v21099_v35  ;;  %19258 = vmatprep.mubr.msk.f32.mxu1 %vm22606_vm3, %v24483_v56 }
 0x1a7   :  { %21101 = vmatprep.subr.bf16.mxu1 %v24485_v55 }
 0x1ad   :  { %19259 = vmatmul.mubr.f32.vlgmr.msra.gmra.mrb[0].mxu1 %v22683_v63 }
 0x1ae   :  { %21103 = vmatpush3.bf16.xpose.msra.mxu1 %v21087_v21  ;;  %19265 = vmatprep.mubr.msk.f32.mxu1 %vm22606_vm3, %v24483_v56 }
 0x1af   :  { %21133 = vmatprep.subr.bf16.mxu1 %v21132_v41  ;;  %v19309_v43 = vpop.f32.mrb[2].mxu0 }
 0x1b0   :  { %v1518_v44 = vpop.f32.mrb[3].mxu0 }
 0x1b5   :  { %19266 = vmatmul.mubr.f32.vlgmr.msra.gmra.mrb[0].mxu1 %v22683_v63 }
 0x1b6   :  { %21135 = vmatpush3.bf16.msra.mxu1 %v21132_v41  ;;  %v2666_v41 = vand.u32 4294901760, %v2086_v38 }
 0x1b7   :  { %21137 = vmatprep.subr.bf16.mxu1 %v22694_v27 }
 0x210   :  { %v540_v48 = vpop.xlane.xlu1 %539 }
 0x211   :  { %v537_v49 = vpop.xlane.xlu0 %536 }
 0x214   :  { %v1545_v54 = vpop.permute.xlu1 %1544 }
 0x215   :  { %v1543_v59 = vpop.permute.xlu0 %1542 }
 0x288   :  { %v1006_v45 = vpop.f32.mrb[0].mxu1 }
 0x289   :  { %v1531_v46 = vrot.slane %v1006_v45, %v22681_v62  ;;  %v19267_v47 = vpop.f32.mrb[1].mxu1  ;;  %v2669_v45 = vand.u32 4294901760, %v2087_v42 }
 0x28b   :  { %v1532_v50 = vadd.f32 %v1531_v46, %v537_v49  ;;  %v1533_v51 = vadd.f32 %v1531_v46, %v540_v48  ;;  %v2672_v46 = vand.u32 4294901760, %v2088_v0  ;;  %v2760_v48 = vsub.f32 %v2086_v38, %v2666_v41 }
 0x28d   :  { %v1534_v52 = vadd.f32 %v1532_v50, %v1518_v44  ;;  %v1535_v53 = vadd.f32 %v19309_v43, %v1533_v51  ;;  %v2732_v43 = vsub.f32 %v2658_v37, %v22739_v39  ;;  %v2660_v44 = vsel %vm534_vm2, %v22646_v3, 0 }
 0x28e   :  { %v22752_v49 = vand.u32 4294901760, %v2660_v44 }
 0x28f   :  { %vm1537_vm4 = vcmp.gt.f32.partialorder %v1535_v53, 0.0  ;;  %v1539_v57 = vmul.f32 0.2, %v1535_v53  ;;  %vm1536_vm5 = vcmp.gt.f32.partialorder %v1534_v52, 0.0  ;;  %v1538_v58 = vmul.f32 0.2, %v1534_v52 }
 0x290   :  { %v2733_v51 = vand.u32 4294901760, %v2732_v43 }
 0x291   :  { %v1541_v61 = vsel %vm1537_vm4, %v1535_v53, %v1539_v57  ;;  %v1540_v63 = vsel %vm1536_vm5, %v1534_v52, %v1538_v58  ;;  %v2761_v53 = vand.u32 4294901760, %v2760_v48  ;;  %v2742_v57 = vsub.f32 %v2660_v44, %v22752_v49 }
 0x292   :  { %v1549_v1 = vadd.f32 %v1545_v54, %v1541_v61  ;;  %v1548_v2 = vadd.f32 %v1543_v59, %v1540_v63  ;;  %v2774_v54 = vsub.f32 %v2088_v0, %v2672_v46  ;;  %v2734_v3 = vsub.f32 %v2732_v43, %v2733_v51 }
 0x293   :  { %v2762_v59 = vsub.f32 %v2760_v48, %v2761_v53 }
 0x294   :  { %v1554_v4 = vsel %vm1550_vm6, %v1549_v1, -inf  ;;  %v1551_v5 = vsel %vm1550_vm6, %v1548_v2, -inf  ;;  %v2775_v63 = vand.u32 4294901760, %v2774_v54 }
 0x295   :  { %1555 = vmax.xlane.f32.xlu1 %v1554_v4  ;;  %1552 = vmax.xlane.f32.xlu0 %v1551_v5  ;;  %v2735_v4 = vand.u32 4294901760, %v2734_v3  ;;  %v2092_v3 = vld [vmem:[%s24479_s1 + $0x78] sm:$0xff] }
 0x322   :  { %v1556_v6 = vpop.xlane.xlu1 %1555  ;;  %v1553_v7 = vpop.xlane.xlu0 %1552 }
 0x323   :  { %v1558_v8 = vsub.f32 %v1549_v1, %v1556_v6  ;;  %v1557_v9 = vsub.f32 %v1548_v2, %v1553_v7  ;;  %v2743_v1 = vand.u32 4294901760, %v2742_v57  ;;  %v22759_v2 = vpack.c.bf16 %v2672_v46, %v2669_v45 }
 0x324   :  { %v2763_v6 = vand.u32 4294901760, %v2762_v59  ;;  %v11_v59 = vld [vmem:[%s24478_s0] sm:$0xff] }
 0x325   :  { %v1559_v10 = vmul.f32 1.442695, %v1557_v9  ;;  %v1561_v11 = vmul.f32 1.442695, %v1558_v8  ;;  %24603 = vst [vmem:[#allocation4_spill] sm:$0xff] %v22759_v2  ;;  %v2776_v8 = vsub.f32 %v2774_v54, %v2775_v63  ;;  %v2744_v9 = vsub.f32 %v2742_v57, %v2743_v1 }
 0x327   :  { %22555 = vpow2.f32 %v1559_v10 }
 0x328   :  { %22557 = vpow2.f32 %v1561_v11  ;;  %v2777_v11 = vand.u32 4294901760, %v2776_v8 }
 0x331   :  { %v22556_v12 = vpop.eup %22555 }
 0x332   :  { %v1563_v13 = vsel %vm1550_vm6, %v22556_v12, 0.0  ;;  %v22558_v14 = vpop.eup %22557 }
 0x333   :  { %1564 = vadd.xlane.f32.xlu0 %v1563_v13  ;;  %v1566_v15 = vsel %vm1550_vm6, %v22558_v14, 0.0 }
 0x337   :  { %1567 = vadd.xlane.f32.xlu0 %v1566_v15 }
 0x3c0   :  { %v1565_v16 = vpop.xlane.xlu0 %1564 }
 0x3c1   :  { %22559 = vrcp.f32 %v1565_v16 }
 0x3c4   :  { %v1568_v18 = vpop.xlane.xlu0 %1567 }
 0x3c5   :  { %22561 = vrcp.f32 %v1568_v18 }
 0x3cb   :  { %v22560_v19 = vpop.eup %22559 }
 0x3cc   :  { %v1571_v20 = vmul.f32 %v22560_v19, %v22556_v12  ;;  %v2745_v12 = vand.u32 4294901760, %v2744_v9  ;;  %v2120_v19 = vld [vmem:[%s24479_s1 + $0x40] sm:$0xff] }
 0x3ce   :  { %v1574_v21 = vsel %vm1550_vm6, %v1571_v20, 0  ;;  %v2121_v20 = vld [vmem:[%s24479_s1 + $0x48] sm:$0xff] }
 0x3cf   :  { %v22562_v22 = vpop.eup %22561  ;;  %v1646_v23 = vand.u32 4294901760, %v1574_v21 }
 0x3d0   :  { %v1572_v24 = vmul.f32 %v22562_v22, %v22558_v14  ;;  %v2134_v22 = vand.u32 4294901760, %v2121_v20 }
 0x3d1   :  { %19321 = vmatprep.mubr.f32.mxu1 %v1646_v23  ;;  %v1647_v25 = vsub.f32 %v1574_v21, %v1646_v23  ;;  %v2131_v21 = vand.u32 4294901760, %v2120_v19 }
 0x3d2   :  { %v1577_v26 = vsel %vm1550_vm6, %v1572_v24, 0 }
 0x3d3   :  { %v1656_v28 = vand.u32 4294901760, %v1577_v26  ;;  %v1648_v29 = vand.u32 4294901760, %v1647_v25  ;;  %v2221_v24 = vsub.f32 %v2120_v19, %v2131_v21 }
 0x3d5   :  { %v1657_v30 = vsub.f32 %v1577_v26, %v1656_v28  ;;  %19322 = vmatmul.mubr.f32.vlgmr.msra.gmra.mrb[2].mxu1 %v1656_v28  ;;  %v1649_v31 = vsub.f32 %v1647_v25, %v1648_v29  ;;  %v2122_v26 = vld [vmem:[%s24479_s1 + $0x50] sm:$0xff] }
 0x3d6   :  { %21139 = vmatpush3.bf16.msra.mxu1 %v22694_v27  ;;  %19328 = vmatprep.mubr.f32.mxu1 %v1647_v25  ;;  %v2085_v27 = vld [vmem:[%s24479_s1 + $0x20] sm:$0xff]  ;;  %v2228_v25 = vsub.f32 %v2121_v20, %v2134_v22 }
 0x3d7   :  { %21141 = vmatprep.subr.bf16.mxu1 %v22690_v17  ;;  %v1650_v32 = vand.u32 4294901760, %v1649_v31  ;;  %v1658_v34 = vand.u32 4294901760, %v1657_v30  ;;  %v2663_v40 = vand.u32 4294901760, %v2085_v27  ;;  %v2222_v31 = vand.u32 4294901760, %v2221_v24 }
 0x3d9   :  { %19314 = vmatprep.mubr.f32.mxu0 %v1650_v32  ;;  %v1659_v35 = vsub.f32 %v1657_v30, %v1658_v34  ;;  %v2753_v47 = vsub.f32 %v2085_v27, %v2663_v40  ;;  %v22754_v50 = vpack.c.bf16 %v2666_v41, %v2663_v40  ;;  %v2229_v32 = vand.u32 4294901760, %v2228_v25 }
 0x3db   :  { %v1660_v36 = vand.u32 4294901760, %v1659_v35  ;;  %24602 = vst [vmem:[#allocation3_spill] sm:$0xff] %v22754_v50  ;;  %v2754_v52 = vand.u32 4294901760, %v2753_v47  ;;  %v22772_v14 = vpack.c.bf16 %v2760_v48, %v2753_v47  ;;  %v2223_v35 = vsub.f32 %v2221_v24, %v2222_v31 }
 0x3dd   :  { %19315 = vmatmul.mubr.f32.vlgmr.msra.gmra.mrb[4].mxu0 %v1660_v36  ;;  %19329 = vmatmul.mubr.f32.vlgmr.msra.gmra.mrb[2].mxu1 %v1657_v30  ;;  %v2755_v58 = vsub.f32 %v2753_v47, %v2754_v52  ;;  %24606 = vst [vmem:[#allocation7_spill] sm:$0xff] %v22772_v14  ;;  %v22785_v16 = vpack.c.bf16 %v2761_v53, %v2754_v52  ;;  %v2224_v38 = vand.u32 4294901760, %v2223_v35  ;;  %v2089_v52 = vld [vmem:[%s24479_s1 + $0x60] sm:$0xff]  ;;  %v2090_v53 = vld [vmem:[%s24479_s1 + $0x68] sm:$0xff]  ;;  %v2095_v35 = vld [vmem:[%s24479_s1 + $0x90] sm:$0xff] }
 0x3de   :  { %21143 = vmatpush3.bf16.msra.mxu1 %v22690_v17  ;;  %19335 = vmatprep.mubr.f32.mxu1 %v1648_v29  ;;  %v2137_v29 = vand.u32 4294901760, %v2122_v26  ;;  %v2230_v36 = vsub.f32 %v2228_v25, %v2229_v32  ;;  %v22827_v47 = vpack.c.bf16 %v2228_v25, %v2221_v24 }
 0x3df   :  { %21145 = vmatprep.subr.bf16.mxu1 %v22698_v33  ;;  %v2756_v5 = vand.u32 4294901760, %v2755_v58  ;;  %24608 = vst [vmem:[#allocation9_spill] sm:$0xff] %v22785_v16 }
 0x3e0   :  { %v2235_v37 = vsub.f32 %v2122_v26, %v2137_v29 }
 0x3e2   :  { %v2236_v40 = vand.u32 4294901760, %v2235_v37 }
 0x3e4   :  { %v2237_v0 = vsub.f32 %v2235_v37, %v2236_v40 }
 0x3e5   :  { %19336 = vmatmul.mubr.f32.vlgmr.msra.gmra.mrb[2].mxu1 %v1658_v34 }
 0x3e6   :  { %21147 = vmatpush3.bf16.msra.mxu1 %v22698_v33  ;;  %19342 = vmatprep.mubr.f32.mxu1 %v1646_v23  ;;  %v2767_v33 = vsub.f32 %v2087_v42, %v2669_v45  ;;  %v2238_v44 = vand.u32 4294901760, %v2237_v0 }
 0x3e7   :  { %21149 = vmatprep.subr.bf16.mxu1 %v22690_v17 }
 0x3e8   :  { %v2768_v61 = vand.u32 4294901760, %v2767_v33  ;;  %v22776_v15 = vpack.c.bf16 %v2774_v54, %v2767_v33  ;;  %v3707_v54 = vand.u32 4294901760, %v2089_v52 }
 0x3ea   :  { %v2769_v7 = vsub.f32 %v2767_v33, %v2768_v61  ;;  %24607 = vst [vmem:[#allocation8_spill] sm:$0xff] %v22776_v15  ;;  %v22789_v18 = vpack.c.bf16 %v2775_v63, %v2768_v61  ;;  %v2091_v33 = vld [vmem:[%s24479_s1 + $0x70] sm:$0xff]  ;;  %v3716_v61 = vand.u32 4294901760, %v2092_v3  ;;  %v22850_v63 = vand.u32 4294901760, %v11_v59 }
 0x3eb   :  { %v3713_v58 = vand.u32 4294901760, %v2091_v33 }
 0x3ec   :  { %v2770_v10 = vand.u32 4294901760, %v2769_v7  ;;  %24609 = vst [vmem:[#allocation10_spill] sm:$0xff] %v22789_v18  ;;  %v22861_v7 = vsub.f32 %v11_v59, %v22850_v63 }
 0x3ed   :  { %19343 = vmatmul.mubr.f32.vlgmr.msra.gmra.mrb[2].mxu1 %v1656_v28 }
 0x3ee   :  { %21151 = vmatpush3.bf16.msra.mxu1 %v22690_v17  ;;  %19349 = vmatprep.mubr.f32.mxu1 %v1646_v23  ;;  %v22763_v17 = vpack.c.bf16 %v2763_v6, %v2756_v5  ;;  %v22767_v13 = vpack.c.bf16 %v2777_v11, %v2770_v10  ;;  %v22808_v23 = vpack.c.bf16 %v2134_v22, %v2131_v21  ;;  %v12_v10 = vld [vmem:[%s24478_s0 + $0x8] sm:$0xff]  ;;  %v3777_v20 = vand.u32 4294901760, %v22861_v7 }
 0x3ef   :  { %21201 = vmatprep.subr.bf16.mxu1 %v22754_v50  ;;  %v22856_v5 = vsub.f32 %v2091_v33, %v3713_v58  ;;  %v22858_v6 = vsub.f32 %v2092_v3, %v3716_v61  ;;  %v22888_v21 = vpack.c.bf16 %v3716_v61, %v3713_v58 }
 0x3f0   :  { %24604 = vst [vmem:[#allocation5_spill] sm:$0xff] %v22763_v17  ;;  %24605 = vst [vmem:[#allocation6_spill] sm:$0xff] %v22767_v13  ;;  %21153 = vmatprep.subr.bf16.mxu0 %v22808_v23 }
 0x3f1   :  { %21155 = vmatpush3.bf16.msra.mxu0 %v22808_v23  ;;  %v22869_v9 = vpack.c.bf16 %v22858_v6, %v22856_v5  ;;  %v3812_v26 = vand.u32 4294901760, %v22856_v5 }
 0x3f5   :  { %19350 = vmatmul.mubr.f32.vlgmr.msra.gmra.mrb[2].mxu1 %v1656_v28  ;;  %v2123_v28 = vld [vmem:[%s24479_s1 + $0x58] sm:$0xff] }
 0x3f6   :  { %21203 = vmatpush3.bf16.msra.mxu1 %v22754_v50  ;;  %19426 = vmatprep.mubr.f32.mxu1 %v2735_v4  ;;  %v2140_v30 = vand.u32 4294901760, %v2123_v28 }
 0x3f7   :  { %21205 = vmatprep.subr.bf16.mxu1 %v22759_v2 }
 0x3f8   :  { %v22818_v34 = vpack.c.bf16 %v2140_v30, %v2137_v29  ;;  %v2242_v27 = vsub.f32 %v2123_v28, %v2140_v30  ;;  %v24482_v28 = vand.u32 4294901760, %v22858_v6 }
 0x3fa   :  { %21207 = vmatpush3.bf16.msra.mxu1 %v22759_v2  ;;  %21157 = vmatprep.subr.bf16.mxu0 %v22818_v34  ;;  %v2243_v41 = vand.u32 4294901760, %v2242_v27  ;;  %v22829_v48 = vpack.c.bf16 %v2242_v27, %v2235_v37  ;;  %v22912_v30 = vpack.c.bf16 %v24482_v28, %v3812_v26  ;;  %v5317_v37 = vand.u32 4294901760, %v2095_v35 }
 0x3fb   :  { %21209 = vmatprep.subr.bf16.mxu1 %v22763_v17  ;;  %21159 = vmatpush3.bf16.msra.mxu0 %v22818_v34 }
 0x3fd   :  { %19427 = vmatmul.mubr.f32.vlgmr.msra.gmra.mrb[4].mxu1 %v2745_v12  ;;  %v22880_v12 = vand.u32 4294901760, %v12_v10 }
 0x3fe   :  { %21211 = vmatpush3.bf16.msra.mxu1 %v22763_v17  ;;  %19437 = vmatprep.mubr.f32.mxu1 %v22739_v39 }
 0x3ff   :  { %21213 = vmatprep.subr.bf16.mxu1 %v22767_v13  ;;  %v22885_v19 = vsub.f32 %v12_v10, %v22880_v12 }
 0x401   :  { %v24481_v29 = vand.u32 4294901760, %v22885_v19 }
 0x402   :  { %21215 = vmatpush3.bf16.msra.mxu1 %v22767_v13 }
 0x403   :  { %21217 = vmatprep.subr.bf16.mxu1 %v22772_v14 }
 0x405   :  { %19438 = vmatmul.mubr.f32.vlgmr.msra.gmra.mrb[4].mxu1 %v22752_v49 }
 0x406   :  { %21219 = vmatpush3.bf16.msra.mxu1 %v22772_v14  ;;  %19448 = vmatprep.mubr.f32.mxu1 %v2732_v43  ;;  %v2244_v43 = vsub.f32 %v2242_v27, %v2243_v41 }
 0x407   :  { %21221 = vmatprep.subr.bf16.mxu1 %v22776_v15 }
 0x408   :  { %v2245_v45 = vand.u32 4294901760, %v2244_v43 }
 0x40a   :  { %21223 = vmatpush3.bf16.msra.mxu1 %v22776_v15  ;;  %v22825_v46 = vpack.c.bf16 %v2245_v45, %v2238_v44 }
 0x40b   :  { %21225 = vmatprep.subr.bf16.mxu1 %v22754_v50 }
 0x40d   :  { %19449 = vmatmul.mubr.f32.vlgmr.msra.gmra.mrb[4].mxu1 %v2742_v57  ;;  %v3710_v57 = vand.u32 4294901760, %v2090_v53 }
 0x40e   :  { %21227 = vmatpush3.bf16.msra.mxu1 %v22754_v50  ;;  %19459 = vmatprep.mubr.f32.mxu1 %v2733_v51  ;;  %v22833_v51 = vpack.c.bf16 %v2243_v41, %v2236_v40  ;;  %v22941_v40 = vld [vmem:[%s24479_s1 + $0xa8] sm:$0xff] }
 0x40f   :  { %21229 = vmatprep.subr.bf16.mxu1 %v22759_v2  ;;  %v22854_v4 = vsub.f32 %v2090_v53, %v3710_v57  ;;  %v22878_v11 = vpack.c.bf16 %v3710_v57, %v3707_v54  ;;  %v5326_v0 = vand.u32 4294901760, %v22941_v40 }
 0x411   :  { %v3805_v24 = vand.u32 4294901760, %v22854_v4 }
 0x412   :  { %21231 = vmatpush3.bf16.msra.mxu1 %v22759_v2 }
 0x413   :  { %21233 = vmatprep.subr.bf16.mxu1 %v22785_v16 }
 0x415   :  { %19460 = vmatmul.mubr.f32.vlgmr.msra.gmra.mrb[4].mxu1 %v2743_v1  ;;  %v22852_v1 = vsub.f32 %v2089_v52, %v3707_v54 }
 0x416   :  { %21235 = vmatpush3.bf16.msra.mxu1 %v22785_v16  ;;  %19470 = vmatprep.mubr.f32.mxu1 %v22739_v39 }
 0x417   :  { %21237 = vmatprep.subr.bf16.mxu1 %v22789_v18  ;;  %v22865_v8 = vpack.c.bf16 %v22854_v4, %v22852_v1  ;;  %v3798_v22 = vand.u32 4294901760, %v22852_v1 }
 0x419   :  { %v22901_v25 = vpack.c.bf16 %v3805_v24, %v3798_v22 }
 0x41a   :  { %21239 = vmatpush3.bf16.msra.mxu1 %v22789_v18 }
 0x41b   :  { %21241 = vmatprep.subr.bf16.mxu1 %v22754_v50 }
 0x41d   :  { %19471 = vmatmul.mubr.f32.vlgmr.msra.gmra.mrb[4].mxu1 %v22752_v49 }
 0x41e   :  { %21243 = vmatpush3.bf16.msra.mxu1 %v22754_v50  ;;  %19481 = vmatprep.mubr.f32.mxu1 %v22739_v39  ;;  %v2231_v39 = vand.u32 4294901760, %v2230_v36  ;;  %v2096_v36 = vld [vmem:[%s24479_s1 + $0x98] sm:$0xff] }
 0x41f   :  { %21245 = vmatprep.subr.bf16.mxu1 %v22759_v2  ;;  %v5320_v27 = vand.u32 4294901760, %v2096_v36 }
 0x420   :  { %v22822_v42 = vpack.c.bf16 %v2231_v39, %v2224_v38  ;;  %v22936_v39 = vld [vmem:[%s24479_s1 + $0xa0] sm:$0xff] }
 0x421   :  { %v22931_v38 = vpack.c.bf16 %v5320_v27, %v5317_v37  ;;  %v5323_v41 = vand.u32 4294901760, %v22936_v39 }
 0x422   :  { %21247 = vmatpush3.bf16.msra.mxu1 %v22759_v2  ;;  %21161 = vmatprep.subr.bf16.mxu0 %v22822_v42 }
 0x423   :  { %21289 = vmatprep.subr.bf16.mxu1 %v22865_v8  ;;  %v22947_v53 = vpack.c.bf16 %v5326_v0, %v5323_v41 }
 0x425   :  { %19482 = vmatmul.mubr.f32.vlgmr.msra.gmra.mrb[4].mxu1 %v22752_v49  ;;  %v22831_v49 = vpack.c.bf16 %v2229_v32, %v2222_v31 }
 0x426   :  { %19556 = vmatprep.mubr.f32.mxu1 %v22861_v7 }
 0x42b   :  { %21291 = vmatpush3.bf16.xpose.msra.mxu1 %v22865_v8 }
 0x42c   :  { %21293 = vmatprep.subr.bf16.mxu1 %v22869_v9 }
 0x433   :  { %21295 = vmatpush3.bf16.xpose.msra.mxu1 %v22869_v9 }
 0x434   :  { %21297 = vmatprep.subr.bf16.mxu1 %v22878_v11 }
 0x43a   :  { %19557 = vmatmul.mubr.f32.vlgmr.msra.gmra.mrb[6].mxu1 %v22885_v19 }
 0x43b   :  { %21299 = vmatpush3.bf16.xpose.msra.mxu1 %v22878_v11  ;;  %19567 = vmatprep.mubr.f32.mxu1 %v3777_v20 }
 0x43c   :  { %21301 = vmatprep.subr.bf16.mxu1 %v22888_v21 }
 0x443   :  { %21303 = vmatpush3.bf16.xpose.msra.mxu1 %v22888_v21 }
 0x444   :  { %21305 = vmatprep.subr.bf16.mxu1 %v22901_v25 }
 0x44a   :  { %19568 = vmatmul.mubr.f32.vlgmr.msra.gmra.mrb[6].mxu1 %v24481_v29  ;;  %v23016_v29 = vsub.f32 %v22941_v40, %v5326_v0 }
 0x44b   :  { %21307 = vmatpush3.bf16.xpose.msra.mxu1 %v22901_v25  ;;  %19578 = vmatprep.mubr.f32.mxu1 %v22850_v63 }
 0x44c   :  { %21309 = vmatprep.subr.bf16.mxu1 %v22912_v30 }
 0x453   :  { %21311 = vmatpush3.bf16.xpose.msra.mxu1 %v22912_v30 }
 0x454   :  { %21313 = vmatprep.subr.bf16.mxu1 %v22878_v11 }
 0x45a   :  { %19579 = vmatmul.mubr.f32.vlgmr.msra.gmra.mrb[6].mxu1 %v22880_v12 }
 0x45b   :  { %21315 = vmatpush3.bf16.xpose.msra.mxu1 %v22878_v11  ;;  %19589 = vmatprep.mubr.f32.mxu1 %v22850_v63 }
 0x45c   :  { %21317 = vmatprep.subr.bf16.mxu1 %v22888_v21 }
 0x463   :  { %21319 = vmatpush3.bf16.xpose.msra.mxu1 %v22888_v21 }
 0x464   :  { %21369 = vmatprep.subr.bf16.mxu1 %v22931_v38 }
 0x46a   :  { %19590 = vmatmul.mubr.f32.vlgmr.msra.gmra.mrb[6].mxu1 %v22880_v12 }
 0x46b   :  { %21371 = vmatpush3.bf16.xpose.msra.mxu1 %v22931_v38 }
 0x46c   :  { %21373 = vmatprep.subr.bf16.mxu1 %v22947_v53 }
 0x473   :  { %21375 = vmatpush3.bf16.xpose.msra.mxu1 %v22947_v53 }
 0x4b0   :  { %v19316_v31 = vpop.f32.mrb[4].mxu0 }
 0x4b1   :  { %v1652_v32 = vpop.f32.mrb[5].mxu0 }
 0x4c8   :  { %v19351_v43 = vpop.f32.mrb[2].mxu1 }
 0x4c9   :  { %v22208_v44 = vadd.f32 %v19351_v43, %v19316_v31  ;;  %v2071_v45 = vpop.f32.mrb[3].mxu1 }
 0x4ca   :  { %v22209_v52 = vadd.f32 %v2071_v45, %v1652_v32  ;;  %v13_v45 = vld [vmem:[%s24478_s0 + $0x10] sm:$0xff] }
 0x4cb   :  { %v2128_v33 = vsel %vm534_vm2, %v22208_v44, 0 }
 0x4cc   :  { %v22950_v54 = vand.u32 4294901760, %v2128_v33  ;;  %v2125_v57 = vsel %vm534_vm2, %v22209_v52, 0  ;;  %v22975_v52 = vsub.f32 %v2095_v35, %v5317_v37 }
 0x4cd   :  { %v22954_v3 = vand.u32 4294901760, %v2125_v57 }
 0x4ce   :  { %v2210_v58 = vsub.f32 %v2128_v33, %v22950_v54  ;;  %v14_v33 = vld [vmem:[%s24478_s0 + $0x18] sm:$0xff] }
 0x4cf   :  { %v2200_v59 = vsub.f32 %v2125_v57, %v22954_v3 }
 0x4d0   :  { %v2211_v61 = vand.u32 4294901760, %v2210_v58 }
 0x4d1   :  { %v2201_v10 = vand.u32 4294901760, %v2200_v59 }
 0x4d2   :  { %v2212_v31 = vsub.f32 %v2210_v58, %v2211_v61 }
 0x4d3   :  { %v2202_v32 = vsub.f32 %v2200_v59, %v2201_v10 }
 0x4d4   :  { %v2213_v44 = vand.u32 4294901760, %v2212_v31 }
 0x4d5   :  { %v2203_v43 = vand.u32 4294901760, %v2202_v32 }
 0x4d7   :  { %19360 = vmatprep.mubr.f32.mxu0 %v2203_v43 }
 0x4d8   :  { %19361 = vmatmul.mubr.f32.vlgmr.msra.gmra.mrb[6].mxu0 %v2213_v44 }
 0x4d9   :  { %21163 = vmatpush3.bf16.msra.mxu0 %v22822_v42  ;;  %19371 = vmatprep.mubr.f32.mxu0 %v22954_v3  ;;  %v22973_v42 = vand.u32 4294901760, %v13_v45 }
 0x4da   :  { %21165 = vmatprep.subr.bf16.mxu0 %v22825_v46 }
 0x4db   :  { %v22986_v57 = vsub.f32 %v13_v45, %v22973_v42 }
 0x4dd   :  { %21167 = vmatpush3.bf16.msra.mxu0 %v22825_v46  ;;  %v22977_v46 = vsub.f32 %v2096_v36, %v5320_v27  ;;  %v5387_v36 = vand.u32 4294901760, %v22986_v57 }
 0x4de   :  { %21169 = vmatprep.subr.bf16.mxu0 %v22827_v47 }
 0x4df   :  { %v5388_v31 = vsub.f32 %v22986_v57, %v5387_v36 }
 0x4e0   :  { %19372 = vmatmul.mubr.f32.vlgmr.msra.gmra.mrb[6].mxu0 %v22950_v54 }
 0x4e1   :  { %21171 = vmatpush3.bf16.msra.mxu0 %v22827_v47  ;;  %19382 = vmatprep.mubr.f32.mxu0 %v2200_v59  ;;  %v22983_v47 = vand.u32 4294901760, %v14_v33  ;;  %v5408_v59 = vand.u32 4294901760, %v22975_v52  ;;  %v5389_v44 = vand.u32 4294901760, %v5388_v31 }
 0x4e2   :  { %21173 = vmatprep.subr.bf16.mxu0 %v22829_v48 }
 0x4e3   :  { %v22991_v35 = vsub.f32 %v14_v33, %v22983_v47  ;;  %v5409_v37 = vsub.f32 %v22975_v52, %v5408_v59  ;;  %v23013_v33 = vsub.f32 %v22936_v39, %v5323_v41  ;;  %19684 = vmatprep.mubr.f32.mxu1 %v5389_v44 }
 0x4e5   :  { %21175 = vmatpush3.bf16.msra.mxu0 %v22829_v48  ;;  %v5415_v48 = vand.u32 4294901760, %v22977_v46  ;;  %v5410_v32 = vand.u32 4294901760, %v5409_v37  ;;  %v5422_v37 = vand.u32 4294901760, %v23013_v33 }
 0x4e6   :  { %21177 = vmatprep.subr.bf16.mxu0 %v22808_v23 }
 0x4e7   :  { %v5416_v27 = vsub.f32 %v22977_v46, %v5415_v48  ;;  %v5423_v39 = vsub.f32 %v23013_v33, %v5422_v37 }
 0x4e8   :  { %19383 = vmatmul.mubr.f32.vlgmr.msra.gmra.mrb[6].mxu0 %v2210_v58  ;;  %v5397_v58 = vand.u32 4294901760, %v22991_v35 }
 0x4e9   :  { %21179 = vmatpush3.bf16.msra.mxu0 %v22808_v23  ;;  %19393 = vmatprep.mubr.f32.mxu0 %v2201_v10  ;;  %v5417_v10 = vand.u32 4294901760, %v5416_v27  ;;  %v5429_v27 = vand.u32 4294901760, %v23016_v29  ;;  %v5424_v41 = vand.u32 4294901760, %v5423_v39 }
 0x4ea   :  { %21181 = vmatprep.subr.bf16.mxu0 %v22818_v34  ;;  %v5398_v43 = vsub.f32 %v22991_v35, %v5397_v58 }
 0x4eb   :  { %v23010_v45 = vpack.c.bf16 %v5417_v10, %v5410_v32  ;;  %v5430_v40 = vsub.f32 %v23016_v29, %v5429_v27  ;;  %v23053_v32 = vpack.c.bf16 %v22977_v46, %v22975_v52 }
 0x4ec   :  { %v5399_v28 = vand.u32 4294901760, %v5398_v43 }
 0x4ed   :  { %21183 = vmatpush3.bf16.msra.mxu0 %v22818_v34  ;;  %21377 = vmatprep.subr.bf16.mxu1 %v23010_v45  ;;  %v5431_v0 = vand.u32 4294901760, %v5430_v40 }
 0x4ee   :  { %21185 = vmatprep.subr.bf16.mxu0 %v22831_v49  ;;  %19685 = vmatmul.mubr.f32.vlgmr.msra.gmra.mrb[8].mxu1 %v5399_v28 }
 0x4ef   :  { %21379 = vmatpush3.bf16.xpose.msra.mxu1 %v23010_v45  ;;  %19695 = vmatprep.mubr.f32.mxu1 %v22973_v42 }
 0x4f0   :  { %19394 = vmatmul.mubr.f32.vlgmr.msra.gmra.mrb[6].mxu0 %v2211_v61  ;;  %v23030_v61 = vpack.c.bf16 %v5431_v0, %v5424_v41 }
 0x4f1   :  { %21187 = vmatpush3.bf16.msra.mxu0 %v22831_v49  ;;  %19404 = vmatprep.mubr.f32.mxu0 %v22954_v3 }
 0x4f2   :  { %21189 = vmatprep.subr.bf16.mxu0 %v22833_v51  ;;  %21381 = vmatprep.subr.bf16.mxu1 %v23030_v61 }
 0x4f5   :  { %21191 = vmatpush3.bf16.msra.mxu0 %v22833_v51 }
 0x4f6   :  { %21193 = vmatprep.subr.bf16.mxu0 %v22808_v23 }
 0x4f7   :  { %21383 = vmatpush3.bf16.xpose.msra.mxu1 %v23030_v61 }
 0x4f8   :  { %v23034_v49 = vpop.f32.mrb[4].mxu1  ;;  %19405 = vmatmul.mubr.f32.vlgmr.msra.gmra.mrb[6].mxu0 %v22950_v54  ;;  %21385 = vmatprep.subr.bf16.mxu1 %v23053_v32 }
 0x4f9   :  { %3194 = vrot.lane.b32.xlu0 %v23034_v49, %s22603_s13  ;;  %v23039_v28 = vpop.f32.mrb[5].mxu1  ;;  %21195 = vmatpush3.bf16.msra.mxu0 %v22808_v23  ;;  %v3198_v52 = vsel %vm534_vm2, %v23034_v49, 0 }
 0x4fa   :  { %v3196_v51 = vsel %vm534_vm2, %v23039_v28, 0  ;;  %19415 = vmatprep.mubr.f32.mxu0 %v22954_v3  ;;  %3192 = vrot.lane.b32.xlu1 %v23039_v28, %s22603_s13  ;;  %v23061_v3 = vld [vmem:[%s24478_s0 + $0x40] sm:$0xff]  ;;  %v3281_v46 = vand.u32 4294901760, %v3198_v52 }
 0x4fb   :  { %v23047_v31 = vand.u32 4294901760, %v3196_v51  ;;  %21197 = vmatprep.subr.bf16.mxu0 %v22818_v34 }
 0x4fd   :  { %v23056_v23 = vsub.f32 %v3196_v51, %v23047_v31  ;;  %4248 = vrot.lane.b32.xlu0 %v23061_v3, %s22609_s11  ;;  %21199 = vmatpush3.bf16.msra.mxu0 %v22818_v34  ;;  %v23079_v34 = vpack.c.bf16 %v23016_v29, %v23013_v33  ;;  %v23094_v29 = vpack.c.bf16 %v5415_v48, %v5408_v59 }
 0x4fe   :  { %19696 = vmatmul.mubr.f32.vlgmr.msra.gmra.mrb[8].mxu1 %v22983_v47  ;;  %v3282_v59 = vsub.f32 %v3198_v52, %v3281_v46 }
 0x4ff   :  { %v3273_v10 = vand.u32 4294901760, %v23056_v23  ;;  %21387 = vmatpush3.bf16.xpose.msra.mxu1 %v23053_v32  ;;  %19706 = vmatprep.mubr.f32.mxu1 %v22986_v57 }
 0x500   :  { %19416 = vmatmul.mubr.f32.vlgmr.msra.gmra.mrb[6].mxu0 %v22950_v54  ;;  %21389 = vmatprep.subr.bf16.mxu1 %v23079_v34  ;;  %v23100_v54 = vpack.c.bf16 %v5429_v27, %v5422_v37 }
 0x501   :  { %4800 = vrot.lane.b32.xlu0 %v23039_v28, %s22610_s12  ;;  %v3274_v43 = vsub.f32 %v23056_v23, %v3273_v10 }
 0x503   :  { %v3275_v44 = vand.u32 4294901760, %v3274_v43 }
 0x505   :  { %19488 = vmatprep.mubr.f32.mxu0 %v3275_v44 }
 0x507   :  { %21391 = vmatpush3.bf16.xpose.msra.mxu1 %v23079_v34 }
 0x508   :  { %21393 = vmatprep.subr.bf16.mxu1 %v22931_v38 }
 0x50e   :  { %19707 = vmatmul.mubr.f32.vlgmr.msra.gmra.mrb[8].mxu1 %v22991_v35 }
 0x50f   :  { %21395 = vmatpush3.bf16.xpose.msra.mxu1 %v22931_v38  ;;  %19717 = vmatprep.mubr.f32.mxu1 %v5387_v36 }
 0x510   :  { %21397 = vmatprep.subr.bf16.mxu1 %v22947_v53 }
 0x517   :  { %21399 = vmatpush3.bf16.xpose.msra.mxu1 %v22947_v53 }
 0x518   :  { %21401 = vmatprep.subr.bf16.mxu1 %v23094_v29 }
 0x51e   :  { %19718 = vmatmul.mubr.f32.vlgmr.msra.gmra.mrb[8].mxu1 %v5397_v58 }
 0x51f   :  { %21403 = vmatpush3.bf16.xpose.msra.mxu1 %v23094_v29  ;;  %19728 = vmatprep.mubr.f32.mxu1 %v22973_v42 }
 0x520   :  { %21405 = vmatprep.subr.bf16.mxu1 %v23100_v54 }
 0x527   :  { %21407 = vmatpush3.bf16.xpose.msra.mxu1 %v23100_v54 }
 0x528   :  { %21409 = vmatprep.subr.bf16.mxu1 %v22931_v38 }
 0x52e   :  { %19729 = vmatmul.mubr.f32.vlgmr.msra.gmra.mrb[8].mxu1 %v22983_v47 }
 0x52f   :  { %21411 = vmatpush3.bf16.xpose.msra.mxu1 %v22931_v38  ;;  %19739 = vmatprep.mubr.f32.mxu1 %v22973_v42 }
 0x530   :  { %21413 = vmatprep.subr.bf16.mxu1 %v22947_v53 }
 0x537   :  { %21415 = vmatpush3.bf16.xpose.msra.mxu1 %v22947_v53 }
 0x538   :  { %21506 = vmatprep.subr.bf16.mxu1 %v24485_v55 }
 0x53e   :  { %19740 = vmatmul.mubr.f32.vlgmr.msra.gmra.mrb[8].mxu1 %v22983_v47  ;;  %v3283_v47 = vand.u32 4294901760, %v3282_v59 }
 0x53f   :  { %19896 = vmatprep.mubr.msk.f32.mxu1 %vm22606_vm3, %v24483_v56 }
 0x540   :  { %v3284_v51 = vsub.f32 %v3282_v59, %v3283_v47 }
 0x542   :  { %v3285_v52 = vand.u32 4294901760, %v3284_v51 }
 0x56b   :  { %v3195_v57 = vpop.permute.xlu0 %3194 }
 0x56c   :  { %v3202_v48 = vsel %vm534_vm2, %v3195_v57, 0  ;;  %v3193_v42 = vpop.permute.xlu1 %3192 }
 0x56d   :  { %v3208_v35 = vand.u32 4294901760, %v3202_v48  ;;  %v3200_v36 = vsel %vm534_vm2, %v3193_v42, 0  ;;  %v19591_v42 = vpop.f32.mrb[6].mxu1 }
 0x56e   :  { %v3205_v58 = vand.u32 4294901760, %v3200_v36 }
 0x56f   :  { %v3300_v33 = vsub.f32 %v3202_v48, %v3208_v35 }
 0x570   :  { %v21248_v37 = vpack.c.bf16 %v3208_v35, %v3205_v58  ;;  %v3293_v27 = vsub.f32 %v3200_v36, %v3205_v58  ;;  %v4224_v35 = vpop.f32.mrb[7].mxu1  ;;  %v3813_v36 = vsub.f32 %v22856_v5, %v3812_v26 }
 0x571   :  { %v3301_v39 = vand.u32 4294901760, %v3300_v33 }
 0x572   :  { %v3294_v40 = vand.u32 4294901760, %v3293_v27  ;;  %21249 = vmatprep.subr.bf16.mxu0 %v21248_v37  ;;  %v21256_v56 = vpack.c.bf16 %v3300_v33, %v3293_v27 }
 0x573   :  { %v3302_v41 = vsub.f32 %v3300_v33, %v3301_v39  ;;  %21251 = vmatpush3.bf16.xpose.msra.mxu0 %v21248_v37 }
 0x574   :  { %v3295_v0 = vsub.f32 %v3293_v27, %v3294_v40  ;;  %v21264_v48 = vpack.c.bf16 %v3301_v39, %v3294_v40 }
 0x575   :  { %v3303_v43 = vand.u32 4294901760, %v3302_v41 }
 0x576   :  { %v3296_v44 = vand.u32 4294901760, %v3295_v0 }
 0x578   :  { %v21252_v57 = vpack.c.bf16 %v3303_v43, %v3296_v44 }
 0x57a   :  { %19489 = vmatmul.mubr.f32.vlgmr.msra.gmra.mrb[8].mxu0 %v3285_v52  ;;  %21253 = vmatprep.subr.bf16.mxu0 %v21252_v57 }
 0x57b   :  { %21255 = vmatpush3.bf16.xpose.msra.mxu0 %v21252_v57  ;;  %19495 = vmatprep.mubr.f32.mxu0 %v23047_v31 }
 0x57c   :  { %21257 = vmatprep.subr.bf16.mxu0 %v21256_v56 }
 0x582   :  { %19496 = vmatmul.mubr.f32.vlgmr.msra.gmra.mrb[8].mxu0 %v3281_v46 }
 0x583   :  { %21259 = vmatpush3.bf16.xpose.msra.mxu0 %v21256_v56  ;;  %19502 = vmatprep.mubr.f32.mxu0 %v23056_v23  ;;  %v3778_v56 = vsub.f32 %v22861_v7, %v3777_v20  ;;  %v3799_v23 = vsub.f32 %v22852_v1, %v3798_v22  ;;  %v24610_v1 = vand.u32 4294901760, %v22858_v6 }
 0x584   :  { %21261 = vmatprep.subr.bf16.mxu0 %v21248_v37 }
 0x585   :  { %v3800_v7 = vand.u32 4294901760, %v3799_v23  ;;  %v3820_v22 = vsub.f32 %v22858_v6, %v24610_v1  ;;  %v18210_v23 = vadd.f32 -1.0, %v23061_v3 }
 0x587   :  { %v3821_v58 = vand.u32 4294901760, %v3820_v22 }
 0x58a   :  { %19503 = vmatmul.mubr.f32.vlgmr.msra.gmra.mrb[8].mxu0 %v3282_v59  ;;  %v3779_v59 = vand.u32 4294901760, %v3778_v56 }
 0x58b   :  { %21263 = vmatpush3.bf16.xpose.msra.mxu0 %v21248_v37  ;;  %19509 = vmatprep.mubr.f32.mxu0 %v3273_v10  ;;  %v3806_v10 = vsub.f32 %v22854_v4, %v3805_v24  ;;  %v24611_v4 = vand.u32 4294901760, %v22885_v19 }
 0x58c   :  { %21265 = vmatprep.subr.bf16.mxu0 %v21264_v48 }
 0x58d   :  { %v3807_v20 = vand.u32 4294901760, %v3806_v10  ;;  %v3788_v24 = vsub.f32 %v22885_v19, %v24611_v4  ;;  %v2083_v10 = vmul.f32 1e+09, %v18210_v23 }
 0x58f   :  { %v3789_v33 = vand.u32 4294901760, %v3788_v24  ;;  %v2093_v24 = vld [vmem:[%s24479_s1 + $0x80] sm:$0xff] }
 0x592   :  { %19510 = vmatmul.mubr.f32.vlgmr.msra.gmra.mrb[8].mxu0 %v3283_v47 }
 0x593   :  { %21267 = vmatpush3.bf16.xpose.msra.mxu0 %v21264_v48  ;;  %19516 = vmatprep.mubr.f32.mxu0 %v23047_v31 }
 0x594   :  { %21269 = vmatprep.subr.bf16.mxu0 %v21248_v37 }
 0x59a   :  { %19517 = vmatmul.mubr.f32.vlgmr.msra.gmra.mrb[8].mxu0 %v3281_v46 }
 0x59b   :  { %21271 = vmatpush3.bf16.xpose.msra.mxu0 %v21248_v37  ;;  %19523 = vmatprep.mubr.f32.mxu0 %v23047_v31  ;;  %v23137_v31 = vpack.c.bf16 %v3807_v20, %v3800_v7 }
 0x59c   :  { %21273 = vmatprep.subr.bf16.mxu0 %v22878_v11 }
 0x5a2   :  { %19524 = vmatmul.mubr.f32.vlgmr.msra.gmra.mrb[8].mxu0 %v3281_v46  ;;  %v3814_v46 = vand.u32 4294901760, %v3813_v36 }
 0x5a3   :  { %21275 = vmatpush3.bf16.xpose.msra.mxu0 %v22878_v11  ;;  %19534 = vmatprep.mubr.f32.mxu0 %v3779_v59 }
 0x5a4   :  { %21277 = vmatprep.subr.bf16.mxu0 %v22888_v21  ;;  %v23150_v37 = vpack.c.bf16 %v3821_v58, %v3814_v46  ;;  %v2094_v46 = vld [vmem:[%s24479_s1 + $0x88] sm:$0xff]  ;;  %v4263_v58 = vand.u32 4294901760, %v2093_v24 }
 0x5ab   :  { %21279 = vmatpush3.bf16.xpose.msra.mxu0 %v22888_v21 }
 0x5ac   :  { %21281 = vmatprep.subr.bf16.mxu0 %v23137_v31 }
 0x5b2   :  { %19535 = vmatmul.mubr.f32.vlgmr.msra.gmra.mrb[10].mxu0 %v3789_v33  ;;  %v4266_v33 = vand.u32 4294901760, %v2094_v46 }
 0x5b3   :  { %21283 = vmatpush3.bf16.xpose.msra.mxu0 %v23137_v31  ;;  %19545 = vmatprep.mubr.f32.mxu0 %v22850_v63 }
 0x5b4   :  { %21285 = vmatprep.subr.bf16.mxu0 %v23150_v37 }
 0x5bb   :  { %21287 = vmatpush3.bf16.xpose.msra.mxu0 %v23150_v37 }
 0x5c2   :  { %19546 = vmatmul.mubr.f32.vlgmr.msra.gmra.mrb[10].mxu0 %v22880_v12 }
 0x5d3   :  { %v23157_v5 = vpop.f32.mrb[6].mxu0 }
 0x5d4   :  { %v4812_v6 = vsel %vm534_vm2, %v23157_v5, 0  ;;  %v23161_v19 = vpop.f32.mrb[7].mxu0 }
 0x5d5   :  { %v4818_v26 = vand.u32 4294901760, %v4812_v6  ;;  %v4809_v27 = vsel %vm534_vm2, %v23161_v19, 0 }
 0x5d6   :  { %v4815_v47 = vand.u32 4294901760, %v4809_v27 }
 0x5d7   :  { %v4910_v39 = vsub.f32 %v4812_v6, %v4818_v26 }
 0x5d8   :  { %v23165_v63 = vpack.c.bf16 %v4818_v26, %v4815_v47  ;;  %v4903_v40 = vsub.f32 %v4809_v27, %v4815_v47  ;;  %v23191_v27 = vpack.c.bf16 %v4266_v33, %v4263_v58  ;;  %v4358_v47 = vsub.f32 %v2094_v46, %v4266_v33 }
 0x5d9   :  { %v4911_v41 = vand.u32 4294901760, %v4910_v39 }
 0x5da   :  { %24612 = vst [vmem:[#allocation11_spill] sm:$0xff] %v23165_v63  ;;  %v4904_v0 = vand.u32 4294901760, %v4903_v40  ;;  %v23167_v51 = vpack.c.bf16 %v4910_v39, %v4903_v40  ;;  %24616 = vst [vmem:[#allocation15_spill] sm:$0xff] %v23191_v27  ;;  %21321 = vmatprep.subr.bf16.mxu0 %v23191_v27 }
 0x5db   :  { %v4912_v12 = vsub.f32 %v4910_v39, %v4911_v41  ;;  %21323 = vmatpush3.bf16.msra.mxu0 %v23191_v27 }
 0x5dc   :  { %24613 = vst [vmem:[#allocation12_spill] sm:$0xff] %v23167_v51  ;;  %v4905_v43 = vsub.f32 %v4903_v40, %v4904_v0  ;;  %v23169_v44 = vpack.c.bf16 %v4911_v41, %v4904_v0  ;;  %v4359_v40 = vand.u32 4294901760, %v4358_v47 }
 0x5dd   :  { %v4913_v52 = vand.u32 4294901760, %v4912_v12  ;;  %v22596_v12 = vld [vmem:[%s24478_s0 + $0x48] sm:$0xff] }
 0x5de   :  { %24614 = vst [vmem:[#allocation13_spill] sm:$0xff] %v23169_v44  ;;  %v4906_v57 = vand.u32 4294901760, %v4905_v43  ;;  %v4360_v0 = vsub.f32 %v4358_v47, %v4359_v40  ;;  %v18211_v23 = vadd.f32 -1.0, %v22596_v12 }
 0x5e0   :  { %v23171_v48 = vpack.c.bf16 %v4913_v52, %v4906_v57  ;;  %v4361_v52 = vand.u32 4294901760, %v4360_v0 }
 0x5e2   :  { %24615 = vst [vmem:[#allocation14_spill] sm:$0xff] %v23171_v48 }
 0x611   :  { %v23173_v56 = vpop.f32.mrb[8].mxu1 }
 0x612   :  { %v23175_v59 = vpop.f32.mrb[9].mxu1 }
 0x613   :  { %5850 = vrot.lane.b32.xlu0 %v23175_v59, %s22611_s14 }
 0x617   :  { %5858 = vrot.lane.b32.xlu0 %v23061_v3, %s22612_s15 }
 0x61b   :  { %6378 = vrot.lane.b32.xlu0 %v2083_v10, %s22612_s15 }
 0x61f   :  { %4770 = vrot.lane.b32.xlu0 %v2083_v10, %s22609_s11 }
 0x675   :  { %v19525_v7 = vpop.f32.mrb[8].mxu0 }
 0x676   :  { %v3696_v20 = vpop.f32.mrb[9].mxu0 }
 0x695   :  { %v19547_v36 = vpop.f32.mrb[10].mxu0 }
 0x696   :  { %v22210_v1 = vadd.f32 %v19591_v42, %v19547_v36  ;;  %v3882_v22 = vpop.f32.mrb[11].mxu0  ;;  %v4351_v42 = vsub.f32 %v2093_v24, %v4263_v58 }
 0x697   :  { %v22211_v4 = vadd.f32 %v4224_v35, %v3882_v22 }
 0x698   :  { %v4235_v3 = vadd.f32 1.0, %v22210_v1  ;;  %4242 = vrot.lane.b32.xlu1 %v22210_v1, %s22611_s14  ;;  %v4352_v39 = vand.u32 4294901760, %v4351_v42  ;;  %v23207_v10 = vpack.c.bf16 %v4358_v47, %v4351_v42 }
 0x699   :  { %v4234_v6 = vadd.f32 1.0, %v22211_v4 }
 0x69a   :  { %v4237_v26 = vmul.f32 %v19525_v7, %v4235_v3  ;;  %v4353_v41 = vsub.f32 %v4351_v42, %v4352_v39  ;;  %24618 = vst [vmem:[#allocation17_spill] sm:$0xff] %v23207_v10  ;;  %v2084_v7 = vmul.f32 1e+09, %v18211_v23 }
 0x69b   :  { %v4236_v35 = vmul.f32 %v4234_v6, %v3696_v20  ;;  %v23212_v20 = vpack.c.bf16 %v4359_v40, %v4352_v39 }
 0x69c   :  { %4240 = vrot.lane.b32.xlu1 %v22211_v4, %s22611_s14  ;;  %v4354_v43 = vand.u32 4294901760, %v4353_v41  ;;  %v23214_v4 = vpop.permute.xlu0 %4248 }
 0x69d   :  { %24619 = vst [vmem:[#allocation18_spill] sm:$0xff] %v23212_v20  ;;  %24620 = vst [vmem:[#allocation19_spill] sm:$0xff] %v23214_v4 }
 0x69e   :  { %v23200_v57 = vpack.c.bf16 %v4361_v52, %v4354_v43 }
 0x6a0   :  { %4250 = vrot.lane.b32.xlu1 %v22596_v12, %s22609_s11  ;;  %24617 = vst [vmem:[#allocation16_spill] sm:$0xff] %v23200_v57  ;;  %21325 = vmatprep.subr.bf16.mxu0 %v23200_v57  ;;  %v4801_v52 = vpop.permute.xlu0 %4800 }
 0x6a1   :  { %v4804_v23 = vsel %vm534_vm2, %v4801_v52, 0 }
 0x6a4   :  { %4802 = vrot.lane.b32.xlu1 %v23034_v49, %s22610_s12 }
 0x6a8   :  { %5852 = vrot.lane.b32.xlu1 %v23173_v56, %s22611_s14 }
 0x6ac   :  { %5860 = vrot.lane.b32.xlu1 %v22596_v12, %s22612_s15 }
 0x6b0   :  { %6380 = vrot.lane.b32.xlu1 %v2084_v7, %s22612_s15 }
 0x6b4   :  { %4772 = vrot.lane.b32.xlu1 %v2084_v7, %s22609_s11  ;;  %v4881_v7 = vand.u32 4294901760, %v4804_v23 }
 0x70a   :  { %v4243_v36 = vpop.permute.xlu1 %4242 }
 0x70b   :  { %v4247_v24 = vadd.f32 %v4243_v36, %v4237_v26 }
 0x70e   :  { %v4241_v1 = vpop.permute.xlu1 %4240 }
 0x70f   :  { %v4246_v22 = vadd.f32 %v4241_v1, %v4236_v35  ;;  %v4882_v1 = vsub.f32 %v4804_v23, %v4881_v7 }
 0x711   :  { %v23217_v46 = vmul.f32 %v23214_v4, %v4246_v22 }
 0x712   :  { %v23219_v3 = vpop.permute.xlu1 %4250 }
 0x713   :  { %24621 = vst [vmem:[#allocation20_spill] sm:$0xff] %v23219_v3  ;;  %v4257_v58 = vsel %vm1550_vm6, %v23217_v46, 0  ;;  %v23224_v33 = vmul.f32 %v23219_v3, %v4247_v24  ;;  %v4883_v24 = vand.u32 4294901760, %v4882_v1 }
 0x714   :  { %v4329_v6 = vand.u32 4294901760, %v4257_v58 }
 0x715   :  { %v4260_v42 = vsel %vm1550_vm6, %v23224_v33, 0 }
 0x716   :  { %v4330_v47 = vsub.f32 %v4257_v58, %v4329_v6  ;;  %v4339_v35 = vand.u32 4294901760, %v4260_v42  ;;  %v4803_v36 = vpop.permute.xlu1 %4802 }
 0x717   :  { %v4806_v22 = vsel %vm534_vm2, %v4803_v36, 0 }
 0x718   :  { %v4340_v39 = vsub.f32 %v4260_v42, %v4339_v35  ;;  %v4331_v40 = vand.u32 4294901760, %v4330_v47  ;;  %v4891_v58 = vand.u32 4294901760, %v4806_v22 }
 0x71a   :  { %v4341_v26 = vand.u32 4294901760, %v4340_v39  ;;  %v4332_v41 = vsub.f32 %v4330_v47, %v4331_v40  ;;  %v4892_v42 = vsub.f32 %v4806_v22, %v4891_v58 }
 0x71c   :  { %v4333_v0 = vand.u32 4294901760, %v4332_v41  ;;  %v4342_v12 = vsub.f32 %v4340_v39, %v4341_v26 }
 0x71e   :  { %19596 = vmatprep.mubr.f32.mxu0 %v4333_v0  ;;  %v4343_v43 = vand.u32 4294901760, %v4342_v12 }
 0x720   :  { %19597 = vmatmul.mubr.f32.vlgmr.msra.gmra.mrb[12].mxu0 %v4343_v43 }
 0x721   :  { %21327 = vmatpush3.bf16.msra.mxu0 %v23200_v57  ;;  %19603 = vmatprep.mubr.f32.mxu0 %v4329_v6 }
 0x722   :  { %21329 = vmatprep.subr.bf16.mxu0 %v23207_v10 }
 0x728   :  { %19604 = vmatmul.mubr.f32.vlgmr.msra.gmra.mrb[12].mxu0 %v4339_v35 }
 0x729   :  { %21331 = vmatpush3.bf16.msra.mxu0 %v23207_v10  ;;  %19610 = vmatprep.mubr.f32.mxu0 %v4330_v47  ;;  %v4884_v47 = vsub.f32 %v4882_v1, %v4883_v24 }
 0x72a   :  { %21333 = vmatprep.subr.bf16.mxu0 %v23191_v27 }
 0x730   :  { %19611 = vmatmul.mubr.f32.vlgmr.msra.gmra.mrb[12].mxu0 %v4340_v39  ;;  %v4893_v39 = vand.u32 4294901760, %v4892_v42 }
 0x731   :  { %21335 = vmatpush3.bf16.msra.mxu0 %v23191_v27  ;;  %19617 = vmatprep.mubr.f32.mxu0 %v4331_v40  ;;  %v4885_v40 = vand.u32 4294901760, %v4884_v47 }
 0x732   :  { %21337 = vmatprep.subr.bf16.mxu0 %v23212_v20 }
 0x738   :  { %19618 = vmatmul.mubr.f32.vlgmr.msra.gmra.mrb[12].mxu0 %v4341_v26  ;;  %v4894_v26 = vsub.f32 %v4892_v42, %v4893_v39 }
 0x739   :  { %21339 = vmatpush3.bf16.msra.mxu0 %v23212_v20  ;;  %19624 = vmatprep.mubr.f32.mxu0 %v4329_v6 }
 0x73a   :  { %21341 = vmatprep.subr.bf16.mxu0 %v23191_v27  ;;  %v4895_v41 = vand.u32 4294901760, %v4894_v26 }
 0x740   :  { %19625 = vmatmul.mubr.f32.vlgmr.msra.gmra.mrb[12].mxu0 %v4339_v35 }
 0x741   :  { %21343 = vmatpush3.bf16.msra.mxu0 %v23191_v27  ;;  %19631 = vmatprep.mubr.f32.mxu0 %v4329_v6  ;;  %v2099_v6 = vld [vmem:[%s24479_s1 + $0xb0] sm:$0xff] }
 0x742   :  { %21345 = vmatprep.subr.bf16.mxu0 %v23165_v63  ;;  %v5873_v0 = vand.u32 4294901760, %v2099_v6 }
 0x744   :  { %v5961_v52 = vsub.f32 %v2099_v6, %v5873_v0  ;;  %v5853_v6 = vpop.permute.xlu1 %5852 }
 0x746   :  { %v5962_v36 = vand.u32 4294901760, %v5961_v52 }
 0x748   :  { %19632 = vmatmul.mubr.f32.vlgmr.msra.gmra.mrb[12].mxu0 %v4339_v35  ;;  %v2100_v35 = vld [vmem:[%s24479_s1 + $0xb8] sm:$0xff] }
 0x749   :  { %19638 = vmatprep.mubr.f32.mxu0 %v4885_v40  ;;  %v5876_v12 = vand.u32 4294901760, %v2100_v35 }
 0x74a   :  { %21347 = vmatpush3.bf16.xpose.msra.mxu0 %v23165_v63 }
 0x74b   :  { %21349 = vmatprep.subr.bf16.mxu0 %v23171_v48  ;;  %v23257_v43 = vpack.c.bf16 %v5876_v12, %v5873_v0  ;;  %v5968_v23 = vsub.f32 %v2100_v35, %v5876_v12  ;;  %v5845_v0 = vadd.f32 1.0, %v23173_v56  ;;  %v23275_v12 = vpop.permute.xlu1 %5860 }
 0x74c   :  { %24627 = vst [vmem:[#allocation26_spill] sm:$0xff] %v23275_v12 }
 0x74d   :  { %24622 = vst [vmem:[#allocation21_spill] sm:$0xff] %v23257_v43  ;;  %v23264_v47 = vpack.c.bf16 %v5968_v23, %v5961_v52 }
 0x74f   :  { %24624 = vst [vmem:[#allocation23_spill] sm:$0xff] %v23264_v47  ;;  %v23280_v55 = vpop.permute.xlu1 %6380 }
 0x750   :  { %24629 = vst [vmem:[#allocation28_spill] sm:$0xff] %v23280_v55 }
 0x751   :  { %19639 = vmatmul.mubr.f32.vlgmr.msra.gmra.mrb[14].mxu0 %v4895_v41  ;;  %v5851_v41 = vpop.permute.xlu0 %5850 }
 0x752   :  { %21351 = vmatpush3.bf16.xpose.msra.mxu0 %v23171_v48  ;;  %19645 = vmatprep.mubr.f32.mxu0 %v4881_v7 }
 0x753   :  { %21353 = vmatprep.subr.bf16.mxu0 %v23167_v51 }
 0x755   :  { %v23272_v35 = vpop.permute.xlu0 %5858 }
 0x756   :  { %24626 = vst [vmem:[#allocation25_spill] sm:$0xff] %v23272_v35 }
 0x759   :  { %19646 = vmatmul.mubr.f32.vlgmr.msra.gmra.mrb[14].mxu0 %v4891_v58 }
 0x75a   :  { %21355 = vmatpush3.bf16.xpose.msra.mxu0 %v23167_v51  ;;  %19652 = vmatprep.mubr.f32.mxu0 %v4882_v1  ;;  %v5969_v1 = vand.u32 4294901760, %v5968_v23 }
 0x75b   :  { %21357 = vmatprep.subr.bf16.mxu0 %v23165_v63 }
 0x75c   :  { %v5970_v22 = vsub.f32 %v5968_v23, %v5969_v1 }
 0x761   :  { %19653 = vmatmul.mubr.f32.vlgmr.msra.gmra.mrb[14].mxu0 %v4892_v42 }
 0x762   :  { %21359 = vmatpush3.bf16.xpose.msra.mxu0 %v23165_v63  ;;  %19659 = vmatprep.mubr.f32.mxu0 %v4883_v24 }
 0x763   :  { %21361 = vmatprep.subr.bf16.mxu0 %v23169_v44 }
 0x769   :  { %19660 = vmatmul.mubr.f32.vlgmr.msra.gmra.mrb[14].mxu0 %v4893_v39  ;;  %v23266_v39 = vpack.c.bf16 %v5969_v1, %v5962_v36 }
 0x76a   :  { %21363 = vmatpush3.bf16.xpose.msra.mxu0 %v23169_v44  ;;  %19666 = vmatprep.mubr.f32.mxu0 %v4881_v7 }
 0x76b   :  { %21365 = vmatprep.subr.bf16.mxu0 %v23165_v63  ;;  %24625 = vst [vmem:[#allocation24_spill] sm:$0xff] %v23266_v39 }
 0x771   :  { %19667 = vmatmul.mubr.f32.vlgmr.msra.gmra.mrb[14].mxu0 %v4891_v58 }
 0x772   :  { %21367 = vmatpush3.bf16.xpose.msra.mxu0 %v23165_v63  ;;  %19673 = vmatprep.mubr.f32.mxu0 %v4881_v7  ;;  %v5963_v7 = vsub.f32 %v5961_v52, %v5962_v36 }
 0x773   :  { %21417 = vmatprep.subr.bf16.mxu0 %v23257_v43 }
 0x774   :  { %v5964_v24 = vand.u32 4294901760, %v5963_v7  ;;  %v5844_v7 = vadd.f32 1.0, %v23175_v59 }
 0x779   :  { %19674 = vmatmul.mubr.f32.vlgmr.msra.gmra.mrb[14].mxu0 %v4891_v58  ;;  %v5971_v58 = vand.u32 4294901760, %v5970_v22 }
 0x77a   :  { %21419 = vmatpush3.bf16.msra.mxu0 %v23257_v43 }
 0x77b   :  { %v23261_v42 = vpack.c.bf16 %v5971_v58, %v5964_v24  ;;  %v23278_v24 = vpop.permute.xlu0 %6378 }
 0x77c   :  { %24628 = vst [vmem:[#allocation27_spill] sm:$0xff] %v23278_v24 }
 0x77d   :  { %24623 = vst [vmem:[#allocation22_spill] sm:$0xff] %v23261_v42  ;;  %21421 = vmatprep.subr.bf16.mxu0 %v23261_v42 }
 0x77f   :  { %v23284_v48 = vpop.permute.xlu0 %4770 }
 0x780   :  { %24630 = vst [vmem:[#allocation29_spill] sm:$0xff] %v23284_v48 }
 0x81b   :  { %v23268_v40 = vpop.f32.mrb[12].mxu0 }
 0x81c   :  { %v23270_v26 = vpop.f32.mrb[13].mxu0 }
 0x84c   :  { %v19675_v22 = vpop.f32.mrb[14].mxu0 }
 0x84d   :  { %v5847_v52 = vmul.f32 %v19675_v22, %v5845_v0  ;;  %v5306_v23 = vpop.f32.mrb[15].mxu0 }
 0x84e   :  { %v5846_v36 = vmul.f32 %v5844_v7, %v5306_v23  ;;  %v4776_v7 = vadd.f32 %v23284_v48, %v23217_v46  ;;  %v23294_v23 = vpop.permute.xlu1 %4772 }
 0x84f   :  { %v5857_v1 = vadd.f32 %v5853_v6, %v5847_v52  ;;  %24631 = vst [vmem:[#allocation30_spill] sm:$0xff] %v23294_v23 }
 0x850   :  { %v5856_v58 = vadd.f32 %v5851_v41, %v5846_v36 }
 0x851   :  { %v5865_v44 = vmul.f32 %v23275_v12, %v5857_v1 }
 0x852   :  { %v5864_v51 = vmul.f32 %v23272_v35, %v5856_v58  ;;  %v4777_v58 = vadd.f32 %v23294_v23, %v23224_v33 }
 0x853   :  { %v6385_v56 = vadd.f32 %v23280_v55, %v5865_v44  ;;  %v5870_v59 = vsel %vm1550_vm6, %v5865_v44, 0 }
 0x854   :  { %v5949_v63 = vand.u32 4294901760, %v5870_v59  ;;  %v6384_v20 = vadd.f32 %v23278_v24, %v5864_v51  ;;  %v5867_v0 = vsel %vm1550_vm6, %v5864_v51, 0  ;;  %v4778_v51 = vsel %vm1550_vm6, %v4776_v7, -inf }
 0x855   :  { %v6389_v6 = vsel %vm1550_vm6, %v6385_v56, -inf  ;;  %v5939_v41 = vand.u32 4294901760, %v5867_v0  ;;  %v4781_v46 = vsel %vm1550_vm6, %v4777_v58, -inf }
 0x856   :  { %6390 = vmax.xlane.f32.xlu1 %v6389_v6  ;;  %v5950_v22 = vsub.f32 %v5870_v59, %v5949_v63  ;;  %v6386_v52 = vsel %vm1550_vm6, %v6384_v20, -inf }
 0x857   :  { %6387 = vmax.xlane.f32.xlu0 %v6386_v52  ;;  %v5940_v36 = vsub.f32 %v5867_v0, %v5939_v41 }
 0x858   :  { %v5951_v44 = vand.u32 4294901760, %v5950_v22 }
 0x859   :  { %v5941_v1 = vand.u32 4294901760, %v5940_v36 }
 0x85a   :  { %v5952_v24 = vsub.f32 %v5950_v22, %v5951_v44 }
 0x85b   :  { %4779 = vmax.xlane.f32.xlu0 %v4778_v51  ;;  %v5942_v55 = vsub.f32 %v5940_v36, %v5941_v1 }
 0x85c   :  { %v5953_v59 = vand.u32 4294901760, %v5952_v24 }
 0x85d   :  { %v5943_v35 = vand.u32 4294901760, %v5942_v55 }
 0x85f   :  { %4782 = vmax.xlane.f32.xlu0 %v4781_v46  ;;  %19746 = vmatprep.mubr.f32.mxu0 %v5943_v35 }
 0x860   :  { %19747 = vmatmul.mubr.f32.vlgmr.msra.gmra.mrb[16].mxu0 %v5953_v59 }
 0x861   :  { %19753 = vmatprep.mubr.f32.mxu0 %v5939_v41  ;;  %21423 = vmatpush3.bf16.msra.mxu0 %v23261_v42 }
 0x862   :  { %21425 = vmatprep.subr.bf16.mxu0 %v23264_v47 }
 0x868   :  { %19754 = vmatmul.mubr.f32.vlgmr.msra.gmra.mrb[16].mxu0 %v5949_v63 }
 0x869   :  { %19760 = vmatprep.mubr.f32.mxu0 %v5940_v36  ;;  %21427 = vmatpush3.bf16.msra.mxu0 %v23264_v47 }
 0x86a   :  { %21429 = vmatprep.subr.bf16.mxu0 %v23257_v43 }
 0x870   :  { %19761 = vmatmul.mubr.f32.vlgmr.msra.gmra.mrb[16].mxu0 %v5950_v22 }
 0x871   :  { %19767 = vmatprep.mubr.f32.mxu0 %v5941_v1  ;;  %21431 = vmatpush3.bf16.msra.mxu0 %v23257_v43 }
 0x872   :  { %21433 = vmatprep.subr.bf16.mxu0 %v23266_v39 }
 0x878   :  { %19768 = vmatmul.mubr.f32.vlgmr.msra.gmra.mrb[16].mxu0 %v5951_v44 }
 0x879   :  { %19774 = vmatprep.mubr.f32.mxu0 %v5939_v41  ;;  %21435 = vmatpush3.bf16.msra.mxu0 %v23266_v39 }
 0x87a   :  { %21437 = vmatprep.subr.bf16.mxu0 %v23257_v43 }
 0x880   :  { %19775 = vmatmul.mubr.f32.vlgmr.msra.gmra.mrb[16].mxu0 %v5949_v63 }
 0x881   :  { %19781 = vmatprep.mubr.f32.mxu0 %v5939_v41  ;;  %21439 = vmatpush3.bf16.msra.mxu0 %v23257_v43 }
 0x888   :  { %19782 = vmatmul.mubr.f32.vlgmr.msra.gmra.mrb[16].mxu0 %v5949_v63 }
 0x8e3   :  { %v6391_v55 = vpop.xlane.xlu1 %6390 }
 0x8e4   :  { %v6393_v33 = vsub.f32 %v6385_v56, %v6391_v55  ;;  %v6388_v35 = vpop.xlane.xlu0 %6387 }
 0x8e5   :  { %v6392_v24 = vsub.f32 %v6384_v20, %v6388_v35 }
 0x8e6   :  { %v6396_v0 = vmul.f32 1.442695, %v6393_v33 }
 0x8e7   :  { %v6394_v6 = vmul.f32 1.442695, %v6392_v24 }
 0x8e8   :  { %22563 = vpow2.f32 %v6396_v0  ;;  %v4780_v63 = vpop.xlane.xlu0 %4779 }
 0x8e9   :  { %22565 = vpow2.f32 %v6394_v6  ;;  %v4784_v41 = vsub.f32 %v4776_v7, %v4780_v63 }
 0x8eb   :  { %v4786_v51 = vmul.f32 1.442695, %v4784_v41 }
 0x8ec   :  { %v4783_v20 = vpop.xlane.xlu0 %4782 }
 0x8ed   :  { %v4785_v56 = vsub.f32 %v4777_v58, %v4783_v20 }
 0x8ef   :  { %v4788_v1 = vmul.f32 1.442695, %v4785_v56 }
 0x8f1   :  { %22567 = vpow2.f32 %v4788_v1 }
 0x8f2   :  { %v22564_v22 = vpop.eup %22563  ;;  %22569 = vpow2.f32 %v4786_v51 }
 0x8f3   :  { %v22566_v52 = vpop.eup %22565  ;;  %v6401_v36 = vsel %vm1550_vm6, %v22564_v22, 0.0 }
 0x8f4   :  { %6402 = vadd.xlane.f32.xlu0 %v6401_v36  ;;  %v6398_v44 = vsel %vm1550_vm6, %v22566_v52, 0.0 }
 0x8f5   :  { %6399 = vadd.xlane.f32.xlu1 %v6398_v44 }
 0x8fb   :  { %v22568_v46 = vpop.eup %22567 }
 0x8fc   :  { %v22570_v59 = vpop.eup %22569  ;;  %v4793_v55 = vsel %vm1550_vm6, %v22568_v46, 0.0 }
 0x8fd   :  { %v4790_v33 = vsel %vm1550_vm6, %v22570_v59, 0.0 }
 0x906   :  { %6418 = vrot.lane.b32.xlu1 %v23161_v19, %s22610_s12 }
 0x90a   :  { %6420 = vrot.lane.b32.xlu0 %v23157_v5, %s22610_s12 }
 0x929   :  { %4794 = vadd.xlane.f32.xlu0 %v4793_v55 }
 0x92a   :  { %4791 = vadd.xlane.f32.xlu1 %v4790_v33 }
 0x93b   :  { %6422 = vrot.lane.b32.xlu1 %v23039_v28, %s22613_s26  ;;  %v23331_v28 = vld [vmem:[%s24478_s0 + $0x50] sm:$0xff] }
 0x95b   :  { %v23319_v5 = vpop.f32.mrb[16].mxu0 }
 0x95c   :  { %v23321_v19 = vpop.f32.mrb[17].mxu0 }
 0x981   :  { %v6403_v7 = vpop.xlane.xlu0 %6402 }
 0x982   :  { %22571 = vrcp.f32 %v6403_v7  ;;  %v6400_v58 = vpop.xlane.xlu1 %6399 }
 0x983   :  { %22573 = vrcp.f32 %v6400_v58 }
 0x985   :  { %v6421_v44 = vpop.permute.xlu0 %6420 }
 0x986   :  { %v6419_v36 = vpop.permute.xlu1 %6418 }
 0x98c   :  { %v22572_v35 = vpop.eup %22571 }
 0x98d   :  { %v22574_v24 = vpop.eup %22573  ;;  %v6407_v0 = vmul.f32 %v22572_v35, %v22564_v22 }
 0x98e   :  { %v6406_v6 = vmul.f32 %v22574_v24, %v22566_v52 }
 0x98f   :  { %6412 = vrot.lane.b32.xlu0 %v6407_v0, %s22614_s27 }
 0x990   :  { %6410 = vrot.lane.b32.xlu1 %v6406_v6, %s22614_s27 }
 0x993   :  { %6426 = vrot.lane.b32.xlu0 %v6419_v36, %s22613_s26 }
 0x994   :  { %6424 = vrot.lane.b32.xlu1 %v23034_v49, %s22613_s26 }
 0x997   :  { %6969 = vrot.lane.b32.xlu0 %v23331_v28, %s22615_s30 }
 0x998   :  { %6428 = vrot.lane.b32.xlu1 %v6421_v44, %s22613_s26 }
 0x9b6   :  { %v4795_v22 = vpop.xlane.xlu0 %4794 }
 0x9b7   :  { %v4792_v52 = vpop.xlane.xlu1 %4791  ;;  %22575 = vrcp.f32 %v4795_v22 }
 0x9b8   :  { %22577 = vrcp.f32 %v4792_v52 }
 0x9bb   :  { %v6423_v63 = vpop.permute.xlu1 %6422 }
 0x9bc   :  { %v6441_v41 = vand.u32 4294901760, %v6423_v63 }
 0x9be   :  { %v23339_v55 = vsub.f32 %v6423_v63, %v6441_v41 }
 0x9c1   :  { %v22576_v20 = vpop.eup %22575 }
 0x9c2   :  { %v22578_v56 = vpop.eup %22577  ;;  %v23335_v49 = vmul.f32 %v22576_v20, %v22568_v46 }
 0x9c3   :  { %v23337_v51 = vmul.f32 %v22578_v56, %v22570_v59  ;;  %v6532_v59 = vand.u32 4294901760, %v23339_v55 }
 0xa01   :  { %v6413_v1 = vpop.permute.xlu0 %6412 }
 0xa02   :  { %v6417_v33 = vsel %vm1550_vm6, %v23335_v49, %v6413_v1  ;;  %v6411_v7 = vpop.permute.xlu1 %6410 }
 0xa03   :  { %v6438_v58 = vsel %vm534_vm2, %v6417_v33, 0  ;;  %v6416_v35 = vsel %vm1550_vm6, %v23337_v51, %v6411_v7 }
 0xa04   :  { %v23346_v24 = vand.u32 4294901760, %v6438_v58  ;;  %v6435_v0 = vsel %vm534_vm2, %v6416_v35, 0  ;;  %v6533_v35 = vsub.f32 %v23339_v55, %v6532_v59 }
 0xa05   :  { %v23349_v46 = vand.u32 4294901760, %v6435_v0  ;;  %v6427_v6 = vpop.permute.xlu0 %6426 }
 0xa06   :  { %v23353_v36 = vsub.f32 %v6438_v58, %v23346_v24  ;;  %v6447_v44 = vand.u32 4294901760, %v6427_v6  ;;  %v6425_v22 = vpop.permute.xlu1 %6424  ;;  %v6534_v10 = vand.u32 4294901760, %v6533_v35 }
 0xa07   :  { %v6510_v52 = vsub.f32 %v6435_v0, %v23349_v46  ;;  %v6444_v63 = vand.u32 4294901760, %v6425_v22 }
 0xa08   :  { %v6521_v20 = vand.u32 4294901760, %v23353_v36  ;;  %v6545_v56 = vsub.f32 %v6427_v6, %v6447_v44  ;;  %v24632_v6 = vmov 0.0|0.0  }
 0xa09   :  { %v23357_v1 = vpack.c.bf16 %v6444_v63, %v6441_v41  ;;  %v6538_v33 = vsub.f32 %v6425_v22, %v6444_v63  ;;  %v6511_v7 = vand.u32 4294901760, %v6510_v52 }
 0xa0a   :  { %v6429_v39 = vpop.permute.xlu1 %6428  ;;  %v6546_v47 = vand.u32 4294901760, %v6545_v56  ;;  %v6522_v0 = vsub.f32 %v23353_v36, %v6521_v20 }
 0xa0b   :  { %v6539_v23 = vand.u32 4294901760, %v6538_v33  ;;  %v6450_v48 = vand.u32 4294901760, %v6429_v39  ;;  %21441 = vmatprep.subr.bf16.mxu0 %v23357_v1  ;;  %21508 = vmatpush3.bf16.msra.mxu1 %v23357_v1  ;;  %v6512_v58 = vsub.f32 %v6510_v52, %v6511_v7 }
 0xa0c   :  { %21443 = vmatpush3.bf16.msra.mxu0 %v23357_v1  ;;  %21509 = vmatprep.subr.bf16.mxu1 %v24632_v6  ;;  %v6547_v42 = vsub.f32 %v6545_v56, %v6546_v47  ;;  %v6523_v57 = vand.u32 4294901760, %v6522_v0 }
 0xa0d   :  { %v6540_v41 = vsub.f32 %v6538_v33, %v6539_v23  ;;  %v23365_v22 = vpack.c.bf16 %v6450_v48, %v6447_v44  ;;  %v6552_v63 = vsub.f32 %v6429_v39, %v6450_v48  ;;  %v6513_v12 = vand.u32 4294901760, %v6512_v58 }
 0xa0e   :  { %v6548_v18 = vand.u32 4294901760, %v6547_v42  ;;  %v23378_v39 = vpack.c.bf16 %v6538_v33, %v23339_v55  ;;  %v7895_v58 = vsel %vm7894_vm7, %v23331_v28, 0 }
 0xa0f   :  { %24633 = vst [vmem:[#allocation31_spill] sm:$0xff] %v23365_v22  ;;  %v6553_v43 = vand.u32 4294901760, %v6552_v63  ;;  %21445 = vmatprep.subr.bf16.mxu0 %v23365_v22  ;;  %19792 = vmatprep.mubr.f32.mxu0 %v6513_v12  ;;  %v6541_v4 = vand.u32 4294901760, %v6540_v41  ;;  %v7963_v0 = vand.u32 4294901760, %v7895_v58 }
 0xa10   :  { %21447 = vmatpush3.bf16.msra.mxu0 %v23365_v22 }
 0xa11   :  { %v6554_v3 = vsub.f32 %v6552_v63, %v6553_v43  ;;  %v23369_v27 = vpack.c.bf16 %v6541_v4, %v6534_v10  ;;  %v23382_v10 = vpack.c.bf16 %v6552_v63, %v6545_v56  ;;  %v6974_v4 = vand.u32 4294901760, %v23337_v51 }
 0xa12   :  { %v23399_v42 = vpack.c.bf16 %v6553_v43, %v6546_v47  ;;  %v7964_v41 = vsub.f32 %v7895_v58, %v7963_v0 }
 0xa13   :  { %v6555_v16 = vand.u32 4294901760, %v6554_v3  ;;  %19793 = vmatmul.mubr.f32.vlgmr.msra.gmra.mrb[18].mxu0 %v6523_v57  ;;  %21449 = vmatprep.subr.bf16.mxu0 %v23369_v27  ;;  %24635 = vst [vmem:[#allocation33_spill] sm:$0xff] %v23382_v10  ;;  %v6977_v3 = vand.u32 4294901760, %v23335_v49 }
 0xa14   :  { %21451 = vmatpush3.bf16.msra.mxu0 %v23369_v27  ;;  %19803 = vmatprep.mubr.f32.mxu0 %v23349_v46  ;;  %24636 = vst [vmem:[#allocation34_spill] sm:$0xff] %v23399_v42  ;;  %v7965_v63 = vand.u32 4294901760, %v7964_v41 }
 0xa15   :  { %v23374_v48 = vpack.c.bf16 %v6555_v16, %v6548_v18  ;;  %v23392_v16 = vpack.c.bf16 %v6539_v23, %v6532_v59  ;;  %v6970_v18 = vpop.permute.xlu0 %6969  ;;  %v7052_v23 = vsub.f32 %v23337_v51, %v6974_v4  ;;  %v7059_v55 = vsub.f32 %v23335_v49, %v6977_v3 }
 0xa16   :  { %v6971_v57 = vsel %vm1550_vm6, %v6970_v18, 0  ;;  %v2101_v18 = vld [vmem:[%s24479_s1 + $0xc0] sm:$0xff] }
 0xa17   :  { %24634 = vst [vmem:[#allocation32_spill] sm:$0xff] %v23374_v48  ;;  %21453 = vmatprep.subr.bf16.mxu0 %v23374_v48  ;;  %v23404_v12 = vand.u32 4294901760, %v6971_v57  ;;  %v7053_v43 = vand.u32 4294901760, %v7052_v23  ;;  %v7060_v47 = vand.u32 4294901760, %v7059_v55  ;;  %v21495_v35 = vpack.c.bf16 %v7059_v55, %v7052_v23 }
 0xa18   :  { %21455 = vmatpush3.bf16.msra.mxu0 %v23374_v48 }
 0xa19   :  { %21457 = vmatprep.subr.bf16.mxu0 %v23378_v39  ;;  %24637 = vst [vmem:[#allocation35_spill] sm:$0xff] %v23404_v12  ;;  %v23410_v59 = vsub.f32 %v6971_v57, %v23404_v12  ;;  %v7054_v49 = vsub.f32 %v7052_v23, %v7053_v43  ;;  %v7061_v51 = vsub.f32 %v7059_v55, %v7060_v47 }
 0xa1a   :  { %v7966_v57 = vsub.f32 %v7964_v41, %v7965_v63 }
 0xa1b   :  { %19804 = vmatmul.mubr.f32.vlgmr.msra.gmra.mrb[18].mxu0 %v23346_v24  ;;  %24638 = vst [vmem:[#allocation36_spill] sm:$0xff] %v23410_v59  ;;  %v7062_v56 = vand.u32 4294901760, %v7061_v51 }
 0xa1c   :  { %21459 = vmatpush3.bf16.msra.mxu0 %v23378_v39  ;;  %19814 = vmatprep.mubr.f32.mxu0 %v6510_v52  ;;  %v21489_v52 = vpack.c.bf16 %v6977_v3, %v6974_v4  ;;  %v23458_v4 = vand.u32 4294901760, %v2101_v18  ;;  %v7967_v3 = vand.u32 4294901760, %v7966_v57  ;;  %v2105_v57 = vld [vmem:[%s24479_s1 + $0xe0] sm:$0xff] }
 0xa1d   :  { %21461 = vmatprep.subr.bf16.mxu0 %v23382_v10 }
 0xa1e   :  { %24642 = vst [vmem:[#allocation39_spill] sm:$0xff] %v23458_v4  ;;  %v23462_v23 = vsub.f32 %v2101_v18, %v23458_v4  ;;  %v2104_v18 = vld [vmem:[%s24479_s1 + $0xd8] sm:$0xff] }
 0xa20   :  { %21463 = vmatpush3.bf16.msra.mxu0 %v23382_v10  ;;  %24643 = vst [vmem:[#allocation40_spill] sm:$0xff] %v23462_v23  ;;  %v23466_v55 = vand.u32 4294901760, %v23462_v23 }
 0xa21   :  { %21465 = vmatprep.subr.bf16.mxu0 %v23357_v1 }
 0xa22   :  { %24644 = vst [vmem:[#allocation41_spill] sm:$0xff] %v23466_v55 }
 0xa23   :  { %19815 = vmatmul.mubr.f32.vlgmr.msra.gmra.mrb[18].mxu0 %v23353_v36  ;;  %v23417_v36 = vand.u32 4294901760, %v23410_v59 }
 0xa24   :  { %21467 = vmatpush3.bf16.msra.mxu0 %v23357_v1  ;;  %19825 = vmatprep.mubr.f32.mxu0 %v6511_v7 }
 0xa25   :  { %21469 = vmatprep.subr.bf16.mxu0 %v23365_v22  ;;  %24639 = vst [vmem:[#allocation37_spill] sm:$0xff] %v23417_v36  ;;  %v7043_v44 = vsub.f32 %v23410_v59, %v23417_v36 }
 0xa27   :  { %v23427_v33 = vand.u32 4294901760, %v7043_v44 }
 0xa28   :  { %21471 = vmatpush3.bf16.msra.mxu0 %v23365_v22 }
 0xa29   :  { %21473 = vmatprep.subr.bf16.mxu0 %v23392_v16  ;;  %24641 = vst [vmem:[#allocation38_spill] sm:$0xff] %v23427_v33 }
 0xa2b   :  { %19826 = vmatmul.mubr.f32.vlgmr.msra.gmra.mrb[18].mxu0 %v6521_v20  ;;  %v7055_v20 = vand.u32 4294901760, %v7054_v49 }
 0xa2c   :  { %21475 = vmatpush3.bf16.msra.mxu0 %v23392_v16  ;;  %19836 = vmatprep.mubr.f32.mxu0 %v23349_v46 }
 0xa2d   :  { %21477 = vmatprep.subr.bf16.mxu0 %v23399_v42  ;;  %v21492_v7 = vpack.c.bf16 %v7062_v56, %v7055_v20 }
 0xa30   :  { %21479 = vmatpush3.bf16.msra.mxu0 %v23399_v42 }
 0xa31   :  { %21481 = vmatprep.subr.bf16.mxu0 %v23357_v1 }
 0xa33   :  { %19837 = vmatmul.mubr.f32.vlgmr.msra.gmra.mrb[18].mxu0 %v23346_v24 }
 0xa34   :  { %21483 = vmatpush3.bf16.msra.mxu0 %v23357_v1  ;;  %19847 = vmatprep.mubr.f32.mxu0 %v23349_v46  ;;  %v24640_v46 = vmov 0.0  }
 0xa35   :  { %21485 = vmatprep.subr.bf16.mxu0 %v23365_v22 }
 0xa38   :  { %21487 = vmatpush3.bf16.msra.mxu0 %v23365_v22 }
 0xa39   :  { %21488 = vmatprep.subr.bf16.mxu0 %v24632_v6 }
 0xa3b   :  { %19848 = vmatmul.mubr.f32.vlgmr.msra.gmra.mrb[18].mxu0 %v23346_v24  ;;  %v21501_v24 = vpack.c.bf16 %v7060_v47, %v7053_v43  ;;  %v7977_v43 = vsub.f32 %v23462_v23, %v23466_v55 }
 0xa3c   :  { %21490 = vmatpush3.bf16.msra.mxu0 %v21489_v52  ;;  %19854 = vmatprep.mubr.msk.f32.mxu0 %vm22606_vm3, %v24640_v46 }
 0xa3d   :  { %21491 = vmatprep.subr.bf16.mxu0 %v24632_v6  ;;  %v23472_v47 = vand.u32 4294901760, %v7977_v43  ;;  %v8363_v43 = vand.u32 4294901760, %v2105_v57 }
 0xa3f   :  { %19855 = vmatmul.mubr.f32.vlgmr.msra.gmra.mrb[20].mxu0 %v23427_v33  ;;  %24645 = vst [vmem:[#allocation42_spill] sm:$0xff] %v23472_v47 }
 0xa40   :  { %21493 = vmatpush3.bf16.msra.mxu0 %v21492_v7  ;;  %19861 = vmatprep.mubr.msk.f32.mxu0 %vm22606_vm3, %v24640_v46 }
 0xa41   :  { %21494 = vmatprep.subr.bf16.mxu0 %v24632_v6 }
 0xa47   :  { %19862 = vmatmul.mubr.f32.vlgmr.msra.gmra.mrb[20].mxu0 %v23404_v12 }
 0xa48   :  { %21496 = vmatpush3.bf16.msra.mxu0 %v21495_v35  ;;  %19868 = vmatprep.mubr.msk.f32.mxu0 %vm22606_vm3, %v24640_v46 }
 0xa49   :  { %21497 = vmatprep.subr.bf16.mxu0 %v24632_v6 }
 0xa4f   :  { %19869 = vmatmul.mubr.f32.vlgmr.msra.gmra.mrb[20].mxu0 %v23410_v59 }
 0xa50   :  { %21499 = vmatpush3.bf16.msra.mxu0 %v21489_v52  ;;  %19875 = vmatprep.mubr.msk.f32.mxu0 %vm22606_vm3, %v24640_v46 }
 0xa51   :  { %21500 = vmatprep.subr.bf16.mxu0 %v24632_v6 }
 0xa57   :  { %19876 = vmatmul.mubr.f32.vlgmr.msra.gmra.mrb[20].mxu0 %v23417_v36 }
 0xa58   :  { %21502 = vmatpush3.bf16.msra.mxu0 %v21501_v24  ;;  %19882 = vmatprep.mubr.msk.f32.mxu0 %vm22606_vm3, %v24640_v46 }
 0xa59   :  { %21503 = vmatprep.subr.bf16.mxu0 %v24632_v6 }
 0xa5f   :  { %19883 = vmatmul.mubr.f32.vlgmr.msra.gmra.mrb[20].mxu0 %v23404_v12 }
 0xa60   :  { %21505 = vmatpush3.bf16.msra.mxu0 %v21489_v52  ;;  %19889 = vmatprep.mubr.msk.f32.mxu0 %vm22606_vm3, %v24640_v46 }
 0xa61   :  { %19934 = vmatprep.subr.mxu0 %v24640_v46 }
 0xa67   :  { %19890 = vmatmul.mubr.f32.vlgmr.msra.gmra.mrb[20].mxu0 %v23404_v12 }
 0xa68   :  { %19936 = vmatprep.mubr.msk.f32.mxu0 %vm22606_vm3, %v24640_v46  ;;  %19935 = vmatpush3.msra.mxu0 %v23458_v4 }
 0xa69   :  { %19939 = vmatprep.subr.mxu0 %v24640_v46 }
 0xa6b   :  { %19937 = vmatmul.mubr.f32.vlgmr.msra.gmra.mrb[22].mxu0 %v7967_v3  ;;  %v8360_v3 = vand.u32 4294901760, %v2104_v18 }
 0xa6c   :  { %19941 = vmatprep.mubr.msk.f32.mxu0 %vm22606_vm3, %v24640_v46  ;;  %19940 = vmatpush3.msra.mxu0 %v23472_v47 }
 0xa6d   :  { %19944 = vmatprep.subr.mxu0 %v24640_v46 }
 0xa73   :  { %19942 = vmatmul.mubr.f32.vlgmr.msra.gmra.mrb[22].mxu0 %v7963_v0 }
 0xa74   :  { %19945 = vmatpush3.msra.mxu0 %v23462_v23  ;;  %19946 = vmatprep.mubr.msk.f32.mxu0 %vm22606_vm3, %v24640_v46 }
 0xa75   :  { %19949 = vmatprep.subr.mxu0 %v24640_v46 }
 0xa7b   :  { %19947 = vmatmul.mubr.f32.vlgmr.msra.gmra.mrb[22].mxu0 %v7964_v41 }
 0xa7c   :  { %19950 = vmatpush3.msra.mxu0 %v23458_v4  ;;  %19951 = vmatprep.mubr.msk.f32.mxu0 %vm22606_vm3, %v24640_v46 }
 0xa7d   :  { %19954 = vmatprep.subr.mxu0 %v24640_v46 }
 0xa83   :  { %19952 = vmatmul.mubr.f32.vlgmr.msra.gmra.mrb[22].mxu0 %v7965_v63 }
 0xa84   :  { %19955 = vmatpush3.msra.mxu0 %v23466_v55  ;;  %19956 = vmatprep.mubr.msk.f32.mxu0 %vm22606_vm3, %v24640_v46 }
 0xa85   :  { %19959 = vmatprep.subr.mxu0 %v24640_v46 }
 0xa8b   :  { %19957 = vmatmul.mubr.f32.vlgmr.msra.gmra.mrb[22].mxu0 %v7963_v0 }
 0xa8c   :  { %19960 = vmatpush3.msra.mxu0 %v23458_v4  ;;  %19961 = vmatprep.mubr.msk.f32.mxu0 %vm22606_vm3, %v24640_v46 }
 0xa8d   :  { %21542 = vmatprep.subr.bf16.mxu0 %v24632_v6 }
 0xa93   :  { %19962 = vmatmul.mubr.f32.vlgmr.msra.gmra.mrb[22].mxu0 %v7963_v0 }
 0xa94   :  { %20013 = vmatprep.mubr.msk.f32.mxu0 %vm22606_vm3, %v24640_v46 }
 0xb0e   :  { %v23488_v49 = vpop.f32.mrb[18].mxu0 }
 0xb0f   :  { %v23490_v51 = vpop.f32.mrb[19].mxu0 }
 0xb3a   :  { %v7428_v44 = vpop.f32.mrb[20].mxu0 }
 0xb3b   :  { %v7433_v52 = vsel %vm1550_vm6, %v7428_v44, 0  ;;  %v19891_v20 = vpop.f32.mrb[21].mxu0  ;;  %v23539_v44 = vpack.c.bf16 %v8363_v43, %v8360_v3 }
 0xb3c   :  { %v7502_v56 = vand.u32 4294901760, %v7433_v52 }
 0xb3d   :  { %24647 = vst [vmem:[#allocation44_spill] sm:$0xff] %v23539_v44 }
 0xb3e   :  { %v7503_v7 = vsub.f32 %v7433_v52, %v7502_v56  ;;  %v2106_v52 = vld [vmem:[%s24479_s1 + $0xe8] sm:$0xff] }
 0xb3f   :  { %v23548_v20 = vand.u32 4294901760, %v2106_v52 }
 0xb40   :  { %v7504_v35 = vand.u32 4294901760, %v7503_v7 }
 0xb41   :  { %24648 = vst [vmem:[#allocation45_spill] sm:$0xff] %v23548_v20 }
 0xb42   :  { %v7505_v24 = vsub.f32 %v7503_v7, %v7504_v35 }
 0xb44   :  { %v7506_v58 = vand.u32 4294901760, %v7505_v24 }
 0xb46   :  { %19897 = vmatmul.mubr.f32.vlgmr.msra.gmra.mrb[10].mxu1 %v7506_v58 }
 0xb47   :  { %21511 = vmatpush3.bf16.msra.mxu1 %v23369_v27  ;;  %19903 = vmatprep.mubr.msk.f32.mxu1 %vm22606_vm3, %v24640_v46  ;;  %v2102_v27 = vld [vmem:[%s24479_s1 + $0xc8] sm:$0xff] }
 0xb48   :  { %21512 = vmatprep.subr.bf16.mxu1 %v24632_v6 }
 0xb4e   :  { %19904 = vmatmul.mubr.f32.vlgmr.msra.gmra.mrb[10].mxu1 %v7502_v56 }
 0xb4f   :  { %21514 = vmatpush3.bf16.msra.mxu1 %v23378_v39  ;;  %19910 = vmatprep.mubr.msk.f32.mxu1 %vm22606_vm3, %v24640_v46  ;;  %v2103_v39 = vld [vmem:[%s24479_s1 + $0xd0] sm:$0xff] }
 0xb50   :  { %21515 = vmatprep.subr.bf16.mxu1 %v24632_v6  ;;  %v8357_v0 = vand.u32 4294901760, %v2103_v39 }
 0xb52   :  { %v8442_v12 = vsub.f32 %v2103_v39, %v8357_v0 }
 0xb56   :  { %19911 = vmatmul.mubr.f32.vlgmr.msra.gmra.mrb[10].mxu1 %v7503_v7  ;;  %v8456_v7 = vsub.f32 %v2105_v57, %v8363_v43  ;;  %v8443_v43 = vand.u32 4294901760, %v8442_v12 }
 0xb57   :  { %21517 = vmatpush3.bf16.msra.mxu1 %v23357_v1  ;;  %19917 = vmatprep.mubr.msk.f32.mxu1 %vm22606_vm3, %v24640_v46 }
 0xb58   :  { %21518 = vmatprep.subr.bf16.mxu1 %v24632_v6  ;;  %v8457_v24 = vand.u32 4294901760, %v8456_v7 }
 0xb5a   :  { %v8458_v55 = vsub.f32 %v8456_v7, %v8457_v24 }
 0xb5c   :  { %v8459_v4 = vand.u32 4294901760, %v8458_v55 }
 0xb5e   :  { %19918 = vmatmul.mubr.f32.vlgmr.msra.gmra.mrb[10].mxu1 %v7504_v35 }
 0xb5f   :  { %21520 = vmatpush3.bf16.msra.mxu1 %v23392_v16  ;;  %19924 = vmatprep.mubr.msk.f32.mxu1 %vm22606_vm3, %v24640_v46  ;;  %v8354_v16 = vand.u32 4294901760, %v2102_v27 }
 0xb60   :  { %21521 = vmatprep.subr.bf16.mxu1 %v24632_v6 }
 0xb66   :  { %19925 = vmatmul.mubr.f32.vlgmr.msra.gmra.mrb[10].mxu1 %v7502_v56  ;;  %v8339_v41 = vpop.f32.mrb[22].mxu0 }
 0xb67   :  { %21523 = vmatpush3.bf16.msra.mxu1 %v23357_v1  ;;  %19931 = vmatprep.mubr.msk.f32.mxu1 %vm22606_vm3, %v24640_v46  ;;  %v23527_v1 = vpack.c.bf16 %v8357_v0, %v8354_v16  ;;  %v19963_v63 = vpop.f32.mrb[23].mxu0  ;;  %v8343_v33 = vmax.f32 %v8339_v41, 0.0 }
 0xb68   :  { %21524 = vmatprep.subr.bf16.mxu1 %v24632_v6 }
 0xb69   :  { %24646 = vst [vmem:[#allocation43_spill] sm:$0xff] %v23527_v1  ;;  %21544 = vmatpush3.bf16.msra.mxu0 %v23527_v1 }
 0xb6a   :  { %21545 = vmatprep.subr.bf16.mxu0 %v24632_v6 }
 0xb6d   :  { %21547 = vmatpush3.bf16.msra.mxu0 %v23539_v44 }
 0xb6e   :  { %19932 = vmatmul.mubr.f32.vlgmr.msra.gmra.mrb[10].mxu1 %v7502_v56  ;;  %20011 = vmatprep.subr.mxu0 %v24640_v46  ;;  %v8449_v56 = vsub.f32 %v2104_v18, %v8360_v3  ;;  %v8435_v3 = vsub.f32 %v2102_v27, %v8354_v16 }
 0xb6f   :  { %19974 = vmatprep.mubr.msk.f32.mxu1 %vm22606_vm3, %v24640_v46  ;;  %21526 = vmatpush3.bf16.msra.mxu1 %v23527_v1 }
 0xb70   :  { %21527 = vmatprep.subr.bf16.mxu1 %v24632_v6  ;;  %v8450_v35 = vand.u32 4294901760, %v8449_v56  ;;  %v23557_v59 = vpack.c.bf16 %v8456_v7, %v8449_v56  ;;  %v8436_v57 = vand.u32 4294901760, %v8435_v3  ;;  %v23564_v7 = vsub.f32 %v2106_v52, %v23548_v20 }
 0xb71   :  { %20012 = vmatpush3.msra.mxu0 %v23548_v20  ;;  %v23588_v41 = vpack.c.bf16 %v8442_v12, %v8435_v3 }
 0xb72   :  { %21554 = vmatprep.subr.bf16.mxu0 %v24632_v6  ;;  %v8451_v58 = vsub.f32 %v8449_v56, %v8450_v35  ;;  %24650 = vst [vmem:[#allocation47_spill] sm:$0xff] %v23557_v59  ;;  %v23559_v18 = vpack.c.bf16 %v8457_v24, %v8450_v35  ;;  %24652 = vst [vmem:[#allocation49_spill] sm:$0xff] %v23564_v7  ;;  %v23598_v52 = vpack.c.bf16 %v8443_v43, %v8436_v57 }
 0xb73   :  { %21529 = vmatpush3.bf16.msra.mxu1 %v23539_v44  ;;  %24656 = vst [vmem:[#allocation53_spill] sm:$0xff] %v23588_v41 }
 0xb74   :  { %19972 = vmatprep.subr.mxu1 %v24640_v46  ;;  %v8452_v47 = vand.u32 4294901760, %v8451_v58  ;;  %24651 = vst [vmem:[#allocation48_spill] sm:$0xff] %v23559_v18  ;;  %v8444_v58 = vsub.f32 %v8442_v12, %v8443_v43  ;;  %24657 = vst [vmem:[#allocation54_spill] sm:$0xff] %v23598_v52  ;;  %v2107_v12 = vld [vmem:[%s24479_s1 + $0xf0] sm:$0xff] }
 0xb75   :  { %v23615_v35 = vand.u32 4294901760, %v2107_v12 }
 0xb76   :  { %v23555_v36 = vpack.c.bf16 %v8459_v4, %v8452_v47  ;;  %v8445_v56 = vand.u32 4294901760, %v8444_v58 }
 0xb77   :  { %19973 = vmatpush3.msra.mxu1 %v23548_v20  ;;  %24658 = vst [vmem:[#allocation55_spill] sm:$0xff] %v23615_v35 }
 0xb78   :  { %21530 = vmatprep.subr.bf16.mxu1 %v24632_v6  ;;  %24649 = vst [vmem:[#allocation46_spill] sm:$0xff] %v23555_v36 }
 0xc41   :  { %v7890_v63 = vpop.f32.mrb[10].mxu1 }
 0xc42   :  { %8345 = vrot.lane.b32.xlu1 %v7890_v63, %s22616_s18  ;;  %v19933_v23 = vpop.f32.mrb[11].mxu1 }
 0xc43   :  { %v8437_v23 = vsub.f32 %v8435_v3, %v8436_v57 }
 0xc45   :  { %v8438_v47 = vand.u32 4294901760, %v8437_v23 }
 0xc47   :  { %v23567_v16 = vpack.c.bf16 %v8445_v56, %v8438_v47 }
 0xc49   :  { %24653 = vst [vmem:[#allocation50_spill] sm:$0xff] %v23567_v16 }
 0xcb4   :  { %v8346_v42 = vpop.permute.xlu1 %8345 }
 0xcb5   :  { %v8348_v10 = vsel %vm7894_vm7, %v8343_v33, %v8346_v42 }
 0xcb6   :  { %v8351_v63 = vsel %vm8349_vm8, %v8348_v10, 0  ;;  %v23572_v10 = vand.u32 4294901760, %v23564_v7 }
 0xcb7   :  { %v8423_v55 = vand.u32 4294901760, %v8351_v63 }
 0xcb8   :  { %24654 = vst [vmem:[#allocation51_spill] sm:$0xff] %v23572_v10  ;;  %v8465_v33 = vsub.f32 %v23564_v7, %v23572_v10 }
 0xcb9   :  { %v8424_v4 = vsub.f32 %v8351_v63, %v8423_v55 }
 0xcba   :  { %v23585_v0 = vand.u32 4294901760, %v8465_v33 }
 0xcbb   :  { %v8425_v27 = vand.u32 4294901760, %v8424_v4 }
 0xcbc   :  { %24655 = vst [vmem:[#allocation52_spill] sm:$0xff] %v23585_v0 }
 0xcbd   :  { %20014 = vmatmul.mubr.f32.vlgmr.msra.gmra.mrb[24].mxu0 %v8425_v27  ;;  %v8426_v39 = vsub.f32 %v8424_v4, %v8425_v27 }
 0xcbe   :  { %21556 = vmatpush3.bf16.msra.mxu0 %v23527_v1  ;;  %20039 = vmatprep.mubr.msk.f32.mxu0 %vm22606_vm3, %v24640_v46 }
 0xcbf   :  { %21557 = vmatprep.subr.bf16.mxu0 %v24632_v6  ;;  %v8427_v42 = vand.u32 4294901760, %v8426_v39 }
 0xcc1   :  { %19975 = vmatmul.mubr.f32.vlgmr.msra.gmra.mrb[12].mxu1 %v8427_v42 }
 0xcc2   :  { %21532 = vmatpush3.bf16.msra.mxu1 %v23567_v16  ;;  %21559 = vmatpush3.bf16.msra.mxu0 %v23539_v44 }
 0xcc3   :  { %21533 = vmatprep.subr.bf16.mxu1 %v24632_v6  ;;  %20037 = vmatprep.subr.mxu0 %v24640_v46 }
 0xcc4   :  { %19987 = vmatprep.mubr.msk.f32.mxu1 %vm22606_vm3, %v24640_v46 }
 0xcc6   :  { %21535 = vmatpush3.bf16.msra.mxu1 %v23555_v36  ;;  %20038 = vmatpush3.msra.mxu0 %v23548_v20 }
 0xcc7   :  { %20040 = vmatmul.mubr.f32.vlgmr.msra.gmra.mrb[26].mxu0 %v8423_v55  ;;  %19985 = vmatprep.subr.mxu1 %v24640_v46 }
 0xcca   :  { %19986 = vmatpush3.msra.mxu1 %v23585_v0 }
 0xccb   :  { %19988 = vmatmul.mubr.f32.vlgmr.msra.gmra.mrb[14].mxu1 %v8423_v55  ;;  %21536 = vmatprep.subr.bf16.mxu1 %v24632_v6 }
 0xccc   :  { %21538 = vmatpush3.bf16.msra.mxu1 %v23588_v41  ;;  %20000 = vmatprep.mubr.msk.f32.mxu1 %vm22606_vm3, %v24640_v46 }
 0xccd   :  { %21539 = vmatprep.subr.bf16.mxu1 %v24632_v6 }
 0xcd0   :  { %21541 = vmatpush3.bf16.msra.mxu1 %v23557_v59 }
 0xcd1   :  { %19998 = vmatprep.subr.mxu1 %v24640_v46 }
 0xcd4   :  { %19999 = vmatpush3.msra.mxu1 %v23564_v7 }
 0xcd5   :  { %20001 = vmatmul.mubr.f32.vlgmr.msra.gmra.mrb[16].mxu1 %v8424_v4  ;;  %21548 = vmatprep.subr.bf16.mxu1 %v24632_v6 }
 0xcd6   :  { %21550 = vmatpush3.bf16.msra.mxu1 %v23598_v52  ;;  %20026 = vmatprep.mubr.msk.f32.mxu1 %vm22606_vm3, %v24640_v46  ;;  %v23620_v52 = vsub.f32 %v2107_v12, %v23615_v35 }
 0xcd7   :  { %21551 = vmatprep.subr.bf16.mxu1 %v24632_v6 }
 0xcd8   :  { %24659 = vst [vmem:[#allocation56_spill] sm:$0xff] %v23620_v52 }
 0xcda   :  { %21553 = vmatpush3.bf16.msra.mxu1 %v23559_v18 }
 0xcdb   :  { %20024 = vmatprep.subr.mxu1 %v24640_v46 }
 0xcde   :  { %20025 = vmatpush3.msra.mxu1 %v23572_v10 }
 0xcdf   :  { %20027 = vmatmul.mubr.f32.vlgmr.msra.gmra.mrb[18].mxu1 %v8423_v55  ;;  %20042 = vmatprep.subr.mxu1 %v24640_v46 }
 0xce0   :  { %20044 = vmatprep.mubr.msk.f32.mxu1 %vm22606_vm3, %v24640_v46  ;;  %20043 = vmatpush3.msra.mxu1 %v23615_v35 }
 0xce1   :  { %20047 = vmatprep.subr.mxu1 %v24640_v46 }
 0xd90   :  { %v8685_v24 = vpop.f32.mrb[24].mxu0 }
 0xd91   :  { %v20015_v3 = vpop.f32.mrb[25].mxu0 }
 0xd94   :  { %v8429_v57 = vpop.f32.mrb[12].mxu1 }
 0xd95   :  { %v19976_v43 = vpop.f32.mrb[13].mxu1 }
 0xd9a   :  { %v8847_v63 = vpop.f32.mrb[26].mxu0 }
 0xd9b   :  { %v20041_v23 = vpop.f32.mrb[27].mxu0 }
 0xd9e   :  { %v8525_v58 = vpop.f32.mrb[14].mxu1 }
 0xd9f   :  { %v8526_v55 = vadd.f32 %v8525_v58, %v8429_v57  ;;  %v19989_v4 = vpop.f32.mrb[15].mxu1  ;;  %v23628_v57 = vand.u32 4294901760, %v23620_v52  ;;  %v2108_v58 = vld [vmem:[%s24479_s1 + $0xf8] sm:$0xff] }
 0xda0   :  { %v9320_v4 = vand.u32 4294901760, %v2108_v58 }
 0xda1   :  { %24661 = vst [vmem:[#allocation58_spill] sm:$0xff] %v23628_v57 }
 0xda8   :  { %v8607_v47 = vpop.f32.mrb[16].mxu1 }
 0xda9   :  { %v8608_v56 = vadd.f32 %v8607_v47, %v8526_v55  ;;  %v20002_v27 = vpop.f32.mrb[17].mxu1  ;;  %v2109_v55 = vld [vmem:[%s24479_s1 + $0x100] sm:$0xff] }
 0xdaa   :  { %v9323_v47 = vand.u32 4294901760, %v2109_v55  ;;  %v9410_v27 = vsub.f32 %v2108_v58, %v9320_v4 }
 0xdab   :  { %v8686_v39 = vadd.f32 %v8685_v24, %v8608_v56 }
 0xdac   :  { %v23677_v56 = vpack.c.bf16 %v9323_v47, %v9320_v4 }
 0xdae   :  { %24667 = vst [vmem:[#allocation64_spill] sm:$0xff] %v23677_v56  ;;  %21561 = vmatprep.subr.bf16.mxu0 %v23677_v56 }
 0xdaf   :  { %21563 = vmatpush3.bf16.msra.mxu0 %v23677_v56 }
 0xdb2   :  { %v8771_v42 = vpop.f32.mrb[18].mxu1 }
 0xdb3   :  { %v8772_v33 = vadd.f32 %v8771_v42, %v8686_v39  ;;  %v20028_v10 = vpop.f32.mrb[19].mxu1  ;;  %v9417_v39 = vsub.f32 %v2109_v55, %v9323_v47  ;;  %v2110_v42 = vld [vmem:[%s24479_s1 + $0x108] sm:$0xff] }
 0xdb4   :  { %v8935_v10 = vsub.f32 %v23620_v52, %v23628_v57 }
 0xdb5   :  { %v8848_v18 = vadd.f32 %v8847_v63, %v8772_v33  ;;  %v2111_v33 = vld [vmem:[%s24479_s1 + $0x110] sm:$0xff] }
 0xdb7   :  { %v23623_v3 = vadd.f32 %v8848_v18, %v23331_v28  ;;  %v23642_v18 = vand.u32 4294901760, %v8935_v10  ;;  %v9329_v10 = vand.u32 4294901760, %v2111_v33 }
 0xdb9   :  { %24660 = vst [vmem:[#allocation57_spill] sm:$0xff] %v23623_v3  ;;  %v8853_v43 = vsel %vm7894_vm7, %v23623_v3, 0  ;;  %24665 = vst [vmem:[#allocation62_spill] sm:$0xff] %v23642_v18  ;;  %v9431_v47 = vsub.f32 %v2111_v33, %v9329_v10 }
 0xdba   :  { %v23630_v23 = vand.u32 4294901760, %v8853_v43 }
 0xdbb   :  { %v9432_v7 = vand.u32 4294901760, %v9431_v47 }
 0xdbc   :  { %24662 = vst [vmem:[#allocation59_spill] sm:$0xff] %v23630_v23  ;;  %v23633_v24 = vsub.f32 %v8853_v43, %v23630_v23  ;;  %v9326_v43 = vand.u32 4294901760, %v2110_v42 }
 0xdbd   :  { %v9433_v20 = vsub.f32 %v9431_v47, %v9432_v7 }
 0xdbe   :  { %24663 = vst [vmem:[#allocation60_spill] sm:$0xff] %v23633_v24  ;;  %v23638_v12 = vand.u32 4294901760, %v23633_v24  ;;  %v9424_v4 = vsub.f32 %v2110_v42, %v9326_v43  ;;  %v23696_v42 = vpack.c.bf16 %v9417_v39, %v9410_v27 }
 0xdbf   :  { %v9434_v1 = vand.u32 4294901760, %v9433_v20 }
 0xdc0   :  { %24664 = vst [vmem:[#allocation61_spill] sm:$0xff] %v23638_v12  ;;  %v8924_v28 = vsub.f32 %v23633_v24, %v23638_v12  ;;  %24671 = vst [vmem:[#allocation68_spill] sm:$0xff] %v23696_v42  ;;  %v23698_v33 = vpack.c.bf16 %v9431_v47, %v9424_v4 }
 0xdc2   :  { %v23644_v63 = vand.u32 4294901760, %v8924_v28  ;;  %v9411_v28 = vand.u32 4294901760, %v9410_v27  ;;  %24672 = vst [vmem:[#allocation69_spill] sm:$0xff] %v23698_v33 }
 0xdc4   :  { %24666 = vst [vmem:[#allocation63_spill] sm:$0xff] %v23644_v63  ;;  %20045 = vmatmul.mubr.f32.vlgmr.msra.gmra.mrb[20].mxu1 %v23644_v63  ;;  %v9412_v58 = vsub.f32 %v9410_v27, %v9411_v28  ;;  %v23737_v27 = vld [vmem:[%s24478_s0 + $0x40] sm:$0xff] }
 0xdc5   :  { %20048 = vmatpush3.msra.mxu1 %v23642_v18  ;;  %20049 = vmatprep.mubr.msk.f32.mxu1 %vm22606_vm3, %v24640_v46 }
 0xdc6   :  { %20052 = vmatprep.subr.mxu1 %v24640_v46  ;;  %v9413_v18 = vand.u32 4294901760, %v9412_v58 }
 0xdcc   :  { %20050 = vmatmul.mubr.f32.vlgmr.msra.gmra.mrb[20].mxu1 %v23630_v23 }
 0xdcd   :  { %20053 = vmatpush3.msra.mxu1 %v23620_v52  ;;  %20054 = vmatprep.mubr.msk.f32.mxu1 %vm22606_vm3, %v24640_v46  ;;  %v23687_v52 = vpack.c.bf16 %v9329_v10, %v9326_v43 }
 0xdce   :  { %20057 = vmatprep.subr.mxu1 %v24640_v46 }
 0xdcf   :  { %24668 = vst [vmem:[#allocation65_spill] sm:$0xff] %v23687_v52  ;;  %21565 = vmatprep.subr.bf16.mxu0 %v23687_v52 }
 0xdd0   :  { %21567 = vmatpush3.bf16.msra.mxu0 %v23687_v52 }
 0xdd4   :  { %20055 = vmatmul.mubr.f32.vlgmr.msra.gmra.mrb[20].mxu1 %v23633_v24 }
 0xdd5   :  { %20058 = vmatpush3.msra.mxu1 %v23615_v35  ;;  %20059 = vmatprep.mubr.msk.f32.mxu1 %vm22606_vm3, %v24640_v46 }
 0xdd6   :  { %20062 = vmatprep.subr.mxu1 %v24640_v46 }
 0xddc   :  { %20060 = vmatmul.mubr.f32.vlgmr.msra.gmra.mrb[20].mxu1 %v23638_v12 }
 0xddd   :  { %20063 = vmatpush3.msra.mxu1 %v23628_v57  ;;  %20064 = vmatprep.mubr.msk.f32.mxu1 %vm22606_vm3, %v24640_v46  ;;  %v9418_v57 = vand.u32 4294901760, %v9417_v39 }
 0xdde   :  { %20067 = vmatprep.subr.mxu1 %v24640_v46 }
 0xddf   :  { %v9419_v55 = vsub.f32 %v9417_v39, %v9418_v57  ;;  %v23700_v43 = vpack.c.bf16 %v9418_v57, %v9411_v28  ;;  %v23730_v57 = vld [vmem:[%s24478_s0 + $0x48] sm:$0xff]  ;;  %v9309_v39 = vadd.f32 %v23737_v27, %v23490_v51 }
 0xde1   :  { %v9420_v3 = vand.u32 4294901760, %v9419_v55  ;;  %24673 = vst [vmem:[#allocation70_spill] sm:$0xff] %v23700_v43 }
 0xde3   :  { %v23691_v59 = vpack.c.bf16 %v9420_v3, %v9413_v18  ;;  %v23707_v3 = vld [vmem:[%s24479_s1 + $0x118] sm:$0xff]  ;;  %v9310_v18 = vadd.f32 %v23730_v57, %v23488_v49 }
 0xde4   :  { %20065 = vmatmul.mubr.f32.vlgmr.msra.gmra.mrb[20].mxu1 %v23630_v23 }
 0xde5   :  { %20068 = vmatpush3.msra.mxu1 %v23615_v35  ;;  %20069 = vmatprep.mubr.msk.f32.mxu1 %vm22606_vm3, %v24640_v46  ;;  %v9425_v35 = vand.u32 4294901760, %v9424_v4  ;;  %24669 = vst [vmem:[#allocation66_spill] sm:$0xff] %v23691_v59 }
 0xde6   :  { %21569 = vmatprep.subr.bf16.mxu0 %v23691_v59 }
 0xde7   :  { %v9426_v41 = vsub.f32 %v9424_v4, %v9425_v35  ;;  %v23702_v10 = vpack.c.bf16 %v9432_v7, %v9425_v35  ;;  %v23725_v7 = vsub.s32 1, %v22677_v60 }
 0xde9   :  { %v9427_v44 = vand.u32 4294901760, %v9426_v41  ;;  %24674 = vst [vmem:[#allocation71_spill] sm:$0xff] %v23702_v10  ;;  %v23712_v41 = vld [vmem:[%s24479_s1 + $0x120] sm:$0xff]  ;;  %24675 = vst [vmem:[#allocation72_spill] sm:$0xff] %v23725_v7 }
 0xdeb   :  { %v23694_v0 = vpack.c.bf16 %v9434_v1, %v9427_v44  ;;  %v24557_v1 = vand.u32 4294901760, %v23707_v3  ;;  %v24556_v44 = vand.u32 4294901760, %v23712_v41 }
 0xdec   :  { %20070 = vmatmul.mubr.f32.vlgmr.msra.gmra.mrb[20].mxu1 %v23630_v23 }
 0xded   :  { %24670 = vst [vmem:[#allocation67_spill] sm:$0xff] %v23694_v0  ;;  %v23720_v20 = vpack.c.bf16 %v24556_v44, %v24557_v1 }
 0xdef   :  { %21609 = vmatprep.subr.bf16.mxu1 %v23720_v20 }
 0xdf0   :  { %21611 = vmatpush3.bf16.msra.mxu1 %v23720_v20 }
 0xebf   :  { %v9297_v35 = vpop.f32.mrb[20].mxu1 }
 0xec0   :  { %v9304_v60 = vrot.slane %v9297_v35, %v22681_v62  ;;  %v9308_v28 = vrot.slane %v9297_v35, %v23725_v7  ;;  %v20071_v58 = vpop.f32.mrb[21].mxu1 }
 0xec2   :  { %v23743_v55 = vadd.f32 %v9309_v39, %v9304_v60  ;;  %v23745_v4 = vadd.f32 %v9310_v18, %v9308_v28  ;;  %v24677_v28 = vand.u32 4294901760, %v23707_v3 }
 0xec4   :  { %24676 = vst [vmem:[#allocation73_spill] sm:$0xff] %v23743_v55  ;;  %v9314_v49 = vsel %vm534_vm2, %v23743_v55, 0  ;;  %v9317_v47 = vsel %vm534_vm2, %v23745_v4, 0 }
 0xec5   :  { %v9388_v44 = vand.u32 4294901760, %v9314_v49  ;;  %v9398_v1 = vand.u32 4294901760, %v9317_v47 }
 0xec7   :  { %v9389_v36 = vsub.f32 %v9314_v49, %v9388_v44  ;;  %v9399_v16 = vsub.f32 %v9317_v47, %v9398_v1  ;;  %v9951_v49 = vsub.f32 %v23707_v3, %v24677_v28  ;;  %v24678_v47 = vand.u32 4294901760, %v23712_v41 }
 0xec9   :  { %v9390_v51 = vand.u32 4294901760, %v9389_v36  ;;  %v9400_v12 = vand.u32 4294901760, %v9399_v16 }
 0xecb   :  { %v9391_v62 = vsub.f32 %v9389_v36, %v9390_v51  ;;  %v9401_v24 = vsub.f32 %v9399_v16, %v9400_v12 }
 0xecd   :  { %v9392_v35 = vand.u32 4294901760, %v9391_v62  ;;  %v9402_v58 = vand.u32 4294901760, %v9401_v24  ;;  %v2114_v62 = vld [vmem:[%s24479_s1 + $0x128] sm:$0xff] }
 0xecf   :  { %20080 = vmatprep.mubr.f32.mxu0 %v9392_v35  ;;  %v2118_v35 = vld [vmem:[%s24479_s1 + $0x148] sm:$0xff] }
 0xed0   :  { %20081 = vmatmul.mubr.f32.vlgmr.msra.gmra.mrb[28].mxu0 %v9402_v58  ;;  %v2119_v58 = vld [vmem:[%s24479_s1 + $0x150] sm:$0xff] }
 0xed1   :  { %21571 = vmatpush3.bf16.msra.mxu0 %v23691_v59  ;;  %20091 = vmatprep.mubr.f32.mxu0 %v9388_v44 }
 0xed2   :  { %21573 = vmatprep.subr.bf16.mxu0 %v23694_v0 }
 0xed5   :  { %21575 = vmatpush3.bf16.msra.mxu0 %v23694_v0 }
 0xed6   :  { %21577 = vmatprep.subr.bf16.mxu0 %v23696_v42 }
 0xed8   :  { %20092 = vmatmul.mubr.f32.vlgmr.msra.gmra.mrb[28].mxu0 %v9398_v1 }
 0xed9   :  { %21579 = vmatpush3.bf16.msra.mxu0 %v23696_v42  ;;  %20102 = vmatprep.mubr.f32.mxu0 %v9389_v36  ;;  %v2115_v36 = vld [vmem:[%s24479_s1 + $0x130] sm:$0xff] }
 0xeda   :  { %21581 = vmatprep.subr.bf16.mxu0 %v23698_v33  ;;  %v9866_v24 = vand.u32 4294901760, %v2115_v36 }
 0xedc   :  { %v9972_v0 = vsub.f32 %v2115_v36, %v9866_v24 }
 0xedd   :  { %21583 = vmatpush3.bf16.msra.mxu0 %v23698_v33  ;;  %v9952_v33 = vand.u32 4294901760, %v9951_v49 }
 0xede   :  { %21585 = vmatprep.subr.bf16.mxu0 %v23677_v56 }
 0xedf   :  { %v9953_v28 = vsub.f32 %v9951_v49, %v9952_v33 }
 0xee0   :  { %20103 = vmatmul.mubr.f32.vlgmr.msra.gmra.mrb[28].mxu0 %v9399_v16  ;;  %v9863_v16 = vand.u32 4294901760, %v2114_v62 }
 0xee1   :  { %21587 = vmatpush3.bf16.msra.mxu0 %v23677_v56  ;;  %20113 = vmatprep.mubr.f32.mxu0 %v9390_v51  ;;  %v9958_v51 = vsub.f32 %v23712_v41, %v24678_v47  ;;  %v9954_v7 = vand.u32 4294901760, %v9953_v28 }
 0xee2   :  { %21589 = vmatprep.subr.bf16.mxu0 %v23687_v52  ;;  %v9965_v47 = vsub.f32 %v2114_v62, %v9863_v16 }
 0xee3   :  { %v9959_v42 = vand.u32 4294901760, %v9958_v51 }
 0xee5   :  { %21591 = vmatpush3.bf16.msra.mxu0 %v23687_v52  ;;  %v9960_v41 = vsub.f32 %v9958_v51, %v9959_v42 }
 0xee6   :  { %21593 = vmatprep.subr.bf16.mxu0 %v23700_v43 }
 0xee7   :  { %v9961_v59 = vand.u32 4294901760, %v9960_v41 }
 0xee8   :  { %20114 = vmatmul.mubr.f32.vlgmr.msra.gmra.mrb[28].mxu0 %v9400_v12  ;;  %v23781_v12 = vpack.c.bf16 %v9866_v24, %v9863_v16 }
 0xee9   :  { %21595 = vmatpush3.bf16.msra.mxu0 %v23700_v43  ;;  %20124 = vmatprep.mubr.f32.mxu0 %v9388_v44  ;;  %v9878_v43 = vand.u32 4294901760, %v2119_v58  ;;  %v23811_v23 = vpack.c.bf16 %v9961_v59, %v9954_v7 }
 0xeea   :  { %21597 = vmatprep.subr.bf16.mxu0 %v23702_v10  ;;  %21613 = vmatprep.subr.bf16.mxu1 %v23781_v12 }
 0xeeb   :  { %21615 = vmatpush3.bf16.msra.mxu1 %v23781_v12  ;;  %v10000_v14 = vsub.f32 %v2119_v58, %v9878_v43 }
 0xeed   :  { %21599 = vmatpush3.bf16.msra.mxu0 %v23702_v10  ;;  %v9875_v10 = vand.u32 4294901760, %v2118_v35  ;;  %v10001_v7 = vand.u32 4294901760, %v10000_v14 }
 0xeee   :  { %21601 = vmatprep.subr.bf16.mxu0 %v23677_v56 }
 0xeef   :  { %v23807_v3 = vpack.c.bf16 %v9878_v43, %v9875_v10  ;;  %v9993_v41 = vsub.f32 %v2118_v35, %v9875_v10  ;;  %v23828_v43 = vpack.c.bf16 %v9959_v42, %v9952_v33 }
 0xef0   :  { %20125 = vmatmul.mubr.f32.vlgmr.msra.gmra.mrb[28].mxu0 %v9398_v1 }
 0xef1   :  { %21603 = vmatpush3.bf16.msra.mxu0 %v23677_v56  ;;  %20135 = vmatprep.mubr.f32.mxu0 %v9388_v44  ;;  %v2117_v44 = vld [vmem:[%s24479_s1 + $0x140] sm:$0xff]  ;;  %v9973_v56 = vand.u32 4294901760, %v9972_v0  ;;  %v9994_v59 = vand.u32 4294901760, %v9993_v41  ;;  %v23826_v10 = vpack.c.bf16 %v10000_v14, %v9993_v41 }
 0xef2   :  { %21605 = vmatprep.subr.bf16.mxu0 %v23687_v52  ;;  %v9872_v39 = vand.u32 4294901760, %v2117_v44 }
 0xef3   :  { %v9974_v48 = vsub.f32 %v9972_v0, %v9973_v56 }
 0xef5   :  { %21607 = vmatpush3.bf16.msra.mxu0 %v23687_v52  ;;  %v9966_v52 = vand.u32 4294901760, %v9965_v47  ;;  %v9975_v15 = vand.u32 4294901760, %v9974_v48  ;;  %v23820_v48 = vpack.c.bf16 %v9958_v51, %v9951_v49 }
 0xef6   :  { %21705 = vmatprep.subr.bf16.mxu0 %v22754_v50 }
 0xef7   :  { %v9967_v63 = vsub.f32 %v9965_v47, %v9966_v52  ;;  %v23830_v35 = vpack.c.bf16 %v9973_v56, %v9966_v52 }
 0xef8   :  { %20136 = vmatmul.mubr.f32.vlgmr.msra.gmra.mrb[28].mxu0 %v9398_v1  ;;  %v2116_v1 = vld [vmem:[%s24479_s1 + $0x138] sm:$0xff] }
 0xef9   :  { %21707 = vmatpush3.bf16.msra.mxu0 %v22754_v50  ;;  %v9869_v18 = vand.u32 4294901760, %v2116_v1  ;;  %v9968_v50 = vand.u32 4294901760, %v9967_v63 }
 0xefa   :  { %21709 = vmatprep.subr.bf16.mxu0 %v22759_v2 }
 0xefb   :  { %v23791_v60 = vpack.c.bf16 %v9872_v39, %v9869_v18  ;;  %v9979_v22 = vsub.f32 %v2116_v1, %v9869_v18  ;;  %v23814_v16 = vpack.c.bf16 %v9975_v15, %v9968_v50  ;;  %v9995_v1 = vsub.f32 %v9993_v41, %v9994_v59 }
 0xefc   :  { %v23822_v50 = vpack.c.bf16 %v9972_v0, %v9965_v47  ;;  %v22617_v41 = vmov 116  }
 0xefd   :  { %21711 = vmatpush3.bf16.msra.mxu0 %v22759_v2  ;;  %21617 = vmatprep.subr.bf16.mxu1 %v23791_v60  ;;  %v9986_v2 = vsub.f32 %v2117_v44, %v9872_v39  ;;  %v9980_v62 = vand.u32 4294901760, %v9979_v22  ;;  %v10002_v44 = vsub.f32 %v10000_v14, %v10001_v7  ;;  %v9996_v18 = vand.u32 4294901760, %v9995_v1 }
 0xefe   :  { %21713 = vmatprep.subr.bf16.mxu0 %v22763_v17  ;;  %21619 = vmatpush3.bf16.msra.mxu1 %v23791_v60 }
 0xeff   :  { %21621 = vmatprep.subr.bf16.mxu1 %v23807_v3  ;;  %v9987_v36 = vand.u32 4294901760, %v9986_v2  ;;  %v9981_v24 = vsub.f32 %v9979_v22, %v9980_v62  ;;  %v10003_v39 = vand.u32 4294901760, %v10002_v44  ;;  %v23824_v15 = vpack.c.bf16 %v9986_v2, %v9979_v22  ;;  %22554 = vset.pattern.permute.xlu1 %v22617_v41 }
 0xf00   :  { %22553 = vset.pattern.permute.xlu0 %v22617_v41  ;;  %10443 = vperm.xlu1 %22554, %v23730_v57   ;;  %v22599_v57 = vld [vmem:[%s24478_s0] sm:$0xff] }
 0xf01   :  { %v9988_v28 = vsub.f32 %v9986_v2, %v9987_v36  ;;  %v9982_v13 = vand.u32 4294901760, %v9981_v24  ;;  %v23818_v63 = vpack.c.bf16 %v10003_v39, %v9996_v18  ;;  %10439 = vperm.xlu0 %22553, %v23737_v27   ;;  %v4764_v27 = vadd.f32 %v22599_v57, %v23270_v26  ;;  %v22600_v18 = vld [vmem:[%s24478_s0 + $0x8] sm:$0xff] }
 0xf02   :  { %21623 = vmatpush3.bf16.msra.mxu1 %v23807_v3  ;;  %v4765_v39 = vadd.f32 %v22600_v18, %v23268_v40 }
 0xf03   :  { %21625 = vmatprep.subr.bf16.mxu1 %v23811_v23  ;;  %v9989_v17 = vand.u32 4294901760, %v9988_v28 }
 0xf05   :  { %v23816_v55 = vpack.c.bf16 %v9989_v17, %v9982_v13  ;;  %v23832_v17 = vpack.c.bf16 %v9987_v36, %v9980_v62  ;;  %v23834_v13 = vpack.c.bf16 %v10001_v7, %v9994_v59  ;;  %v23879_v59 = vld [vmem:[%s24478_s0 + $0x20] sm:$0xff] }
 0xf06   :  { %v23884_v7 = vmul.f32 %v4764_v27, %v23879_v59 }
 0xf08   :  { %v11567_v1 = vand.u32 4294901760, %v23884_v7 }
 0xf0a   :  { %v11568_v26 = vsub.f32 %v23884_v7, %v11567_v1 }
 0xf0c   :  { %v11569_v44 = vand.u32 4294901760, %v11568_v26 }
 0xfcb   :  { %v20137_v58 = vpop.f32.mrb[28].mxu0 }
 0xfcc   :  { %v9848_v24 = vmax.f32 %v20137_v58, 0.0  ;;  %v9837_v28 = vpop.f32.mrb[29].mxu0  ;;  %v11570_v58 = vsub.f32 %v11568_v26, %v11569_v44 }
 0xfcd   :  { %v9847_v49 = vmax.f32 %v9837_v28, 0.0 }
 0xfce   :  { %v9854_v0 = vsel %vm9849_vm9, %v9848_v24, 0  ;;  %v23904_v24 = vld [vmem:[%s24478_s0 + $0x28] sm:$0xff] }
 0xfcf   :  { %v23837_v51 = vand.u32 4294901760, %v9854_v0  ;;  %v9851_v2 = vsel %vm9849_vm9, %v9847_v49, 0  ;;  %v23909_v28 = vmul.f32 %v4765_v39, %v23904_v24  ;;  %v11571_v49 = vand.u32 4294901760, %v11570_v58 }
 0xfd0   :  { %v9929_v14 = vand.u32 4294901760, %v9851_v2 }
 0xfd1   :  { %v9940_v22 = vsub.f32 %v9854_v0, %v23837_v51  ;;  %v11577_v0 = vand.u32 4294901760, %v23909_v28 }
 0xfd2   :  { %v9930_v52 = vsub.f32 %v9851_v2, %v9929_v14 }
 0xfd3   :  { %v9941_v56 = vand.u32 4294901760, %v9940_v22  ;;  %v11578_v40 = vsub.f32 %v23909_v28, %v11577_v0 }
 0xfd4   :  { %v9931_v42 = vand.u32 4294901760, %v9930_v52 }
 0xfd5   :  { %v9942_v33 = vsub.f32 %v9940_v22, %v9941_v56  ;;  %v11579_v2 = vand.u32 4294901760, %v11578_v40 }
 0xfd6   :  { %v9932_v47 = vsub.f32 %v9930_v52, %v9931_v42 }
 0xfd7   :  { %v9943_v36 = vand.u32 4294901760, %v9942_v33 }
 0xfd8   :  { %v9933_v62 = vand.u32 4294901760, %v9932_v47 }
 0xfda   :  { %20154 = vmatprep.mubr.f32.mxu1 %v9933_v62 }
 0xfdb   :  { %20155 = vmatmul.mubr.f32.vlgmr.msra.gmra.mrb[22].mxu1 %v9943_v36 }
 0xfdc   :  { %21627 = vmatpush3.bf16.msra.mxu1 %v23811_v23  ;;  %20173 = vmatprep.mubr.f32.mxu1 %v9929_v14 }
 0xfdd   :  { %21629 = vmatprep.subr.bf16.mxu1 %v23814_v16 }
 0xfe0   :  { %21631 = vmatpush3.bf16.msra.mxu1 %v23814_v16 }
 0xfe1   :  { %21633 = vmatprep.subr.bf16.mxu1 %v23816_v55 }
 0xfe4   :  { %21635 = vmatpush3.bf16.msra.mxu1 %v23816_v55 }
 0xfe5   :  { %21637 = vmatprep.subr.bf16.mxu1 %v23818_v63 }
 0xfe8   :  { %21639 = vmatpush3.bf16.msra.mxu1 %v23818_v63 }
 0xfe9   :  { %21641 = vmatprep.subr.bf16.mxu1 %v23820_v48 }
 0xfeb   :  { %20174 = vmatmul.mubr.f32.vlgmr.msra.gmra.mrb[22].mxu1 %v23837_v51 }
 0xfec   :  { %21643 = vmatpush3.bf16.msra.mxu1 %v23820_v48  ;;  %20192 = vmatprep.mubr.f32.mxu1 %v9930_v52  ;;  %v23957_v52 = vld [vmem:[%s24478_s0 + $0x38] sm:$0xff] }
 0xfed   :  { %21645 = vmatprep.subr.bf16.mxu1 %v23822_v50 }
 0xff0   :  { %21647 = vmatpush3.bf16.msra.mxu1 %v23822_v50 }
 0xff1   :  { %21649 = vmatprep.subr.bf16.mxu1 %v23824_v15 }
 0xff4   :  { %21651 = vmatpush3.bf16.msra.mxu1 %v23824_v15 }
 0xff5   :  { %21653 = vmatprep.subr.bf16.mxu1 %v23826_v10 }
 0xff8   :  { %21655 = vmatpush3.bf16.msra.mxu1 %v23826_v10 }
 0xff9   :  { %21657 = vmatprep.subr.bf16.mxu1 %v23720_v20 }
 0xffb   :  { %20193 = vmatmul.mubr.f32.vlgmr.msra.gmra.mrb[22].mxu1 %v9940_v22 }
 0xffc   :  { %21659 = vmatpush3.bf16.msra.mxu1 %v23720_v20  ;;  %20211 = vmatprep.mubr.f32.mxu1 %v9931_v42 }
 0xffd   :  { %21661 = vmatprep.subr.bf16.mxu1 %v23781_v12 }
0x1000   :  { %21663 = vmatpush3.bf16.msra.mxu1 %v23781_v12 }
0x1001   :  { %21665 = vmatprep.subr.bf16.mxu1 %v23791_v60 }
0x1004   :  { %21667 = vmatpush3.bf16.msra.mxu1 %v23791_v60 }
0x1005   :  { %21669 = vmatprep.subr.bf16.mxu1 %v23807_v3 }
0x1008   :  { %21671 = vmatpush3.bf16.msra.mxu1 %v23807_v3 }
0x1009   :  { %21673 = vmatprep.subr.bf16.mxu1 %v23828_v43 }
0x100b   :  { %20212 = vmatmul.mubr.f32.vlgmr.msra.gmra.mrb[22].mxu1 %v9941_v56 }
0x100c   :  { %21675 = vmatpush3.bf16.msra.mxu1 %v23828_v43  ;;  %20230 = vmatprep.mubr.f32.mxu1 %v9929_v14 }
0x100d   :  { %21677 = vmatprep.subr.bf16.mxu1 %v23830_v35 }
0x1010   :  { %21679 = vmatpush3.bf16.msra.mxu1 %v23830_v35 }
0x1011   :  { %21681 = vmatprep.subr.bf16.mxu1 %v23832_v17 }
0x1014   :  { %21683 = vmatpush3.bf16.msra.mxu1 %v23832_v17 }
0x1015   :  { %21685 = vmatprep.subr.bf16.mxu1 %v23834_v13 }
0x1018   :  { %21687 = vmatpush3.bf16.msra.mxu1 %v23834_v13 }
0x1019   :  { %21689 = vmatprep.subr.bf16.mxu1 %v23720_v20 }
0x101b   :  { %20231 = vmatmul.mubr.f32.vlgmr.msra.gmra.mrb[22].mxu1 %v23837_v51 }
0x101c   :  { %21691 = vmatpush3.bf16.msra.mxu1 %v23720_v20  ;;  %20249 = vmatprep.mubr.f32.mxu1 %v9929_v14  ;;  %v11580_v14 = vsub.f32 %v11578_v40, %v11579_v2 }
0x101d   :  { %21693 = vmatprep.subr.bf16.mxu1 %v23781_v12 }
0x101e   :  { %v11581_v22 = vand.u32 4294901760, %v11580_v14  ;;  %v24681_v14 = vld [vmem:[#allocation6_spill] sm:$0xff] }
0x1020   :  { %21695 = vmatpush3.bf16.msra.mxu1 %v23781_v12 }
0x1021   :  { %21697 = vmatprep.subr.bf16.mxu1 %v23791_v60 }
0x1024   :  { %21699 = vmatpush3.bf16.msra.mxu1 %v23791_v60 }
0x1025   :  { %21701 = vmatprep.subr.bf16.mxu1 %v23807_v3 }
0x1028   :  { %21703 = vmatpush3.bf16.msra.mxu1 %v23807_v3 }
0x1029   :  { %21777 = vmatprep.subr.bf16.mxu1 %v22878_v11 }
0x102b   :  { %20250 = vmatmul.mubr.f32.vlgmr.msra.gmra.mrb[22].mxu1 %v23837_v51  ;;  %v22602_v51 = vld [vmem:[%s24478_s0 + $0x18] sm:$0xff] }
0x102c   :  { %20368 = vmatprep.mubr.f32.mxu1 %v11571_v49 }
0x1031   :  { %21779 = vmatpush3.bf16.xpose.msra.mxu1 %v22878_v11 }
0x1032   :  { %21781 = vmatprep.subr.bf16.mxu1 %v22888_v21 }
0x1039   :  { %21783 = vmatpush3.bf16.xpose.msra.mxu1 %v22888_v21 }
0x103a   :  { %21785 = vmatprep.subr.bf16.mxu1 %v23137_v31 }
0x1040   :  { %20369 = vmatmul.mubr.f32.vlgmr.msra.gmra.mrb[24].mxu1 %v11581_v22  ;;  %v24682_v22 = vld [vmem:[#allocation7_spill] sm:$0xff] }
0x1041   :  { %21787 = vmatpush3.bf16.xpose.msra.mxu1 %v23137_v31  ;;  %20379 = vmatprep.mubr.f32.mxu1 %v11567_v1  ;;  %v23939_v31 = vld [vmem:[%s24478_s0 + $0x30] sm:$0xff] }
0x1042   :  { %21789 = vmatprep.subr.bf16.mxu1 %v23150_v37 }
0x1049   :  { %21791 = vmatpush3.bf16.xpose.msra.mxu1 %v23150_v37 }
0x104a   :  { %21793 = vmatprep.subr.bf16.mxu1 %v22865_v8 }
0x1050   :  { %20380 = vmatmul.mubr.f32.vlgmr.msra.gmra.mrb[24].mxu1 %v11577_v0 }
0x1051   :  { %21795 = vmatpush3.bf16.xpose.msra.mxu1 %v22865_v8  ;;  %20390 = vmatprep.mubr.f32.mxu1 %v11568_v26  ;;  %v22601_v8 = vld [vmem:[%s24478_s0 + $0x10] sm:$0xff] }
0x1052   :  { %21797 = vmatprep.subr.bf16.mxu1 %v22869_v9 }
0x1059   :  { %21799 = vmatpush3.bf16.xpose.msra.mxu1 %v22869_v9  ;;  %v6374_v9 = vadd.f32 %v22601_v8, %v23321_v19  ;;  %v24683_v8 = vld [vmem:[#allocation8_spill] sm:$0xff] }
0x105a   :  { %21801 = vmatprep.subr.bf16.mxu1 %v22878_v11 }
0x1060   :  { %20391 = vmatmul.mubr.f32.vlgmr.msra.gmra.mrb[24].mxu1 %v11578_v40 }
0x1061   :  { %21803 = vmatpush3.bf16.xpose.msra.mxu1 %v22878_v11  ;;  %20401 = vmatprep.mubr.f32.mxu1 %v11569_v44 }
0x1062   :  { %21805 = vmatprep.subr.bf16.mxu1 %v22888_v21 }
0x1069   :  { %21807 = vmatpush3.bf16.xpose.msra.mxu1 %v22888_v21 }
0x106a   :  { %21809 = vmatprep.subr.bf16.mxu1 %v22901_v25 }
0x1070   :  { %20402 = vmatmul.mubr.f32.vlgmr.msra.gmra.mrb[24].mxu1 %v11579_v2  ;;  %v24680_v2 = vld [vmem:[#allocation5_spill] sm:$0xff] }
0x1071   :  { %21811 = vmatpush3.bf16.xpose.msra.mxu1 %v22901_v25  ;;  %20412 = vmatprep.mubr.f32.mxu1 %v11567_v1  ;;  %v23944_v25 = vmul.f32 %v6374_v9, %v23939_v31  ;;  %v24684_v9 = vld [vmem:[#allocation3_spill] sm:$0xff] }
0x1072   :  { %21813 = vmatprep.subr.bf16.mxu1 %v22912_v30 }
0x1073   :  { %v13157_v37 = vand.u32 4294901760, %v23944_v25 }
0x1075   :  { %v13158_v19 = vsub.f32 %v23944_v25, %v13157_v37 }
0x1077   :  { %v13159_v56 = vand.u32 4294901760, %v13158_v19 }
0x1079   :  { %21815 = vmatpush3.bf16.xpose.msra.mxu1 %v22912_v30  ;;  %v6375_v30 = vadd.f32 %v22602_v51, %v23319_v5  ;;  %v13160_v42 = vsub.f32 %v13158_v19, %v13159_v56  ;;  %v24687_v51 = vld [vmem:[#allocation10_spill] sm:$0xff] }
0x107a   :  { %21817 = vmatprep.subr.bf16.mxu1 %v22878_v11 }
0x107b   :  { %v13161_v47 = vand.u32 4294901760, %v13160_v42 }
0x1080   :  { %20413 = vmatmul.mubr.f32.vlgmr.msra.gmra.mrb[24].mxu1 %v11577_v0 }
0x1081   :  { %21819 = vmatpush3.bf16.xpose.msra.mxu1 %v22878_v11  ;;  %20423 = vmatprep.mubr.f32.mxu1 %v11567_v1  ;;  %v23961_v11 = vmul.f32 %v6375_v30, %v23957_v52 }
0x1082   :  { %21821 = vmatprep.subr.bf16.mxu1 %v22888_v21 }
0x1083   :  { %v13167_v33 = vand.u32 4294901760, %v23961_v11 }
0x1085   :  { %v13168_v5 = vsub.f32 %v23961_v11, %v13167_v33 }
0x1087   :  { %v13169_v62 = vand.u32 4294901760, %v13168_v5 }
0x1089   :  { %21823 = vmatpush3.bf16.xpose.msra.mxu1 %v22888_v21  ;;  %v13170_v21 = vsub.f32 %v13168_v5, %v13169_v62 }
0x108a   :  { %21873 = vmatprep.subr.bf16.mxu1 %v22931_v38 }
0x108b   :  { %v13171_v36 = vand.u32 4294901760, %v13170_v21 }
0x1090   :  { %20424 = vmatmul.mubr.f32.vlgmr.msra.gmra.mrb[24].mxu1 %v11577_v0 }
0x1091   :  { %21875 = vmatpush3.bf16.xpose.msra.mxu1 %v22931_v38  ;;  %20518 = vmatprep.mubr.f32.mxu1 %v13161_v47 }
0x1092   :  { %21877 = vmatprep.subr.bf16.mxu1 %v22947_v53 }
0x1099   :  { %21879 = vmatpush3.bf16.xpose.msra.mxu1 %v22947_v53 }
0x109a   :  { %21881 = vmatprep.subr.bf16.mxu1 %v23010_v45 }
0x10a0   :  { %20519 = vmatmul.mubr.f32.vlgmr.msra.gmra.mrb[26].mxu1 %v13171_v36 }
0x10a1   :  { %21883 = vmatpush3.bf16.xpose.msra.mxu1 %v23010_v45  ;;  %20529 = vmatprep.mubr.f32.mxu1 %v13157_v37 }
0x10a2   :  { %21885 = vmatprep.subr.bf16.mxu1 %v23030_v61 }
0x10a9   :  { %21887 = vmatpush3.bf16.xpose.msra.mxu1 %v23030_v61  ;;  %v23992_v61 = vpop.permute.xlu1 %10443 }
0x10aa   :  { %21889 = vmatprep.subr.bf16.mxu1 %v23053_v32 }
0x10b0   :  { %20530 = vmatmul.mubr.f32.vlgmr.msra.gmra.mrb[26].mxu1 %v13167_v33 }
0x10b1   :  { %21891 = vmatpush3.bf16.xpose.msra.mxu1 %v23053_v32  ;;  %20540 = vmatprep.mubr.f32.mxu1 %v13158_v19  ;;  %v24686_v19 = vld [vmem:[#allocation9_spill] sm:$0xff] }
0x10b2   :  { %21893 = vmatprep.subr.bf16.mxu1 %v23079_v34 }
0x10b9   :  { %21895 = vmatpush3.bf16.xpose.msra.mxu1 %v23079_v34 }
0x10ba   :  { %21897 = vmatprep.subr.bf16.mxu1 %v22931_v38 }
0x10c0   :  { %20541 = vmatmul.mubr.f32.vlgmr.msra.gmra.mrb[26].mxu1 %v13168_v5 }
0x10c1   :  { %21899 = vmatpush3.bf16.xpose.msra.mxu1 %v22931_v38  ;;  %20551 = vmatprep.mubr.f32.mxu1 %v13159_v56 }
0x10c2   :  { %21901 = vmatprep.subr.bf16.mxu1 %v22947_v53 }
0x10c9   :  { %21903 = vmatpush3.bf16.xpose.msra.mxu1 %v22947_v53 }
0x10ca   :  { %21905 = vmatprep.subr.bf16.mxu1 %v23094_v29 }
0x10d0   :  { %20552 = vmatmul.mubr.f32.vlgmr.msra.gmra.mrb[26].mxu1 %v13169_v62 }
0x10d1   :  { %21907 = vmatpush3.bf16.xpose.msra.mxu1 %v23094_v29  ;;  %20562 = vmatprep.mubr.f32.mxu1 %v13157_v37  ;;  %v23995_v29 = vpop.permute.xlu0 %10439 }
0x10d2   :  { %21909 = vmatprep.subr.bf16.mxu1 %v23100_v54 }
0x10d9   :  { %21911 = vmatpush3.bf16.xpose.msra.mxu1 %v23100_v54 }
0x10da   :  { %21913 = vmatprep.subr.bf16.mxu1 %v22931_v38 }
0x10e0   :  { %20563 = vmatmul.mubr.f32.vlgmr.msra.gmra.mrb[26].mxu1 %v13167_v33 }
0x10e1   :  { %21915 = vmatpush3.bf16.xpose.msra.mxu1 %v22931_v38  ;;  %20573 = vmatprep.mubr.f32.mxu1 %v13157_v37  ;;  %v24679_v38 = vld [vmem:[#allocation73_spill] sm:$0xff]  ;;  %v24685_v37 = vld [vmem:[#allocation4_spill] sm:$0xff] }
0x10e2   :  { %21917 = vmatprep.subr.bf16.mxu1 %v22947_v53 }
0x10e9   :  { %21919 = vmatpush3.bf16.xpose.msra.mxu1 %v22947_v53 }
0x10ea   :  { %22010 = vmatprep.subr.bf16.mxu1 %v24632_v6 }
0x10f0   :  { %20574 = vmatmul.mubr.f32.vlgmr.msra.gmra.mrb[26].mxu1 %v13167_v33 }
0x10f1   :  { %20730 = vmatprep.mubr.msk.f32.mxu1 %vm22606_vm3, %v24640_v46 }
0x10fe   :  { %v20251_v45 = vpop.f32.mrb[22].mxu1 }
0x10ff   :  { %v10437_v32 = vadd.f32 %v20251_v45, %v23745_v4  ;;  %v10426_v34 = vpop.f32.mrb[23].mxu1 }
0x1100   :  { %v10436_v54 = vadd.f32 %v10426_v34, %v24679_v38 }
0x1101   :  { %v23999_v41 = vmul.f32 %v23992_v61, %v10437_v32 }
0x1102   :  { %v24002_v53 = vmul.f32 %v23995_v29, %v10436_v54 }
0x1103   :  { %v10452_v57 = vsel %vm534_vm2, %v23999_v41, 0 }
0x1104   :  { %v10533_v27 = vand.u32 4294901760, %v10452_v57  ;;  %v10449_v1 = vsel %vm534_vm2, %v24002_v53, 0 }
0x1105   :  { %v10523_v26 = vand.u32 4294901760, %v10449_v1 }
0x1106   :  { %v10534_v4 = vsub.f32 %v10452_v57, %v10533_v27 }
0x1107   :  { %v10524_v44 = vsub.f32 %v10449_v1, %v10523_v26 }
0x1108   :  { %v10535_v18 = vand.u32 4294901760, %v10534_v4 }
0x1109   :  { %v10525_v39 = vand.u32 4294901760, %v10524_v44 }
0x110a   :  { %v10536_v58 = vsub.f32 %v10534_v4, %v10535_v18 }
0x110b   :  { %v10526_v49 = vsub.f32 %v10524_v44, %v10525_v39 }
0x110c   :  { %v10537_v40 = vand.u32 4294901760, %v10536_v58 }
0x110d   :  { %v10527_v0 = vand.u32 4294901760, %v10526_v49 }
0x110f   :  { %20260 = vmatprep.mubr.f32.mxu0 %v10527_v0 }
0x1110   :  { %20261 = vmatmul.mubr.f32.vlgmr.msra.gmra.mrb[30].mxu0 %v10537_v40 }
0x1111   :  { %21715 = vmatpush3.bf16.msra.mxu0 %v24680_v2  ;;  %20271 = vmatprep.mubr.f32.mxu0 %v10523_v26 }
0x1112   :  { %21717 = vmatprep.subr.bf16.mxu0 %v24681_v14 }
0x1115   :  { %21719 = vmatpush3.bf16.msra.mxu0 %v24681_v14 }
0x1116   :  { %21721 = vmatprep.subr.bf16.mxu0 %v24682_v22 }
0x1118   :  { %20272 = vmatmul.mubr.f32.vlgmr.msra.gmra.mrb[30].mxu0 %v10533_v27 }
0x1119   :  { %21723 = vmatpush3.bf16.msra.mxu0 %v24682_v22  ;;  %20282 = vmatprep.mubr.f32.mxu0 %v10524_v44 }
0x111a   :  { %21725 = vmatprep.subr.bf16.mxu0 %v24683_v8 }
0x111d   :  { %21727 = vmatpush3.bf16.msra.mxu0 %v24683_v8 }
0x111e   :  { %21729 = vmatprep.subr.bf16.mxu0 %v24684_v9 }
0x1120   :  { %20283 = vmatmul.mubr.f32.vlgmr.msra.gmra.mrb[30].mxu0 %v10534_v4 }
0x1121   :  { %21731 = vmatpush3.bf16.msra.mxu0 %v24684_v9  ;;  %20293 = vmatprep.mubr.f32.mxu0 %v10525_v39 }
0x1122   :  { %21733 = vmatprep.subr.bf16.mxu0 %v24685_v37 }
0x1125   :  { %21735 = vmatpush3.bf16.msra.mxu0 %v24685_v37 }
0x1126   :  { %21737 = vmatprep.subr.bf16.mxu0 %v24686_v19 }
0x1128   :  { %20294 = vmatmul.mubr.f32.vlgmr.msra.gmra.mrb[30].mxu0 %v10535_v18 }
0x1129   :  { %21739 = vmatpush3.bf16.msra.mxu0 %v24686_v19  ;;  %20304 = vmatprep.mubr.f32.mxu0 %v10523_v26 }
0x112a   :  { %21741 = vmatprep.subr.bf16.mxu0 %v24687_v51 }
0x112d   :  { %21743 = vmatpush3.bf16.msra.mxu0 %v24687_v51 }
0x112e   :  { %21745 = vmatprep.subr.bf16.mxu0 %v24684_v9 }
0x1130   :  { %20305 = vmatmul.mubr.f32.vlgmr.msra.gmra.mrb[30].mxu0 %v10533_v27 }
0x1131   :  { %21747 = vmatpush3.bf16.msra.mxu0 %v24684_v9  ;;  %20315 = vmatprep.mubr.f32.mxu0 %v10523_v26 }
0x1132   :  { %21749 = vmatprep.subr.bf16.mxu0 %v24685_v37 }
0x1135   :  { %21751 = vmatpush3.bf16.msra.mxu0 %v24685_v37 }
0x1138   :  { %20316 = vmatmul.mubr.f32.vlgmr.msra.gmra.mrb[30].mxu0 %v10533_v27 }
0x1163   :  { %v24027_v30 = vpop.f32.mrb[24].mxu1 }
0x1164   :  { %v24029_v56 = vpop.f32.mrb[25].mxu1 }
0x11c3   :  { %v24031_v42 = vpop.f32.mrb[26].mxu1 }
0x11c4   :  { %v24033_v33 = vpop.f32.mrb[27].mxu1 }
0x120b   :  { %v24035_v47 = vpop.f32.mrb[30].mxu0 }
0x120c   :  { %10986 = vrot.lane.b32.xlu0 %v24035_v47, %s22603_s13  ;;  %v24039_v5 = vpop.f32.mrb[31].mxu0  ;;  %v10990_v38 = vsel %vm534_vm2, %v24035_v47, 0 }
0x120d   :  { %v10988_v62 = vsel %vm534_vm2, %v24039_v5, 0  ;;  %10984 = vrot.lane.b32.xlu1 %v24039_v5, %s22603_s13  ;;  %v11073_v54 = vand.u32 4294901760, %v10990_v38 }
0x120e   :  { %v11063_v21 = vand.u32 4294901760, %v10988_v62 }
0x120f   :  { %v11074_v27 = vsub.f32 %v10990_v38, %v11073_v54  ;;  %v24689_v38 = vld [vmem:[#allocation16_spill] sm:$0xff] }
0x1210   :  { %v11064_v36 = vsub.f32 %v10988_v62, %v11063_v21  ;;  %12034 = vrot.lane.b32.xlu0 %v24027_v30, %s22611_s14 }
0x1211   :  { %12032 = vrot.lane.b32.xlu1 %v24029_v56, %s22611_s14  ;;  %v11075_v0 = vand.u32 4294901760, %v11074_v27 }
0x1212   :  { %v11065_v45 = vand.u32 4294901760, %v11064_v36 }
0x1213   :  { %v11076_v8 = vsub.f32 %v11074_v27, %v11075_v0 }
0x1214   :  { %12580 = vrot.lane.b32.xlu0 %v24035_v47, %s22610_s12  ;;  %v11066_v32 = vsub.f32 %v11064_v36, %v11065_v45 }
0x1215   :  { %12578 = vrot.lane.b32.xlu1 %v24039_v5, %s22610_s12  ;;  %v11077_v19 = vand.u32 4294901760, %v11076_v8 }
0x1216   :  { %v11067_v34 = vand.u32 4294901760, %v11066_v32 }
0x1218   :  { %20322 = vmatprep.mubr.f32.mxu0 %v11067_v34  ;;  %13624 = vrot.lane.b32.xlu0 %v24031_v42, %s22611_s14  ;;  %v24688_v34 = vld [vmem:[#allocation15_spill] sm:$0xff] }
0x1219   :  { %13622 = vrot.lane.b32.xlu1 %v24033_v33, %s22611_s14 }
0x127e   :  { %v10987_v57 = vpop.permute.xlu0 %10986 }
0x127f   :  { %v10994_v1 = vsel %vm534_vm2, %v10987_v57, 0  ;;  %v10985_v26 = vpop.permute.xlu1 %10984  ;;  %v12026_v57 = vadd.f32 1.0, %v24029_v56 }
0x1280   :  { %v11000_v4 = vand.u32 4294901760, %v10994_v1  ;;  %v10992_v44 = vsel %vm534_vm2, %v10985_v26, 0 }
0x1281   :  { %v10997_v18 = vand.u32 4294901760, %v10992_v44 }
0x1282   :  { %v11092_v39 = vsub.f32 %v10994_v1, %v11000_v4  ;;  %v12035_v26 = vpop.permute.xlu0 %12034 }
0x1283   :  { %v21752_v58 = vpack.c.bf16 %v11000_v4, %v10997_v18  ;;  %v11085_v49 = vsub.f32 %v10992_v44, %v10997_v18  ;;  %v12033_v44 = vpop.permute.xlu1 %12032 }
0x1284   :  { %v11093_v40 = vand.u32 4294901760, %v11092_v39 }
0x1285   :  { %v11086_v2 = vand.u32 4294901760, %v11085_v49  ;;  %21753 = vmatprep.subr.bf16.mxu0 %v21752_v58  ;;  %v21760_v62 = vpack.c.bf16 %v11092_v39, %v11085_v49 }
0x1286   :  { %v11094_v14 = vsub.f32 %v11092_v39, %v11093_v40  ;;  %21755 = vmatpush3.bf16.xpose.msra.mxu0 %v21752_v58 }
0x1287   :  { %v11087_v22 = vsub.f32 %v11085_v49, %v11086_v2  ;;  %v21768_v32 = vpack.c.bf16 %v11093_v40, %v11086_v2 }
0x1288   :  { %v11095_v9 = vand.u32 4294901760, %v11094_v14 }
0x1289   :  { %v11088_v37 = vand.u32 4294901760, %v11087_v22 }
0x128b   :  { %v21756_v51 = vpack.c.bf16 %v11095_v9, %v11088_v37 }
0x128d   :  { %20323 = vmatmul.mubr.f32.vlgmr.msra.gmra.mrb[32].mxu0 %v11077_v19  ;;  %21757 = vmatprep.subr.bf16.mxu0 %v21756_v51 }
0x128e   :  { %21759 = vmatpush3.bf16.xpose.msra.mxu0 %v21756_v51  ;;  %20329 = vmatprep.mubr.f32.mxu0 %v11063_v21 }
0x128f   :  { %21761 = vmatprep.subr.bf16.mxu0 %v21760_v62 }
0x1295   :  { %20330 = vmatmul.mubr.f32.vlgmr.msra.gmra.mrb[32].mxu0 %v11073_v54 }
0x1296   :  { %21763 = vmatpush3.bf16.xpose.msra.mxu0 %v21760_v62  ;;  %20336 = vmatprep.mubr.f32.mxu0 %v11064_v36  ;;  %v12027_v36 = vadd.f32 1.0, %v24027_v30  ;;  %v24692_v62 = vld [vmem:[#allocation17_spill] sm:$0xff] }
0x1297   :  { %21765 = vmatprep.subr.bf16.mxu0 %v21752_v58 }
0x129d   :  { %20337 = vmatmul.mubr.f32.vlgmr.msra.gmra.mrb[32].mxu0 %v11074_v27 }
0x129e   :  { %21767 = vmatpush3.bf16.xpose.msra.mxu0 %v21752_v58  ;;  %20343 = vmatprep.mubr.f32.mxu0 %v11065_v45 }
0x129f   :  { %21769 = vmatprep.subr.bf16.mxu0 %v21768_v32 }
0x12a5   :  { %20344 = vmatmul.mubr.f32.vlgmr.msra.gmra.mrb[32].mxu0 %v11075_v0 }
0x12a6   :  { %21771 = vmatpush3.bf16.xpose.msra.mxu0 %v21768_v32  ;;  %20350 = vmatprep.mubr.f32.mxu0 %v11063_v21  ;;  %v12579_v32 = vpop.permute.xlu1 %12578 }
0x12a7   :  { %21773 = vmatprep.subr.bf16.mxu0 %v21752_v58 }
0x12ad   :  { %20351 = vmatmul.mubr.f32.vlgmr.msra.gmra.mrb[32].mxu0 %v11073_v54 }
0x12ae   :  { %21775 = vmatpush3.bf16.xpose.msra.mxu0 %v21752_v58  ;;  %20357 = vmatprep.mubr.f32.mxu0 %v11063_v21  ;;  %v24690_v21 = vld [vmem:[#allocation20_spill] sm:$0xff] }
0x12af   :  { %21825 = vmatprep.subr.bf16.mxu0 %v24688_v34 }
0x12b5   :  { %20358 = vmatmul.mubr.f32.vlgmr.msra.gmra.mrb[32].mxu0 %v11073_v54  ;;  %v24691_v54 = vld [vmem:[#allocation19_spill] sm:$0xff] }
0x12b6   :  { %21827 = vmatpush3.bf16.msra.mxu0 %v24688_v34 }
0x12b7   :  { %21829 = vmatprep.subr.bf16.mxu0 %v24689_v38 }
0x1388   :  { %v20359_v45 = vpop.f32.mrb[32].mxu0 }
0x1389   :  { %v12029_v27 = vmul.f32 %v20359_v45, %v12027_v36  ;;  %v11488_v1 = vpop.f32.mrb[33].mxu0  ;;  %v24693_v36 = vld [vmem:[#allocation18_spill] sm:$0xff] }
0x138a   :  { %v12028_v4 = vmul.f32 %v12026_v57, %v11488_v1  ;;  %v12582_v57 = vsel %vm534_vm2, %v12579_v32, 0  ;;  %v13616_v32 = vadd.f32 1.0, %v24033_v33 }
0x138b   :  { %v12039_v18 = vadd.f32 %v12035_v26, %v12029_v27  ;;  %v12653_v45 = vand.u32 4294901760, %v12582_v57 }
0x138c   :  { %v12038_v39 = vadd.f32 %v12033_v44, %v12028_v4  ;;  %v24694_v44 = vld [vmem:[#allocation11_spill] sm:$0xff] }
0x138d   :  { %v24067_v58 = vmul.f32 %v12039_v18, %v24690_v21  ;;  %v12654_v27 = vsub.f32 %v12582_v57, %v12653_v45 }
0x138e   :  { %v24070_v49 = vmul.f32 %v12038_v39, %v24691_v54 }
0x138f   :  { %v12046_v0 = vsel %vm1550_vm6, %v24067_v58, 0  ;;  %v12655_v4 = vand.u32 4294901760, %v12654_v27 }
0x1390   :  { %v12125_v30 = vand.u32 4294901760, %v12046_v0  ;;  %v12043_v56 = vsel %vm1550_vm6, %v24070_v49, 0 }
0x1391   :  { %v12115_v40 = vand.u32 4294901760, %v12043_v56  ;;  %v12656_v39 = vsub.f32 %v12654_v27, %v12655_v4 }
0x1392   :  { %v12126_v2 = vsub.f32 %v12046_v0, %v12125_v30 }
0x1393   :  { %v12116_v14 = vsub.f32 %v12043_v56, %v12115_v40  ;;  %v12657_v54 = vand.u32 4294901760, %v12656_v39  ;;  %v24695_v56 = vld [vmem:[#allocation14_spill] sm:$0xff] }
0x1394   :  { %v12127_v22 = vand.u32 4294901760, %v12126_v2 }
0x1395   :  { %v12117_v8 = vand.u32 4294901760, %v12116_v14 }
0x1396   :  { %v12128_v9 = vsub.f32 %v12126_v2, %v12127_v22 }
0x1397   :  { %v12118_v37 = vsub.f32 %v12116_v14, %v12117_v8 }
0x1398   :  { %v12129_v51 = vand.u32 4294901760, %v12128_v9 }
0x1399   :  { %v12119_v19 = vand.u32 4294901760, %v12118_v37 }
0x139b   :  { %20430 = vmatprep.mubr.f32.mxu0 %v12119_v19 }
0x139c   :  { %20431 = vmatmul.mubr.f32.vlgmr.msra.gmra.mrb[34].mxu0 %v12129_v51 }
0x139d   :  { %21831 = vmatpush3.bf16.msra.mxu0 %v24689_v38  ;;  %20437 = vmatprep.mubr.f32.mxu0 %v12115_v40  ;;  %v12581_v38 = vpop.permute.xlu0 %12580 }
0x139e   :  { %21833 = vmatprep.subr.bf16.mxu0 %v24692_v62  ;;  %v12584_v1 = vsel %vm534_vm2, %v12581_v38, 0 }
0x139f   :  { %v12663_v26 = vand.u32 4294901760, %v12584_v1 }
0x13a1   :  { %v12664_v18 = vsub.f32 %v12584_v1, %v12663_v26 }
0x13a3   :  { %v12665_v21 = vand.u32 4294901760, %v12664_v18 }
0x13a4   :  { %20438 = vmatmul.mubr.f32.vlgmr.msra.gmra.mrb[34].mxu0 %v12125_v30 }
0x13a5   :  { %21835 = vmatpush3.bf16.msra.mxu0 %v24692_v62  ;;  %20444 = vmatprep.mubr.f32.mxu0 %v12116_v14  ;;  %v12666_v0 = vsub.f32 %v12664_v18, %v12665_v21  ;;  %v24699_v14 = vld [vmem:[#allocation22_spill] sm:$0xff]  ;;  %v13617_v62 = vadd.f32 1.0, %v24031_v42  ;;  %v24703_v42 = vld [vmem:[#allocation27_spill] sm:$0xff] }
0x13a6   :  { %21837 = vmatprep.subr.bf16.mxu0 %v24688_v34 }
0x13ac   :  { %20445 = vmatmul.mubr.f32.vlgmr.msra.gmra.mrb[34].mxu0 %v12126_v2  ;;  %v12667_v2 = vand.u32 4294901760, %v12666_v0 }
0x13ad   :  { %21839 = vmatpush3.bf16.msra.mxu0 %v24688_v34  ;;  %20451 = vmatprep.mubr.f32.mxu0 %v12117_v8 }
0x13ae   :  { %21841 = vmatprep.subr.bf16.mxu0 %v24693_v36 }
0x13b4   :  { %20452 = vmatmul.mubr.f32.vlgmr.msra.gmra.mrb[34].mxu0 %v12127_v22 }
0x13b5   :  { %21843 = vmatpush3.bf16.msra.mxu0 %v24693_v36  ;;  %20458 = vmatprep.mubr.f32.mxu0 %v12115_v40 }
0x13b6   :  { %21845 = vmatprep.subr.bf16.mxu0 %v24688_v34 }
0x13bc   :  { %20459 = vmatmul.mubr.f32.vlgmr.msra.gmra.mrb[34].mxu0 %v12125_v30 }
0x13bd   :  { %21847 = vmatpush3.bf16.msra.mxu0 %v24688_v34  ;;  %20465 = vmatprep.mubr.f32.mxu0 %v12115_v40  ;;  %v24696_v34 = vld [vmem:[#allocation12_spill] sm:$0xff]  ;;  %v24698_v40 = vld [vmem:[#allocation21_spill] sm:$0xff] }
0x13be   :  { %21849 = vmatprep.subr.bf16.mxu0 %v24694_v44 }
0x13c4   :  { %20466 = vmatmul.mubr.f32.vlgmr.msra.gmra.mrb[34].mxu0 %v12125_v30  ;;  %v24697_v30 = vld [vmem:[#allocation13_spill] sm:$0xff] }
0x13c5   :  { %20472 = vmatprep.mubr.f32.mxu0 %v12657_v54 }
0x13c6   :  { %21851 = vmatpush3.bf16.xpose.msra.mxu0 %v24694_v44 }
0x13c7   :  { %21853 = vmatprep.subr.bf16.mxu0 %v24695_v56 }
0x13cd   :  { %20473 = vmatmul.mubr.f32.vlgmr.msra.gmra.mrb[36].mxu0 %v12667_v2  ;;  %v24704_v2 = vld [vmem:[#allocation29_spill] sm:$0xff] }
0x13ce   :  { %21855 = vmatpush3.bf16.xpose.msra.mxu0 %v24695_v56  ;;  %20479 = vmatprep.mubr.f32.mxu0 %v12653_v45 }
0x13cf   :  { %21857 = vmatprep.subr.bf16.mxu0 %v24696_v34 }
0x13d5   :  { %20480 = vmatmul.mubr.f32.vlgmr.msra.gmra.mrb[36].mxu0 %v12663_v26 }
0x13d6   :  { %21859 = vmatpush3.bf16.xpose.msra.mxu0 %v24696_v34  ;;  %20486 = vmatprep.mubr.f32.mxu0 %v12654_v27  ;;  %v24700_v27 = vld [vmem:[#allocation26_spill] sm:$0xff]  ;;  %v12554_v34 = vadd.f32 %v24070_v49, %v24704_v2 }
0x13d7   :  { %21861 = vmatprep.subr.bf16.mxu0 %v24694_v44 }
0x13dd   :  { %20487 = vmatmul.mubr.f32.vlgmr.msra.gmra.mrb[36].mxu0 %v12664_v18 }
0x13de   :  { %21863 = vmatpush3.bf16.xpose.msra.mxu0 %v24694_v44  ;;  %20493 = vmatprep.mubr.f32.mxu0 %v12655_v4 }
0x13df   :  { %21865 = vmatprep.subr.bf16.mxu0 %v24697_v30 }
0x13e5   :  { %20494 = vmatmul.mubr.f32.vlgmr.msra.gmra.mrb[36].mxu0 %v12665_v21 }
0x13e6   :  { %21867 = vmatpush3.bf16.xpose.msra.mxu0 %v24697_v30  ;;  %20500 = vmatprep.mubr.f32.mxu0 %v12653_v45 }
0x13e7   :  { %21869 = vmatprep.subr.bf16.mxu0 %v24694_v44 }
0x13ed   :  { %20501 = vmatmul.mubr.f32.vlgmr.msra.gmra.mrb[36].mxu0 %v12663_v26 }
0x13ee   :  { %21871 = vmatpush3.bf16.xpose.msra.mxu0 %v24694_v44  ;;  %20507 = vmatprep.mubr.f32.mxu0 %v12653_v45  ;;  %v24702_v44 = vld [vmem:[#allocation28_spill] sm:$0xff] }
0x13ef   :  { %21921 = vmatprep.subr.bf16.mxu0 %v24698_v40 }
0x13f5   :  { %20508 = vmatmul.mubr.f32.vlgmr.msra.gmra.mrb[36].mxu0 %v12663_v26  ;;  %v24701_v26 = vld [vmem:[#allocation25_spill] sm:$0xff] }
0x13f6   :  { %21923 = vmatpush3.bf16.msra.mxu0 %v24698_v40 }
0x13f7   :  { %21925 = vmatprep.subr.bf16.mxu0 %v24699_v14 }
0x1497   :  { %v20467_v22 = vpop.f32.mrb[34].mxu0 }
0x1498   :  { %v12551_v8 = vadd.f32 %v20467_v22, %v23909_v28  ;;  %v12540_v9 = vpop.f32.mrb[35].mxu0 }
0x1499   :  { %v12550_v37 = vadd.f32 %v12540_v9, %v23884_v7  ;;  %v13625_v7 = vpop.permute.xlu0 %13624 }
0x149a   :  { %v12553_v19 = vmul.f32 %v12551_v8, %v23904_v24  ;;  %v13623_v24 = vpop.permute.xlu1 %13622  ;;  %v24705_v8 = vld [vmem:[#allocation30_spill] sm:$0xff] }
0x149b   :  { %v12552_v51 = vmul.f32 %v12550_v37, %v23879_v59  ;;  %v12555_v9 = vadd.f32 %v24067_v58, %v24705_v8  ;;  %v24706_v58 = vld [vmem:[#allocation23_spill] sm:$0xff] }
0x149c   :  { %18201 = vst [vmem:[%s24480_s2 + $0x8] sm:$0xff] %v12553_v19 }
0x149d   :  { %18200 = vst [vmem:[%s24480_s2] sm:$0xff] %v12552_v51  ;;  %v12556_v51 = vsel %vm1550_vm6, %v12554_v34, -inf }
0x14c8   :  { %v20509_v28 = vpop.f32.mrb[36].mxu0 }
0x14c9   :  { %v13619_v36 = vmul.f32 %v20509_v28, %v13617_v62  ;;  %v13078_v57 = vpop.f32.mrb[37].mxu0 }
0x14ca   :  { %v13618_v45 = vmul.f32 %v13616_v32, %v13078_v57  ;;  %v12559_v32 = vsel %vm1550_vm6, %v12555_v9, -inf }
0x14cb   :  { %v13629_v38 = vadd.f32 %v13625_v7, %v13619_v36  ;;  %v24707_v7 = vld [vmem:[#allocation24_spill] sm:$0xff] }
0x14cc   :  { %v13628_v59 = vadd.f32 %v13623_v24, %v13618_v45 }
0x14cd   :  { %v13631_v1 = vmul.f32 %v13629_v38, %v24700_v27 }
0x14ce   :  { %v13630_v4 = vmul.f32 %v13628_v59, %v24701_v26 }
0x14cf   :  { %v14145_v18 = vadd.f32 %v13631_v1, %v24702_v44  ;;  %v13636_v39 = vsel %vm1550_vm6, %v13631_v1, 0 }
0x14d0   :  { %v13715_v21 = vand.u32 4294901760, %v13636_v39  ;;  %v14144_v54 = vadd.f32 %v13630_v4, %v24703_v42  ;;  %v13633_v33 = vsel %vm1550_vm6, %v13630_v4, 0 }
0x14d1   :  { %v14149_v0 = vsel %vm1550_vm6, %v14145_v18, -inf  ;;  %v13705_v56 = vand.u32 4294901760, %v13633_v33 }
0x14d2   :  { %14150 = vmax.xlane.f32.xlu0 %v14149_v0  ;;  %v13716_v30 = vsub.f32 %v13636_v39, %v13715_v21  ;;  %v14146_v22 = vsel %vm1550_vm6, %v14144_v54, -inf }
0x14d3   :  { %14147 = vmax.xlane.f32.xlu1 %v14146_v22  ;;  %v13706_v37 = vsub.f32 %v13633_v33, %v13705_v56 }
0x14d4   :  { %v13717_v19 = vand.u32 4294901760, %v13716_v30 }
0x14d5   :  { %v13707_v62 = vand.u32 4294901760, %v13706_v37 }
0x14d6   :  { %12557 = vmax.xlane.f32.xlu0 %v12556_v51  ;;  %v13718_v28 = vsub.f32 %v13716_v30, %v13717_v19 }
0x14d7   :  { %12560 = vmax.xlane.f32.xlu1 %v12559_v32  ;;  %v13708_v36 = vsub.f32 %v13706_v37, %v13707_v62 }
0x14d8   :  { %v13719_v57 = vand.u32 4294901760, %v13718_v28 }
0x14d9   :  { %v13709_v49 = vand.u32 4294901760, %v13708_v36 }
0x14db   :  { %20580 = vmatprep.mubr.f32.mxu0 %v13709_v49 }
0x14dc   :  { %20581 = vmatmul.mubr.f32.vlgmr.msra.gmra.mrb[38].mxu0 %v13719_v57 }
0x14dd   :  { %20587 = vmatprep.mubr.f32.mxu0 %v13705_v56  ;;  %21927 = vmatpush3.bf16.msra.mxu0 %v24699_v14 }
0x14de   :  { %21929 = vmatprep.subr.bf16.mxu0 %v24706_v58 }
0x14e4   :  { %20588 = vmatmul.mubr.f32.vlgmr.msra.gmra.mrb[38].mxu0 %v13715_v21 }
0x14e5   :  { %20594 = vmatprep.mubr.f32.mxu0 %v13706_v37  ;;  %21931 = vmatpush3.bf16.msra.mxu0 %v24706_v58 }
0x14e6   :  { %21933 = vmatprep.subr.bf16.mxu0 %v24698_v40 }
0x14ec   :  { %20595 = vmatmul.mubr.f32.vlgmr.msra.gmra.mrb[38].mxu0 %v13716_v30 }
0x14ed   :  { %20601 = vmatprep.mubr.f32.mxu0 %v13707_v62  ;;  %21935 = vmatpush3.bf16.msra.mxu0 %v24698_v40 }
0x14ee   :  { %21937 = vmatprep.subr.bf16.mxu0 %v24707_v7 }
0x14f4   :  { %20602 = vmatmul.mubr.f32.vlgmr.msra.gmra.mrb[38].mxu0 %v13717_v19 }
0x14f5   :  { %20608 = vmatprep.mubr.f32.mxu0 %v13705_v56  ;;  %21939 = vmatpush3.bf16.msra.mxu0 %v24707_v7 }
0x14f6   :  { %21941 = vmatprep.subr.bf16.mxu0 %v24698_v40 }
0x14fc   :  { %20609 = vmatmul.mubr.f32.vlgmr.msra.gmra.mrb[38].mxu0 %v13715_v21 }
0x14fd   :  { %20615 = vmatprep.mubr.f32.mxu0 %v13705_v56  ;;  %21943 = vmatpush3.bf16.msra.mxu0 %v24698_v40 }
0x1504   :  { %20616 = vmatmul.mubr.f32.vlgmr.msra.gmra.mrb[38].mxu0 %v13715_v21 }
0x155f   :  { %v14151_v14 = vpop.xlane.xlu0 %14150 }
0x1560   :  { %v14153_v45 = vsub.f32 %v14145_v18, %v14151_v14  ;;  %v14148_v24 = vpop.xlane.xlu1 %14147 }
0x1561   :  { %v14152_v38 = vsub.f32 %v14144_v54, %v14148_v24 }
0x1562   :  { %v14156_v59 = vmul.f32 1.442695, %v14153_v45 }
0x1563   :  { %v14154_v27 = vmul.f32 1.442695, %v14152_v38  ;;  %v12558_v1 = vpop.xlane.xlu0 %12557 }
0x1564   :  { %22579 = vpow2.f32 %v14156_v59  ;;  %v12562_v26 = vsub.f32 %v12554_v34, %v12558_v1  ;;  %v12561_v4 = vpop.xlane.xlu1 %12560 }
0x1565   :  { %22581 = vpow2.f32 %v14154_v27  ;;  %v12563_v44 = vsub.f32 %v12555_v9, %v12561_v4 }
0x1566   :  { %v12564_v39 = vmul.f32 1.442695, %v12562_v26 }
0x1567   :  { %v12566_v42 = vmul.f32 1.442695, %v12563_v44 }
0x1568   :  { %22583 = vpow2.f32 %v12564_v39 }
0x1569   :  { %22585 = vpow2.f32 %v12566_v42 }
0x156e   :  { %v22580_v33 = vpop.eup %22579 }
0x156f   :  { %v22582_v0 = vpop.eup %22581  ;;  %v14161_v40 = vsel %vm1550_vm6, %v22580_v33, 0.0 }
0x1570   :  { %14162 = vadd.xlane.f32.xlu1 %v14161_v40  ;;  %v14158_v18 = vsel %vm1550_vm6, %v22582_v0, 0.0 }
0x1571   :  { %14159 = vadd.xlane.f32.xlu0 %v14158_v18 }
0x1572   :  { %v22584_v21 = vpop.eup %22583 }
0x1573   :  { %v22586_v54 = vpop.eup %22585  ;;  %v12568_v56 = vsel %vm1550_vm6, %v22584_v21, 0.0 }
0x1574   :  { %v12571_v2 = vsel %vm1550_vm6, %v22586_v54, 0.0 }
0x1575   :  { %12569 = vadd.xlane.f32.xlu0 %v12568_v56  ;;  %12572 = vadd.xlane.f32.xlu1 %v12571_v2 }
0x15d7   :  { %v20617_v34 = vpop.f32.mrb[38].mxu0 }
0x15d8   :  { %v14141_v30 = vadd.f32 %v20617_v34, %v23961_v11  ;;  %v14130_v22 = vpop.f32.mrb[39].mxu0  ;;  %v24708_v34 = vld [vmem:[#allocation31_spill] sm:$0xff] }
0x15d9   :  { %v14140_v8 = vadd.f32 %v14130_v22, %v23944_v25 }
0x15da   :  { %v14143_v9 = vmul.f32 %v14141_v30, %v23957_v52 }
0x15db   :  { %v14142_v37 = vmul.f32 %v14140_v8, %v23939_v31 }
0x15dc   :  { %18203 = vst [vmem:[%s24480_s2 + $0x18] sm:$0xff] %v14143_v9 }
0x15dd   :  { %18202 = vst [vmem:[%s24480_s2 + $0x10] sm:$0xff] %v14142_v37 }
0x15fd   :  { %v14163_v19 = vpop.xlane.xlu1 %14162 }
0x15fe   :  { %22587 = vrcp.f32 %v14163_v19  ;;  %v14160_v51 = vpop.xlane.xlu0 %14159 }
0x15ff   :  { %22589 = vrcp.f32 %v14160_v51  ;;  %v24709_v51 = vld [vmem:[#allocation32_spill] sm:$0xff] }
0x1602   :  { %v12573_v31 = vpop.xlane.xlu1 %12572  ;;  %v12570_v52 = vpop.xlane.xlu0 %12569 }
0x1603   :  { %22591 = vrcp.f32 %v12573_v31 }
0x1604   :  { %22593 = vrcp.f32 %v12570_v52  ;;  %v24711_v52 = vld [vmem:[#allocation34_spill] sm:$0xff] }
0x1608   :  { %v22588_v11 = vpop.eup %22587 }
0x1609   :  { %v22590_v62 = vpop.eup %22589  ;;  %v14167_v32 = vmul.f32 %v22588_v11, %v22580_v33 }
0x160a   :  { %v14166_v25 = vmul.f32 %v22590_v62, %v22582_v0  ;;  %v24710_v62 = vld [vmem:[#allocation33_spill] sm:$0xff] }
0x160b   :  { %14172 = vrot.lane.b32.xlu1 %v14167_v32, %s22614_s27 }
0x160c   :  { %14170 = vrot.lane.b32.xlu0 %v14166_v25, %s22614_s27 }
0x160d   :  { %v22592_v28 = vpop.eup %22591 }
0x160e   :  { %v22594_v36 = vpop.eup %22593  ;;  %v24157_v49 = vmul.f32 %v22592_v28, %v22586_v54 }
0x160f   :  { %14178 = vrot.lane.b32.xlu1 %v24039_v5, %s22613_s26  ;;  %v24159_v58 = vmul.f32 %v22594_v36, %v22584_v21 }
0x1610   :  { %14180 = vrot.lane.b32.xlu0 %v24035_v47, %s22613_s26  ;;  %v14722_v31 = vand.u32 4294901760, %v24157_v49 }
0x1611   :  { %v14719_v25 = vand.u32 4294901760, %v24159_v58 }
0x1612   :  { %v14804_v36 = vsub.f32 %v24157_v49, %v14722_v31 }
0x1613   :  { %v14797_v28 = vsub.f32 %v24159_v58, %v14719_v25 }
0x167d   :  { %v14173_v57 = vpop.permute.xlu1 %14172 }
0x167e   :  { %v14177_v7 = vsel %vm1550_vm6, %v24157_v49, %v14173_v57  ;;  %v14171_v14 = vpop.permute.xlu0 %14170  ;;  %v14798_v57 = vand.u32 4294901760, %v14797_v28  ;;  %v21993_v49 = vpack.c.bf16 %v14722_v31, %v14719_v25 }
0x167f   :  { %v14188_v5 = vsel %vm534_vm2, %v14177_v7, 0  ;;  %v14176_v47 = vsel %vm1550_vm6, %v24159_v58, %v14171_v14  ;;  %v14805_v7 = vand.u32 4294901760, %v14804_v36 }
0x1680   :  { %v24166_v45 = vand.u32 4294901760, %v14188_v5  ;;  %v14185_v24 = vsel %vm534_vm2, %v14176_v47, 0  ;;  %v14799_v14 = vsub.f32 %v14797_v28, %v14798_v57 }
0x1681   :  { %v24169_v38 = vand.u32 4294901760, %v14185_v24  ;;  %v14179_v59 = vpop.permute.xlu1 %14178 }
0x1682   :  { %v14270_v27 = vsub.f32 %v14188_v5, %v24166_v45  ;;  %v14191_v1 = vand.u32 4294901760, %v14179_v59  ;;  %v14181_v26 = vpop.permute.xlu0 %14180  ;;  %v14806_v5 = vsub.f32 %v14804_v36, %v14805_v7  ;;  %v14800_v58 = vand.u32 4294901760, %v14799_v14 }
0x1683   :  { %v14260_v4 = vsub.f32 %v14185_v24, %v24169_v38  ;;  %v14194_v44 = vand.u32 4294901760, %v14181_v26 }
0x1684   :  { %v14281_v39 = vsub.f32 %v14179_v59, %v14191_v1  ;;  %v14271_v42 = vand.u32 4294901760, %v14270_v27  ;;  %v14807_v47 = vand.u32 4294901760, %v14806_v5  ;;  %v21999_v59 = vpack.c.bf16 %v14804_v36, %v14797_v28  ;;  %v24729_v28 = vld [vmem:[#allocation45_spill] sm:$0xff] }
0x1685   :  { %v24173_v33 = vpack.c.bf16 %v14194_v44, %v14191_v1  ;;  %v14288_v0 = vsub.f32 %v14181_v26, %v14194_v44  ;;  %v14261_v40 = vand.u32 4294901760, %v14260_v4  ;;  %v22005_v1 = vpack.c.bf16 %v14805_v7, %v14798_v57  ;;  %v24715_v26 = vld [vmem:[#allocation37_spill] sm:$0xff]  ;;  %v24717_v44 = vld [vmem:[#allocation63_spill] sm:$0xff] }
0x1686   :  { %v14282_v18 = vand.u32 4294901760, %v14281_v39  ;;  %v14272_v22 = vsub.f32 %v14270_v27, %v14271_v42  ;;  %v21996_v24 = vpack.c.bf16 %v14807_v47, %v14800_v58 }
0x1687   :  { %v14289_v21 = vand.u32 4294901760, %v14288_v0  ;;  %21945 = vmatprep.subr.bf16.mxu0 %v24173_v33  ;;  %22012 = vmatpush3.bf16.msra.mxu1 %v24173_v33  ;;  %v14262_v54 = vsub.f32 %v14260_v4, %v14261_v40  ;;  %v24187_v11 = vpack.c.bf16 %v14288_v0, %v14281_v39 }
0x1688   :  { %v14283_v56 = vsub.f32 %v14281_v39, %v14282_v18  ;;  %21947 = vmatpush3.bf16.msra.mxu0 %v24173_v33  ;;  %22013 = vmatprep.subr.bf16.mxu1 %v24632_v6  ;;  %v14273_v37 = vand.u32 4294901760, %v14272_v22  ;;  %v24718_v39 = vld [vmem:[#allocation42_spill] sm:$0xff] }
0x1689   :  { %v14290_v2 = vsub.f32 %v14288_v0, %v14289_v21  ;;  %21949 = vmatprep.subr.bf16.mxu0 %v24708_v34  ;;  %v14263_v30 = vand.u32 4294901760, %v14262_v54  ;;  %v24198_v32 = vpack.c.bf16 %v14289_v21, %v14282_v18  ;;  %v24720_v0 = vld [vmem:[#allocation40_spill] sm:$0xff]  ;;  %v24722_v18 = vld [vmem:[#allocation61_spill] sm:$0xff]  ;;  %v24724_v54 = vld [vmem:[#allocation50_spill] sm:$0xff] }
0x168a   :  { %v14284_v8 = vand.u32 4294901760, %v14283_v56  ;;  %v24723_v21 = vld [vmem:[#allocation41_spill] sm:$0xff]  ;;  %v24725_v56 = vld [vmem:[#allocation46_spill] sm:$0xff] }
0x168b   :  { %20626 = vmatprep.mubr.f32.mxu0 %v14263_v30  ;;  %v14291_v9 = vand.u32 4294901760, %v14290_v2  ;;  %v24726_v2 = vld [vmem:[#allocation52_spill] sm:$0xff] }
0x168c   :  { %21951 = vmatpush3.bf16.msra.mxu0 %v24708_v34 }
0x168d   :  { %v24181_v19 = vpack.c.bf16 %v14291_v9, %v14284_v8 }
0x168f   :  { %20627 = vmatmul.mubr.f32.vlgmr.msra.gmra.mrb[40].mxu0 %v14273_v37  ;;  %21953 = vmatprep.subr.bf16.mxu0 %v24181_v19 }
0x1690   :  { %21955 = vmatpush3.bf16.msra.mxu0 %v24181_v19  ;;  %20637 = vmatprep.mubr.f32.mxu0 %v24169_v38 }
0x1691   :  { %21957 = vmatprep.subr.bf16.mxu0 %v24709_v51 }
0x1694   :  { %21959 = vmatpush3.bf16.msra.mxu0 %v24709_v51 }
0x1695   :  { %21961 = vmatprep.subr.bf16.mxu0 %v24187_v11 }
0x1697   :  { %20638 = vmatmul.mubr.f32.vlgmr.msra.gmra.mrb[40].mxu0 %v24166_v45 }
0x1698   :  { %21963 = vmatpush3.bf16.msra.mxu0 %v24187_v11  ;;  %20648 = vmatprep.mubr.f32.mxu0 %v14260_v4  ;;  %v24716_v4 = vld [vmem:[#allocation39_spill] sm:$0xff] }
0x1699   :  { %21965 = vmatprep.subr.bf16.mxu0 %v24710_v62 }
0x169c   :  { %21967 = vmatpush3.bf16.msra.mxu0 %v24710_v62 }
0x169d   :  { %21969 = vmatprep.subr.bf16.mxu0 %v24173_v33 }
0x169f   :  { %20649 = vmatmul.mubr.f32.vlgmr.msra.gmra.mrb[40].mxu0 %v14270_v27  ;;  %v24713_v27 = vld [vmem:[#allocation35_spill] sm:$0xff] }
0x16a0   :  { %21971 = vmatpush3.bf16.msra.mxu0 %v24173_v33  ;;  %20659 = vmatprep.mubr.f32.mxu0 %v14261_v40  ;;  %v24721_v40 = vld [vmem:[#allocation60_spill] sm:$0xff] }
0x16a1   :  { %21973 = vmatprep.subr.bf16.mxu0 %v24708_v34 }
0x16a4   :  { %21975 = vmatpush3.bf16.msra.mxu0 %v24708_v34 }
0x16a5   :  { %21977 = vmatprep.subr.bf16.mxu0 %v24198_v32 }
0x16a7   :  { %20660 = vmatmul.mubr.f32.vlgmr.msra.gmra.mrb[40].mxu0 %v14271_v42  ;;  %v24719_v42 = vld [vmem:[#allocation59_spill] sm:$0xff] }
0x16a8   :  { %21979 = vmatpush3.bf16.msra.mxu0 %v24198_v32  ;;  %20670 = vmatprep.mubr.f32.mxu0 %v24169_v38 }
0x16a9   :  { %21981 = vmatprep.subr.bf16.mxu0 %v24711_v52 }
0x16ac   :  { %21983 = vmatpush3.bf16.msra.mxu0 %v24711_v52  ;;  %v24727_v52 = vld [vmem:[#allocation43_spill] sm:$0xff] }
0x16ad   :  { %21985 = vmatprep.subr.bf16.mxu0 %v24173_v33 }
0x16af   :  { %20671 = vmatmul.mubr.f32.vlgmr.msra.gmra.mrb[40].mxu0 %v24166_v45 }
0x16b0   :  { %21987 = vmatpush3.bf16.msra.mxu0 %v24173_v33  ;;  %20681 = vmatprep.mubr.f32.mxu0 %v24169_v38  ;;  %v24712_v38 = vld [vmem:[#allocation38_spill] sm:$0xff] }
0x16b1   :  { %21989 = vmatprep.subr.bf16.mxu0 %v24708_v34 }
0x16b4   :  { %21991 = vmatpush3.bf16.msra.mxu0 %v24708_v34 }
0x16b5   :  { %21992 = vmatprep.subr.bf16.mxu0 %v24632_v6 }
0x16b7   :  { %20682 = vmatmul.mubr.f32.vlgmr.msra.gmra.mrb[40].mxu0 %v24166_v45  ;;  %v24714_v45 = vld [vmem:[#allocation36_spill] sm:$0xff] }
0x16b8   :  { %21994 = vmatpush3.bf16.msra.mxu0 %v21993_v49  ;;  %20688 = vmatprep.mubr.msk.f32.mxu0 %vm22606_vm3, %v24640_v46 }
0x16b9   :  { %21995 = vmatprep.subr.bf16.mxu0 %v24632_v6 }
0x16bb   :  { %20689 = vmatmul.mubr.f32.vlgmr.msra.gmra.mrb[42].mxu0 %v24712_v38 }
0x16bc   :  { %21997 = vmatpush3.bf16.msra.mxu0 %v21996_v24  ;;  %20695 = vmatprep.mubr.msk.f32.mxu0 %vm22606_vm3, %v24640_v46 }
0x16bd   :  { %21998 = vmatprep.subr.bf16.mxu0 %v24632_v6 }
0x16c3   :  { %20696 = vmatmul.mubr.f32.vlgmr.msra.gmra.mrb[42].mxu0 %v24713_v27 }
0x16c4   :  { %22000 = vmatpush3.bf16.msra.mxu0 %v21999_v59  ;;  %20702 = vmatprep.mubr.msk.f32.mxu0 %vm22606_vm3, %v24640_v46  ;;  %v24730_v59 = vld [vmem:[#allocation53_spill] sm:$0xff] }
0x16c5   :  { %22001 = vmatprep.subr.bf16.mxu0 %v24632_v6 }
0x16cb   :  { %20703 = vmatmul.mubr.f32.vlgmr.msra.gmra.mrb[42].mxu0 %v24714_v45  ;;  %v24732_v45 = vld [vmem:[#allocation49_spill] sm:$0xff] }
0x16cc   :  { %22003 = vmatpush3.bf16.msra.mxu0 %v21993_v49  ;;  %20709 = vmatprep.mubr.msk.f32.mxu0 %vm22606_vm3, %v24640_v46 }
0x16cd   :  { %22004 = vmatprep.subr.bf16.mxu0 %v24632_v6 }
0x16d3   :  { %20710 = vmatmul.mubr.f32.vlgmr.msra.gmra.mrb[42].mxu0 %v24715_v26  ;;  %v24734_v26 = vld [vmem:[#allocation64_spill] sm:$0xff] }
0x16d4   :  { %22006 = vmatpush3.bf16.msra.mxu0 %v22005_v1  ;;  %20716 = vmatprep.mubr.msk.f32.mxu0 %vm22606_vm3, %v24640_v46  ;;  %v24733_v1 = vld [vmem:[#allocation54_spill] sm:$0xff] }
0x16d5   :  { %22007 = vmatprep.subr.bf16.mxu0 %v24632_v6 }
0x16db   :  { %20717 = vmatmul.mubr.f32.vlgmr.msra.gmra.mrb[42].mxu0 %v24713_v27 }
0x16dc   :  { %22009 = vmatpush3.bf16.msra.mxu0 %v21993_v49  ;;  %20723 = vmatprep.mubr.msk.f32.mxu0 %vm22606_vm3, %v24640_v46 }
0x16dd   :  { %20768 = vmatprep.subr.mxu0 %v24640_v46 }
0x16e3   :  { %20724 = vmatmul.mubr.f32.vlgmr.msra.gmra.mrb[42].mxu0 %v24713_v27  ;;  %v24731_v27 = vld [vmem:[#allocation47_spill] sm:$0xff] }
0x16e4   :  { %20769 = vmatpush3.msra.mxu0 %v24716_v4  ;;  %20770 = vmatprep.mubr.msk.f32.mxu0 %vm22606_vm3, %v24640_v46 }
0x16e5   :  { %20773 = vmatprep.subr.mxu0 %v24640_v46 }
0x16e7   :  { %20771 = vmatmul.mubr.f32.vlgmr.msra.gmra.mrb[44].mxu0 %v24717_v44  ;;  %v24736_v44 = vld [vmem:[#allocation65_spill] sm:$0xff] }
0x16e8   :  { %20774 = vmatpush3.msra.mxu0 %v24718_v39  ;;  %20775 = vmatprep.mubr.msk.f32.mxu0 %vm22606_vm3, %v24640_v46  ;;  %v24737_v39 = vld [vmem:[#allocation51_spill] sm:$0xff] }
0x16e9   :  { %20778 = vmatprep.subr.mxu0 %v24640_v46 }
0x16ef   :  { %20776 = vmatmul.mubr.f32.vlgmr.msra.gmra.mrb[44].mxu0 %v24719_v42 }
0x16f0   :  { %20779 = vmatpush3.msra.mxu0 %v24720_v0  ;;  %20780 = vmatprep.mubr.msk.f32.mxu0 %vm22606_vm3, %v24640_v46 }
0x16f1   :  { %20783 = vmatprep.subr.mxu0 %v24640_v46 }
0x16f7   :  { %20781 = vmatmul.mubr.f32.vlgmr.msra.gmra.mrb[44].mxu0 %v24721_v40 }
0x16f8   :  { %20784 = vmatpush3.msra.mxu0 %v24716_v4  ;;  %20785 = vmatprep.mubr.msk.f32.mxu0 %vm22606_vm3, %v24640_v46 }
0x16f9   :  { %20788 = vmatprep.subr.mxu0 %v24640_v46 }
0x16ff   :  { %20786 = vmatmul.mubr.f32.vlgmr.msra.gmra.mrb[44].mxu0 %v24722_v18 }
0x1700   :  { %20789 = vmatpush3.msra.mxu0 %v24723_v21  ;;  %20790 = vmatprep.mubr.msk.f32.mxu0 %vm22606_vm3, %v24640_v46 }
0x1701   :  { %20793 = vmatprep.subr.mxu0 %v24640_v46 }
0x1707   :  { %20791 = vmatmul.mubr.f32.vlgmr.msra.gmra.mrb[44].mxu0 %v24719_v42 }
0x1708   :  { %20794 = vmatpush3.msra.mxu0 %v24716_v4  ;;  %20795 = vmatprep.mubr.msk.f32.mxu0 %vm22606_vm3, %v24640_v46  ;;  %v24735_v4 = vld [vmem:[#allocation48_spill] sm:$0xff] }
0x1709   :  { %22034 = vmatprep.subr.bf16.mxu0 %v24632_v6 }
0x170f   :  { %20796 = vmatmul.mubr.f32.vlgmr.msra.gmra.mrb[44].mxu0 %v24719_v42  ;;  %v24738_v42 = vld [vmem:[#allocation66_spill] sm:$0xff] }
0x1710   :  { %22036 = vmatpush3.bf16.msra.mxu0 %v24724_v54  ;;  %20821 = vmatprep.mubr.msk.f32.mxu0 %vm22606_vm3, %v24640_v46 }
0x1711   :  { %22037 = vmatprep.subr.bf16.mxu0 %v24632_v6 }
0x1714   :  { %22039 = vmatpush3.bf16.msra.mxu0 %v24725_v56 }
0x1715   :  { %20819 = vmatprep.subr.mxu0 %v24640_v46 }
0x1718   :  { %20820 = vmatpush3.msra.mxu0 %v24726_v2 }
0x1719   :  { %22046 = vmatprep.subr.bf16.mxu0 %v24632_v6 }
0x178a   :  { %v24280_v34 = vpop.f32.mrb[40].mxu0 }
0x178b   :  { %v24282_v30 = vpop.f32.mrb[41].mxu0 }
0x17b6   :  { %v15173_v22 = vpop.f32.mrb[42].mxu0 }
0x17b7   :  { %v15178_v8 = vsel %vm1550_vm6, %v15173_v22, 0  ;;  %v20725_v9 = vpop.f32.mrb[43].mxu0 }
0x17b8   :  { %v15247_v37 = vand.u32 4294901760, %v15178_v8 }
0x17ba   :  { %v15248_v51 = vsub.f32 %v15178_v8, %v15247_v37 }
0x17bc   :  { %v15249_v62 = vand.u32 4294901760, %v15248_v51 }
0x17be   :  { %v15250_v25 = vsub.f32 %v15248_v51, %v15249_v62 }
0x17c0   :  { %v15251_v31 = vand.u32 4294901760, %v15250_v25 }
0x17c2   :  { %20731 = vmatmul.mubr.f32.vlgmr.msra.gmra.mrb[28].mxu1 %v15251_v31 }
0x17c3   :  { %22015 = vmatpush3.bf16.msra.mxu1 %v24181_v19  ;;  %20737 = vmatprep.mubr.msk.f32.mxu1 %vm22606_vm3, %v24640_v46 }
0x17c4   :  { %22016 = vmatprep.subr.bf16.mxu1 %v24632_v6 }
0x17ca   :  { %20738 = vmatmul.mubr.f32.vlgmr.msra.gmra.mrb[28].mxu1 %v15247_v37 }
0x17cb   :  { %22018 = vmatpush3.bf16.msra.mxu1 %v24187_v11  ;;  %20744 = vmatprep.mubr.msk.f32.mxu1 %vm22606_vm3, %v24640_v46 }
0x17cc   :  { %22019 = vmatprep.subr.bf16.mxu1 %v24632_v6 }
0x17d2   :  { %20745 = vmatmul.mubr.f32.vlgmr.msra.gmra.mrb[28].mxu1 %v15248_v51 }
0x17d3   :  { %22021 = vmatpush3.bf16.msra.mxu1 %v24173_v33  ;;  %20751 = vmatprep.mubr.msk.f32.mxu1 %vm22606_vm3, %v24640_v46 }
0x17d4   :  { %22022 = vmatprep.subr.bf16.mxu1 %v24632_v6 }
0x17da   :  { %20752 = vmatmul.mubr.f32.vlgmr.msra.gmra.mrb[28].mxu1 %v15249_v62 }
0x17db   :  { %22024 = vmatpush3.bf16.msra.mxu1 %v24198_v32  ;;  %20758 = vmatprep.mubr.msk.f32.mxu1 %vm22606_vm3, %v24640_v46  ;;  %v24728_v32 = vld [vmem:[#allocation44_spill] sm:$0xff] }
0x17dc   :  { %22025 = vmatprep.subr.bf16.mxu1 %v24632_v6 }
0x17e2   :  { %20759 = vmatmul.mubr.f32.vlgmr.msra.gmra.mrb[28].mxu1 %v15247_v37  ;;  %v16081_v19 = vpop.f32.mrb[44].mxu0 }
0x17e3   :  { %22027 = vmatpush3.bf16.msra.mxu1 %v24173_v33  ;;  %v20797_v11 = vpop.f32.mrb[45].mxu0  ;;  %20765 = vmatprep.mubr.msk.f32.mxu1 %vm22606_vm3, %v24640_v46  ;;  %v16085_v57 = vmax.f32 %v16081_v19, 0.0 }
0x17e4   :  { %22028 = vmatprep.subr.bf16.mxu1 %v24632_v6 }
0x17ea   :  { %20766 = vmatmul.mubr.f32.vlgmr.msra.gmra.mrb[28].mxu1 %v15247_v37 }
0x17eb   :  { %22030 = vmatpush3.bf16.msra.mxu1 %v24727_v52  ;;  %20808 = vmatprep.mubr.msk.f32.mxu1 %vm22606_vm3, %v24640_v46 }
0x17ec   :  { %22031 = vmatprep.subr.bf16.mxu1 %v24632_v6 }
0x17ef   :  { %22033 = vmatpush3.bf16.msra.mxu1 %v24728_v32 }
0x17f0   :  { %20806 = vmatprep.subr.mxu1 %v24640_v46 }
0x17f3   :  { %20807 = vmatpush3.msra.mxu1 %v24729_v28 }
0x17f4   :  { %22040 = vmatprep.subr.bf16.mxu1 %v24632_v6 }
0x18bd   :  { %v15635_v33 = vpop.f32.mrb[28].mxu1 }
0x18be   :  { %16087 = vrot.lane.b32.xlu1 %v15635_v33, %s22616_s18  ;;  %v20767_v36 = vpop.f32.mrb[29].mxu1  ;;  %v24741_v33 = vld [vmem:[#allocation72_spill] sm:$0xff] }
0x1930   :  { %v16088_v7 = vpop.permute.xlu1 %16087 }
0x1931   :  { %v16090_v14 = vsel %vm7894_vm7, %v16085_v57, %v16088_v7  ;;  %v24742_v57 = vld [vmem:[#allocation2_spill] sm:$0xff] }
0x1932   :  { %v16092_v5 = vsel %vm8349_vm8, %v16090_v14, 0 }
0x1933   :  { %v16164_v49 = vand.u32 4294901760, %v16092_v5 }
0x1935   :  { %v16165_v58 = vsub.f32 %v16092_v5, %v16164_v49  ;;  %20822 = vmatmul.mubr.f32.vlgmr.msra.gmra.mrb[46].mxu0 %v16164_v49 }
0x1936   :  { %22048 = vmatpush3.bf16.msra.mxu0 %v24727_v52  ;;  %20847 = vmatprep.mubr.msk.f32.mxu0 %vm22606_vm3, %v24640_v46 }
0x1937   :  { %v16166_v47 = vand.u32 4294901760, %v16165_v58  ;;  %22049 = vmatprep.subr.bf16.mxu0 %v24632_v6 }
0x1939   :  { %v16167_v24 = vsub.f32 %v16165_v58, %v16166_v47 }
0x193a   :  { %22051 = vmatpush3.bf16.msra.mxu0 %v24728_v32 }
0x193b   :  { %20845 = vmatprep.subr.mxu0 %v24640_v46  ;;  %v16168_v38 = vand.u32 4294901760, %v16167_v24  ;;  %v24743_v24 = vld [vmem:[#allocation62_spill] sm:$0xff] }
0x193d   :  { %20809 = vmatmul.mubr.f32.vlgmr.msra.gmra.mrb[30].mxu1 %v16168_v38  ;;  %v24744_v38 = vld [vmem:[#allocation56_spill] sm:$0xff] }
0x193e   :  { %22042 = vmatpush3.bf16.msra.mxu1 %v24730_v59  ;;  %20846 = vmatpush3.msra.mxu0 %v24729_v28  ;;  %v24745_v59 = vld [vmem:[#allocation58_spill] sm:$0xff] }
0x193f   :  { %20848 = vmatmul.mubr.f32.vlgmr.msra.gmra.mrb[48].mxu0 %v16166_v47  ;;  %22058 = vmatprep.subr.bf16.mxu0 %v24632_v6 }
0x1940   :  { %22060 = vmatpush3.bf16.msra.mxu0 %v24727_v52  ;;  %22043 = vmatprep.subr.bf16.mxu1 %v24632_v6  ;;  %v24740_v52 = vld [vmem:[#allocation57_spill] sm:$0xff] }
0x1941   :  { %22061 = vmatprep.subr.bf16.mxu0 %v24632_v6  ;;  %20834 = vmatprep.mubr.msk.f32.mxu1 %vm22606_vm3, %v24640_v46 }
0x1942   :  { %22045 = vmatpush3.bf16.msra.mxu1 %v24731_v27  ;;  %20873 = vmatprep.mubr.msk.f32.mxu0 %vm22606_vm3, %v24640_v46  ;;  %v17051_v27 = vadd.f32 %v24280_v34, %v23999_v41 }
0x1943   :  { %20832 = vmatprep.subr.mxu1 %v24640_v46 }
0x1944   :  { %22063 = vmatpush3.bf16.msra.mxu0 %v24728_v32 }
0x1945   :  { %20871 = vmatprep.subr.mxu0 %v24640_v46 }
0x1946   :  { %20833 = vmatpush3.msra.mxu1 %v24732_v45  ;;  %v17050_v45 = vadd.f32 %v24282_v30, %v24002_v53 }
0x1947   :  { %20835 = vmatmul.mubr.f32.vlgmr.msra.gmra.mrb[32].mxu1 %v16165_v58  ;;  %22052 = vmatprep.subr.bf16.mxu1 %v24632_v6 }
0x1948   :  { %22054 = vmatpush3.bf16.msra.mxu1 %v24733_v1  ;;  %20872 = vmatpush3.msra.mxu0 %v24729_v28 }
0x1949   :  { %20874 = vmatmul.mubr.f32.vlgmr.msra.gmra.mrb[50].mxu0 %v16164_v49  ;;  %22055 = vmatprep.subr.bf16.mxu1 %v24632_v6  ;;  %v24739_v6 = vld [vmem:[#allocation55_spill] sm:$0xff] }
0x194a   :  { %20860 = vmatprep.mubr.msk.f32.mxu1 %vm22606_vm3, %v24640_v46  ;;  %22065 = vmatprep.subr.bf16.mxu0 %v24734_v26 }
0x194b   :  { %22067 = vmatpush3.bf16.msra.mxu0 %v24734_v26 }
0x194c   :  { %22057 = vmatpush3.bf16.msra.mxu1 %v24735_v4  ;;  %22069 = vmatprep.subr.bf16.mxu0 %v24736_v44 }
0x194d   :  { %20858 = vmatprep.subr.mxu1 %v24640_v46 }
0x194f   :  { %22071 = vmatpush3.bf16.msra.mxu0 %v24736_v44 }
0x1950   :  { %20859 = vmatpush3.msra.mxu1 %v24737_v39  ;;  %22073 = vmatprep.subr.bf16.mxu0 %v24738_v42 }
0x1951   :  { %20861 = vmatmul.mubr.f32.vlgmr.msra.gmra.mrb[34].mxu1 %v16164_v49  ;;  %20876 = vmatprep.subr.mxu1 %v24640_v46 }
0x1952   :  { %20877 = vmatpush3.msra.mxu1 %v24739_v6  ;;  %20878 = vmatprep.mubr.msk.f32.mxu1 %vm22606_vm3, %v24640_v46 }
0x1953   :  { %20881 = vmatprep.subr.mxu1 %v24640_v46 }
0x1a08   :  { %v16266_v0 = vpop.f32.mrb[46].mxu0 }
0x1a09   :  { %v20823_v40 = vpop.f32.mrb[47].mxu0 }
0x1a10   :  { %v16170_v18 = vpop.f32.mrb[30].mxu1 }
0x1a11   :  { %v16267_v21 = vadd.f32 %v16266_v0, %v16170_v18  ;;  %v20810_v54 = vpop.f32.mrb[31].mxu1 }
0x1a12   :  { %v16426_v56 = vpop.f32.mrb[48].mxu0 }
0x1a13   :  { %v20849_v2 = vpop.f32.mrb[49].mxu0 }
0x1a1a   :  { %v16348_v22 = vpop.f32.mrb[32].mxu1 }
0x1a1b   :  { %v16349_v8 = vadd.f32 %v16348_v22, %v16267_v21  ;;  %v20836_v9 = vpop.f32.mrb[33].mxu1 }
0x1a1c   :  { %v16588_v37 = vpop.f32.mrb[50].mxu0  ;;  %v24746_v9 = vld [vmem:[#allocation67_spill] sm:$0xff] }
0x1a1d   :  { %v20875_v51 = vpop.f32.mrb[51].mxu0  ;;  %v16427_v62 = vadd.f32 %v16426_v56, %v16349_v8 }
0x1a1e   :  { %v24748_v51 = vld [vmem:[#allocation69_spill] sm:$0xff] }
0x1a24   :  { %v16512_v25 = vpop.f32.mrb[34].mxu1 }
0x1a25   :  { %v16513_v31 = vadd.f32 %v16512_v25, %v16427_v62  ;;  %v20862_v19 = vpop.f32.mrb[35].mxu1  ;;  %v24750_v62 = vld [vmem:[#allocation71_spill] sm:$0xff] }
0x1a27   :  { %v16589_v11 = vadd.f32 %v16588_v37, %v16513_v31  ;;  %v24747_v37 = vld [vmem:[#allocation68_spill] sm:$0xff] }
0x1a29   :  { %v16592_v32 = vadd.f32 %v16589_v11, %v24740_v52 }
0x1a2b   :  { %v16594_v28 = vsel %vm7894_vm7, %v16592_v32, 0  ;;  %v18187_v36 = vrot.slane %v16592_v32, %v24741_v33  ;;  %v18183_v7 = vrot.slane %v16592_v32, %v24742_v57 }
0x1a2c   :  { %v16662_v14 = vand.u32 4294901760, %v16594_v28 }
0x1a2d   :  { %18192 = vrot.lane.b32.xlu1 %v18187_v36, %s22610_s12  ;;  %18190 = vrot.lane.b32.xlu0 %v18183_v7, %s22610_s12 }
0x1a2e   :  { %v16663_v5 = vsub.f32 %v16594_v28, %v16662_v14 }
0x1a30   :  { %v16664_v49 = vand.u32 4294901760, %v16663_v5 }
0x1a32   :  { %v16665_v58 = vsub.f32 %v16663_v5, %v16664_v49 }
0x1a34   :  { %v16666_v47 = vand.u32 4294901760, %v16665_v58 }
0x1a36   :  { %20879 = vmatmul.mubr.f32.vlgmr.msra.gmra.mrb[36].mxu1 %v16666_v47 }
0x1a37   :  { %20882 = vmatpush3.msra.mxu1 %v24743_v24  ;;  %20883 = vmatprep.mubr.msk.f32.mxu1 %vm22606_vm3, %v24640_v46 }
0x1a38   :  { %20886 = vmatprep.subr.mxu1 %v24640_v46 }
0x1a3e   :  { %20884 = vmatmul.mubr.f32.vlgmr.msra.gmra.mrb[36].mxu1 %v16662_v14 }
0x1a3f   :  { %20887 = vmatpush3.msra.mxu1 %v24744_v38  ;;  %20888 = vmatprep.mubr.msk.f32.mxu1 %vm22606_vm3, %v24640_v46 }
0x1a40   :  { %20891 = vmatprep.subr.mxu1 %v24640_v46 }
0x1a46   :  { %20889 = vmatmul.mubr.f32.vlgmr.msra.gmra.mrb[36].mxu1 %v16663_v5 }
0x1a47   :  { %20892 = vmatpush3.msra.mxu1 %v24739_v6  ;;  %20893 = vmatprep.mubr.msk.f32.mxu1 %vm22606_vm3, %v24640_v46 }
0x1a48   :  { %20896 = vmatprep.subr.mxu1 %v24640_v46 }
0x1a4e   :  { %20894 = vmatmul.mubr.f32.vlgmr.msra.gmra.mrb[36].mxu1 %v16664_v49 }
0x1a4f   :  { %20897 = vmatpush3.msra.mxu1 %v24745_v59  ;;  %20898 = vmatprep.mubr.msk.f32.mxu1 %vm22606_vm3, %v24640_v46 }
0x1a50   :  { %20901 = vmatprep.subr.mxu1 %v24640_v46 }
0x1a56   :  { %20899 = vmatmul.mubr.f32.vlgmr.msra.gmra.mrb[36].mxu1 %v16662_v14 }
0x1a57   :  { %20902 = vmatpush3.msra.mxu1 %v24739_v6  ;;  %20903 = vmatprep.mubr.msk.f32.mxu1 %vm22606_vm3, %v24640_v46 }
0x1a58   :  { %22113 = vmatprep.subr.bf16.mxu1 %v23720_v20 }
0x1a5e   :  { %20904 = vmatmul.mubr.f32.vlgmr.msra.gmra.mrb[36].mxu1 %v16662_v14 }
0x1a5f   :  { %22115 = vmatpush3.bf16.msra.mxu1 %v23720_v20 }
0x1a60   :  { %22117 = vmatprep.subr.bf16.mxu1 %v23781_v12 }
0x1a63   :  { %22119 = vmatpush3.bf16.msra.mxu1 %v23781_v12 }
0x1a64   :  { %22121 = vmatprep.subr.bf16.mxu1 %v23791_v60 }
0x1a67   :  { %22123 = vmatpush3.bf16.msra.mxu1 %v23791_v60 }
0x1a68   :  { %22125 = vmatprep.subr.bf16.mxu1 %v23807_v3 }
0x1a6b   :  { %22127 = vmatpush3.bf16.msra.mxu1 %v23807_v3 }
0x1a6c   :  { %22129 = vmatprep.subr.bf16.mxu1 %v23811_v23 }
0x1b31   :  { %v17038_v46 = vpop.f32.mrb[36].mxu1 }
0x1b32   :  { %v17045_v1 = vrot.slane %v17038_v46, %v24742_v57  ;;  %v17049_v4 = vrot.slane %v17038_v46, %v24741_v33  ;;  %v20905_v39 = vpop.f32.mrb[37].mxu1 }
0x1b34   :  { %v24396_v6 = vadd.f32 %v17050_v45, %v17045_v1  ;;  %v24398_v0 = vadd.f32 %v17051_v27, %v17049_v4 }
0x1b36   :  { %v17055_v40 = vsel %vm534_vm2, %v24396_v6, 0  ;;  %v17058_v18 = vsel %vm534_vm2, %v24398_v0, 0 }
0x1b37   :  { %v17129_v21 = vand.u32 4294901760, %v17055_v40  ;;  %v17139_v41 = vand.u32 4294901760, %v17058_v18 }
0x1b39   :  { %v17130_v34 = vsub.f32 %v17055_v40, %v17129_v21  ;;  %v17140_v54 = vsub.f32 %v17058_v18, %v17139_v41 }
0x1b3b   :  { %v17131_v53 = vand.u32 4294901760, %v17130_v34  ;;  %v17141_v30 = vand.u32 4294901760, %v17140_v54 }
0x1b3d   :  { %v17132_v56 = vsub.f32 %v17130_v34, %v17131_v53  ;;  %v17142_v2 = vsub.f32 %v17140_v54, %v17141_v30 }
0x1b3f   :  { %v17133_v22 = vand.u32 4294901760, %v17132_v56  ;;  %v17143_v8 = vand.u32 4294901760, %v17142_v2 }
0x1b41   :  { %20914 = vmatprep.mubr.f32.mxu0 %v17133_v22 }
0x1b42   :  { %20915 = vmatmul.mubr.f32.vlgmr.msra.gmra.mrb[52].mxu0 %v17143_v8 }
0x1b43   :  { %22075 = vmatpush3.bf16.msra.mxu0 %v24738_v42  ;;  %20925 = vmatprep.mubr.f32.mxu0 %v17129_v21  ;;  %v24749_v42 = vld [vmem:[#allocation70_spill] sm:$0xff] }
0x1b44   :  { %22077 = vmatprep.subr.bf16.mxu0 %v24746_v9 }
0x1b47   :  { %22079 = vmatpush3.bf16.msra.mxu0 %v24746_v9 }
0x1b48   :  { %22081 = vmatprep.subr.bf16.mxu0 %v24747_v37 }
0x1b4a   :  { %20926 = vmatmul.mubr.f32.vlgmr.msra.gmra.mrb[52].mxu0 %v17139_v41 }
0x1b4b   :  { %22083 = vmatpush3.bf16.msra.mxu0 %v24747_v37  ;;  %20936 = vmatprep.mubr.f32.mxu0 %v17130_v34 }
0x1b4c   :  { %22085 = vmatprep.subr.bf16.mxu0 %v24748_v51 }
0x1b4f   :  { %22087 = vmatpush3.bf16.msra.mxu0 %v24748_v51 }
0x1b50   :  { %22089 = vmatprep.subr.bf16.mxu0 %v24734_v26 }
0x1b52   :  { %20937 = vmatmul.mubr.f32.vlgmr.msra.gmra.mrb[52].mxu0 %v17140_v54 }
0x1b53   :  { %22091 = vmatpush3.bf16.msra.mxu0 %v24734_v26  ;;  %20947 = vmatprep.mubr.f32.mxu0 %v17131_v53 }
0x1b54   :  { %22093 = vmatprep.subr.bf16.mxu0 %v24736_v44 }
0x1b57   :  { %22095 = vmatpush3.bf16.msra.mxu0 %v24736_v44 }
0x1b58   :  { %22097 = vmatprep.subr.bf16.mxu0 %v24749_v42 }
0x1b5a   :  { %20948 = vmatmul.mubr.f32.vlgmr.msra.gmra.mrb[52].mxu0 %v17141_v30 }
0x1b5b   :  { %22099 = vmatpush3.bf16.msra.mxu0 %v24749_v42  ;;  %20958 = vmatprep.mubr.f32.mxu0 %v17129_v21 }
0x1b5c   :  { %22101 = vmatprep.subr.bf16.mxu0 %v24750_v62 }
0x1b5f   :  { %22103 = vmatpush3.bf16.msra.mxu0 %v24750_v62 }
0x1b60   :  { %22105 = vmatprep.subr.bf16.mxu0 %v24734_v26 }
0x1b62   :  { %20959 = vmatmul.mubr.f32.vlgmr.msra.gmra.mrb[52].mxu0 %v17139_v41 }
0x1b63   :  { %22107 = vmatpush3.bf16.msra.mxu0 %v24734_v26  ;;  %20969 = vmatprep.mubr.f32.mxu0 %v17129_v21 }
0x1b64   :  { %22109 = vmatprep.subr.bf16.mxu0 %v24736_v44 }
0x1b67   :  { %22111 = vmatpush3.bf16.msra.mxu0 %v24736_v44 }
0x1b6a   :  { %20970 = vmatmul.mubr.f32.vlgmr.msra.gmra.mrb[52].mxu0 %v17139_v41 }
0x1c3d   :  { %v20971_v25 = vpop.f32.mrb[52].mxu0 }
0x1c3e   :  { %v17589_v31 = vmax.f32 %v20971_v25, 0.0  ;;  %v17578_v19 = vpop.f32.mrb[53].mxu0 }
0x1c3f   :  { %v17588_v11 = vmax.f32 %v17578_v19, 0.0 }
0x1c40   :  { %v17594_v52 = vsel %vm9849_vm9, %v17589_v31, 0 }
0x1c41   :  { %v17679_v32 = vand.u32 4294901760, %v17594_v52  ;;  %v17591_v28 = vsel %vm9849_vm9, %v17588_v11, 0 }
0x1c42   :  { %v17669_v33 = vand.u32 4294901760, %v17591_v28 }
0x1c43   :  { %v17680_v36 = vsub.f32 %v17594_v52, %v17679_v32 }
0x1c44   :  { %v17670_v57 = vsub.f32 %v17591_v28, %v17669_v33 }
0x1c45   :  { %v17681_v7 = vand.u32 4294901760, %v17680_v36 }
0x1c46   :  { %v17671_v26 = vand.u32 4294901760, %v17670_v57 }
0x1c47   :  { %v17682_v14 = vsub.f32 %v17680_v36, %v17681_v7 }
0x1c48   :  { %v17672_v5 = vsub.f32 %v17670_v57, %v17671_v26 }
0x1c49   :  { %v17683_v58 = vand.u32 4294901760, %v17682_v14 }
0x1c4a   :  { %v17673_v49 = vand.u32 4294901760, %v17672_v5 }
0x1c4c   :  { %20988 = vmatprep.mubr.f32.mxu1 %v17673_v49 }
0x1c4d   :  { %20989 = vmatmul.mubr.f32.vlgmr.msra.gmra.mrb[38].mxu1 %v17683_v58 }
0x1c4e   :  { %22131 = vmatpush3.bf16.msra.mxu1 %v23811_v23  ;;  %21007 = vmatprep.mubr.f32.mxu1 %v17669_v33 }
0x1c4f   :  { %22133 = vmatprep.subr.bf16.mxu1 %v23814_v16 }
0x1c52   :  { %22135 = vmatpush3.bf16.msra.mxu1 %v23814_v16 }
0x1c53   :  { %22137 = vmatprep.subr.bf16.mxu1 %v23816_v55 }
0x1c56   :  { %22139 = vmatpush3.bf16.msra.mxu1 %v23816_v55 }
0x1c57   :  { %22141 = vmatprep.subr.bf16.mxu1 %v23818_v63 }
0x1c5a   :  { %22143 = vmatpush3.bf16.msra.mxu1 %v23818_v63 }
0x1c5b   :  { %22145 = vmatprep.subr.bf16.mxu1 %v23820_v48 }
0x1c5d   :  { %21008 = vmatmul.mubr.f32.vlgmr.msra.gmra.mrb[38].mxu1 %v17679_v32 }
0x1c5e   :  { %22147 = vmatpush3.bf16.msra.mxu1 %v23820_v48  ;;  %21026 = vmatprep.mubr.f32.mxu1 %v17670_v57  ;;  %v18193_v48 = vpop.permute.xlu1 %18192 }
0x1c5f   :  { %22149 = vmatprep.subr.bf16.mxu1 %v23822_v50 }
0x1c62   :  { %22151 = vmatpush3.bf16.msra.mxu1 %v23822_v50  ;;  %v18191_v50 = vpop.permute.xlu0 %18190 }
0x1c63   :  { %22153 = vmatprep.subr.bf16.mxu1 %v23824_v15 }
0x1c66   :  { %22155 = vmatpush3.bf16.msra.mxu1 %v23824_v15 }
0x1c67   :  { %22157 = vmatprep.subr.bf16.mxu1 %v23826_v10 }
0x1c6a   :  { %22159 = vmatpush3.bf16.msra.mxu1 %v23826_v10 }
0x1c6b   :  { %22161 = vmatprep.subr.bf16.mxu1 %v23720_v20 }
0x1c6d   :  { %21027 = vmatmul.mubr.f32.vlgmr.msra.gmra.mrb[38].mxu1 %v17680_v36 }
0x1c6e   :  { %22163 = vmatpush3.bf16.msra.mxu1 %v23720_v20  ;;  %21045 = vmatprep.mubr.f32.mxu1 %v17671_v26 }
0x1c6f   :  { %22165 = vmatprep.subr.bf16.mxu1 %v23781_v12 }
0x1c72   :  { %22167 = vmatpush3.bf16.msra.mxu1 %v23781_v12 }
0x1c73   :  { %22169 = vmatprep.subr.bf16.mxu1 %v23791_v60 }
0x1c76   :  { %22171 = vmatpush3.bf16.msra.mxu1 %v23791_v60 }
0x1c77   :  { %22173 = vmatprep.subr.bf16.mxu1 %v23807_v3 }
0x1c7a   :  { %22175 = vmatpush3.bf16.msra.mxu1 %v23807_v3 }
0x1c7b   :  { %22177 = vmatprep.subr.bf16.mxu1 %v23828_v43 }
0x1c7d   :  { %21046 = vmatmul.mubr.f32.vlgmr.msra.gmra.mrb[38].mxu1 %v17681_v7 }
0x1c7e   :  { %22179 = vmatpush3.bf16.msra.mxu1 %v23828_v43  ;;  %21064 = vmatprep.mubr.f32.mxu1 %v17669_v33 }
0x1c7f   :  { %22181 = vmatprep.subr.bf16.mxu1 %v23830_v35 }
0x1c82   :  { %22183 = vmatpush3.bf16.msra.mxu1 %v23830_v35 }
0x1c83   :  { %22185 = vmatprep.subr.bf16.mxu1 %v23832_v17 }
0x1c86   :  { %22187 = vmatpush3.bf16.msra.mxu1 %v23832_v17 }
0x1c87   :  { %22189 = vmatprep.subr.bf16.mxu1 %v23834_v13 }
0x1c8a   :  { %22191 = vmatpush3.bf16.msra.mxu1 %v23834_v13 }
0x1c8b   :  { %22193 = vmatprep.subr.bf16.mxu1 %v23720_v20 }
0x1c8d   :  { %21065 = vmatmul.mubr.f32.vlgmr.msra.gmra.mrb[38].mxu1 %v17679_v32 }
0x1c8e   :  { %22195 = vmatpush3.bf16.msra.mxu1 %v23720_v20  ;;  %21083 = vmatprep.mubr.f32.mxu1 %v17669_v33 }
0x1c8f   :  { %22197 = vmatprep.subr.bf16.mxu1 %v23781_v12 }
0x1c92   :  { %22199 = vmatpush3.bf16.msra.mxu1 %v23781_v12 }
0x1c93   :  { %22201 = vmatprep.subr.bf16.mxu1 %v23791_v60 }
0x1c96   :  { %22203 = vmatpush3.bf16.msra.mxu1 %v23791_v60 }
0x1c97   :  { %22205 = vmatprep.subr.bf16.mxu1 %v23807_v3 }
0x1c9a   :  { %22207 = vmatpush3.bf16.msra.mxu1 %v23807_v3 }
0x1c9d   :  { %21084 = vmatmul.mubr.f32.vlgmr.msra.gmra.mrb[38].mxu1 %v17679_v32 }
0x1d70   :  { %v21085_v23 = vpop.f32.mrb[38].mxu1 }
0x1d71   :  { %v18177_v55 = vadd.f32 %v21085_v23, %v24398_v0  ;;  %v18166_v16 = vpop.f32.mrb[39].mxu1 }
0x1d72   :  { %v18176_v20 = vadd.f32 %v18166_v16, %v24396_v6 }
0x1d73   :  { %v18179_v63 = vmul.f32 %v18177_v55, %v23992_v61 }
0x1d74   :  { %v18178_v12 = vmul.f32 %v18176_v20, %v23995_v29 }
0x1d75   :  { %v18197_v15 = vsel %vm534_vm2, %v18179_v63, %v18193_v48 }
0x1d76   :  { %v18199_v60 = vsel %vm8349_vm8, %v18197_v15, 0.0  ;;  %v18196_v10 = vsel %vm534_vm2, %v18178_v12, %v18191_v50 }
0x1d77   :  { %18205 = vst [vmem:[%s24480_s2 + $0x28] sm:$0xff] %v18199_v60  ;;  %v18198_v3 = vsel %vm8349_vm8, %v18196_v10, 0.0 }
0x1d78   :  { %18204 = vst [vmem:[%s24480_s2 + $0x20] sm:$0xff] %v18198_v3 }

</bundles_post_ra>
